<compile_context>
chip_gen: v7x
topology: tpu7x:2x2x1
jax: 0.10.0
libtpu: 0.0.40
codegen_flags: <defaults>
</compile_context>

<pallas_src>
import functools
import numpy as np
import jax
import jax.numpy as jnp
from jax.experimental import pallas as pl
from jax.experimental.pallas import tpu as pltpu

SEM_DIM = 300


def _round_up(x, m):
    return ((x + m - 1) // m) * m


def _detect_single_buffer_support():
    """One-time import probe: can constant-index weight blocks be single-buffered?"""
    if not hasattr(pl, "Buffered"):
        return False
    try:
        wspec = pl.BlockSpec((8, 128), lambda i: (0, 0), pipeline_mode=pl.Buffered(1))
    except TypeError:
        return False
    try:
        def _k(w_ref, x_ref, o_ref):
            o_ref[...] = x_ref[...] + w_ref[...]
        out = pl.pallas_call(
            _k,
            grid_spec=pltpu.PrefetchScalarGridSpec(
                num_scalar_prefetch=0,
                grid=(2,),
                in_specs=[wspec, pl.BlockSpec((8, 128), lambda i: (i, 0))],
                out_specs=pl.BlockSpec((8, 128), lambda i: (i, 0)),
            ),
            out_shape=jax.ShapeDtypeStruct((16, 128), jnp.float32),
        )(jnp.ones((8, 128), jnp.float32), jnp.zeros((16, 128), jnp.float32))
        jax.block_until_ready(out)
        return True
    except Exception:
        # Narrow purpose: any failure here only means "use default double buffering".
        return False


_SINGLE_BUFFER_WEIGHTS = _detect_single_buffer_support()


def _support_calibrator_kernel(
    sf_ref, ss_ref, bw_ref, bsm_ref,
    wm1_ref, bm1_ref, wm2_ref, bm2_ref,
    wfuse_v_ref, wfuse_s_ref, bfuse_ref,
    wq_ref, wqs_ref, wk_ref, wks_ref, wv_ref, wfc_ref,
    out_ref, attn_ref,
    *, inv_temperature, n_base_real,
):
    f32 = jnp.float32
    bf16 = jnp.bfloat16
    ep, nway, feat = sf_ref.shape
    _, nb_pad, sem_pad = bsm_ref.shape

    sf = sf_ref[...].reshape(ep * nway, feat)            # queries / residual
    ss = ss_ref[...].reshape(ep * nway, sem_pad)
    bw = bw_ref[...]                                      # (ep, nb_pad, feat) base visual memory
    bw_flat = bw.reshape(ep * nb_pad, feat)
    bsm = bsm_ref[...].reshape(ep * nb_pad, sem_pad)

    def mm(x, w_ref):
        # bf16 x bf16 on the MXU, f32 accumulation.
        return jnp.dot(x.astype(w_ref.dtype), w_ref[...], preferred_element_type=f32)

    def map_sem(x):
        h = mm(x, wm1_ref) + bm1_ref[...]
        h = jnp.where(h >= 0, h, 0.1 * h)                 # LeakyReLU(0.1)
        # TODO(synk): Dropout(0.1) inside map_sem is identity at inference time.
        return mm(h, wm2_ref) + bm2_ref[...]

    ss_c = map_sem(ss)                                    # (ep*nway, sem_pad)
    bs_c = map_sem(bsm).reshape(ep, nb_pad, sem_pad)      # (ep, nb_pad, sem_pad)

    # Zero padded base-class rows (map_sem's bias would otherwise leak into the episode mean).
    base_row = jax.lax.broadcasted_iota(jnp.int32, (ep, nb_pad, 1), 1)
    bs_c = jnp.where(base_row < n_base_real, bs_c, 0.0)

    # Episode means over the TRUE number of base classes.
    inv_nb = 1.0 / n_base_real
    avg_vis = jnp.sum(bw, axis=1) * inv_nb                # (ep, feat)
    avg_sem = jnp.sum(bs_c, axis=1) * inv_nb              # (ep, sem_pad)

    # Fused [task_visfuse | task_semfuse] gate projection (weights concatenated along N).
    gates = jax.nn.sigmoid(mm(avg_vis, wfuse_v_ref) + mm(avg_sem, wfuse_s_ref)
                           + bfuse_ref[...]) + 1.0        # (ep, feat + sem_pad)
    gate_vis = gates[:, :feat]
    gate_sem = gates[:, feat:]

    bw_g = (bw * gate_vis[:, None, :]).reshape(ep * nb_pad, feat)
    bs_g = (bs_c * gate_sem[:, None, :]).reshape(ep * nb_pad, sem_pad)

    # MultiHeadAttention(n_head=1): q from support, k from gated base, v from UNgated base vis.
    q2 = mm(sf, wq_ref) + mm(ss_c, wqs_ref)               # (ep*nway, dk)
    k2 = mm(bw_g, wk_ref) + mm(bs_g, wks_ref)             # (ep*nb_pad, dk)
    v = mm(bw_flat, wv_ref)                               # (ep*nb_pad, dv)

    q3 = q2.reshape(ep, nway, q2.shape[-1]).astype(bf16)
    k3 = k2.reshape(ep, nb_pad, k2.shape[-1]).astype(bf16)
    v3 = v.reshape(ep, nb_pad, v.shape[-1]).astype(bf16)

    score = jnp.einsum("eqd,ekd->eqk", q3, k3,
                       preferred_element_type=f32) * inv_temperature    # (ep, nway, nb_pad)

    # Softmax over the base-class axis; padded key columns are masked out.
    col = jax.lax.broadcasted_iota(jnp.int32, score.shape, 2)
    masked = jnp.where(col < n_base_real, score, -1e30)
    m = jnp.max(masked, axis=-1, keepdims=True)
    e = jnp.exp(masked - m)
    l = jnp.sum(e, axis=-1, keepdims=True)
    attn = e * pl.reciprocal(l, approx=True)
    # TODO(synk): attention Dropout(0.1) and post-fc Dropout(0.1) are identity at inference.

    ctx = jnp.einsum("eqk,ekd->eqd", attn.astype(bf16), v3,
                     preferred_element_type=f32)                         # (ep, nway, dv)
    out = mm(ctx.reshape(ep * nway, ctx.shape[-1]), wfc_ref) + sf        # fc (no bias) + residual

    out_ref[...] = out.reshape(ep, nway, feat).astype(out_ref.dtype)
    attn_ref[...] = score.astype(attn_ref.dtype)   # raw post-temperature, pre-softmax score


@functools.partial(jax.jit, static_argnames=("nway",))
def support_calibrator(support_feat, base_weights, support_seman, base_seman, params, nway):
    f32, bf16 = jnp.float32, jnp.bfloat16
    n_bs, n_base_cls, feat_dim = base_weights.shape
    sem_dim = support_seman.shape[-1]
    assert support_feat.shape == (n_bs, nway, feat_dim)

    sem_pad = _round_up(sem_dim, 128)              # 300 -> 384: lane-aligned
    nb_pad = _round_up(n_base_cls, 8)              # sublane-aligned key rows
    # Episode tile: >= 2 grid steps when n_bs >= 2 (feeds both v7x TensorCores), capped at 16.
    ep_tile = max(1, min(16, -(-n_bs // 2)))
    n_bs_pad = _round_up(n_bs, ep_tile)
    grid = n_bs_pad // ep_tile

    # ---- parameter packing: pad the 300-dim to 384, fuse the two gate Linears along N ----
    def pad2(a, rows, cols):
        a = jnp.asarray(a, f32)
        return jnp.pad(a, ((0, rows - a.shape[0]), (0, cols - a.shape[1])))

    wm1 = pad2(params["wm1"], sem_pad, sem_pad).astype(bf16)
    bm1 = pad2(params["bm1"], 1, sem_pad)
    wm2 = pad2(params["wm2"], sem_pad, sem_pad).astype(bf16)
    bm2 = pad2(params["bm2"], 1, sem_pad)

    wfuse_v = jnp.concatenate(
        [jnp.asarray(params["wvis_v"], f32),
         pad2(params["wsem_v"], feat_dim, sem_pad)], axis=1).astype(bf16)   # (feat, feat+sem_pad)
    wfuse_s = jnp.concatenate(
        [pad2(params["wvis_s"], sem_pad, feat_dim),
         pad2(params["wsem_s"], sem_pad, sem_pad)], axis=1).astype(bf16)    # (sem_pad, feat+sem_pad)
    bfuse = jnp.concatenate(
        [jnp.asarray(params["bvis"], f32), pad2(params["bsem"], 1, sem_pad)], axis=1)

    d_k = feat_dim                                  # n_head = 1
    wq = jnp.asarray(params["wq"], f32).astype(bf16)
    wqs = pad2(params["wqs"], sem_pad, d_k).astype(bf16)
    wk = jnp.asarray(params["wk"], f32).astype(bf16)
    wks = pad2(params["wks"], sem_pad, d_k).astype(bf16)
    wv = jnp.asarray(params["wv"], f32).astype(bf16)
    wfc = jnp.asarray(params["wfc"], f32).astype(bf16)

    weights = [wm1, bm1, wm2, bm2, wfuse_v, wfuse_s, bfuse, wq, wqs, wk, wks, wv, wfc]

    # ---- input padding (zeros); padded rows/cols are masked/ignored inside the kernel ----
    def pad_to(a, target_shape):
        a = jnp.asarray(a, f32)
        return jnp.pad(a, [(0, t - s) for s, t in zip(a.shape, target_shape)])

    sf_p = pad_to(support_feat, (n_bs_pad, nway, feat_dim))
    ss_p = pad_to(support_seman, (n_bs_pad, nway, sem_pad))
    bw_p = pad_to(base_weights, (n_bs_pad, nb_pad, feat_dim))
    bs_p = pad_to(base_seman, (n_bs_pad, nb_pad, sem_pad))

    # ---- VMEM budget + cost estimate (all static python ints) ----
    def nbytes(shape, itemsize):
        return int(np.prod(shape)) * itemsize

    w_bytes = sum(nbytes(w.shape, jnp.dtype(w.dtype).itemsize) for w in weights)
    act_block_bytes = 4 * (ep_tile * nway * (2 * feat_dim + sem_pad + nb_pad)
                           + ep_tile * nb_pad * (feat_dim + sem_pad))
    w_copies = 1 if _SINGLE_BUFFER_WEIGHTS else 2
    needed = w_copies * w_bytes + 6 * act_block_bytes + (8 << 20)
    try:
        vmem_cap = int(pltpu.get_tpu_info().vmem_capacity_bytes)
    except Exception:
        vmem_cap = 64 << 20     # conservative (v7x per-TC) fallback
    vmem_limit = int(min(max(needed, 32 << 20), int(0.85 * vmem_cap)))

    mq, mb = n_bs_pad * nway, n_bs_pad * nb_pad
    flops = 2 * (
        2 * (mq + mb) * sem_pad * sem_pad                              # map_sem (2 layers each)
        + n_bs_pad * (feat_dim + sem_pad) * (feat_dim + sem_pad)       # fused gate projection
        + mq * (feat_dim + sem_pad) * d_k                              # q projection
        + mb * (feat_dim + sem_pad) * d_k                              # k projection
        + mb * feat_dim * d_k                                          # v projection
        + mq * d_k * nb_pad + mq * nb_pad * d_k                        # score + attn@v
        + mq * d_k * feat_dim)                                         # fc
    transcendentals = int(n_bs_pad * (feat_dim + sem_pad) + mq * nb_pad + mq)
    bytes_accessed = int(w_bytes
                         + 4 * (n_bs_pad * nway * (2 * feat_dim + sem_pad + nb_pad)
                                + n_bs_pad * nb_pad * (feat_dim + sem_pad)))

    # ---- specs ----
    act_specs = [
        pl.BlockSpec((ep_tile, nway, feat_dim), lambda i: (i, 0, 0)),
        pl.BlockSpec((ep_tile, nway, sem_pad), lambda i: (i, 0, 0)),
        pl.BlockSpec((ep_tile, nb_pad, feat_dim), lambda i: (i, 0, 0)),
        pl.BlockSpec((ep_tile, nb_pad, sem_pad), lambda i: (i, 0, 0)),
    ]
    if _SINGLE_BUFFER_WEIGHTS:
        def wspec(w):
            # Constant index_map -> double buffering buys nothing; single-buffer to halve VMEM.
            return pl.BlockSpec(w.shape, lambda i, n=w.ndim: (0,) * n,
                                pipeline_mode=pl.Buffered(1))
    else:
        def wspec(w):
            return pl.BlockSpec(w.shape, lambda i, n=w.ndim: (0,) * n)

    out_specs = [
        pl.BlockSpec((ep_tile, nway, feat_dim), lambda i: (i, 0, 0)),
        pl.BlockSpec((ep_tile, nway, nb_pad), lambda i: (i, 0, 0)),
    ]
    out_shape = (jax.ShapeDtypeStruct((n_bs_pad, nway, feat_dim), f32),
                 jax.ShapeDtypeStruct((n_bs_pad, nway, nb_pad), f32))

    kernel = functools.partial(
        _support_calibrator_kernel,
        inv_temperature=float(1.0 / np.sqrt(feat_dim)),   # d_k = feat_dim, n_head = 1
        n_base_real=int(n_base_cls),
    )

    call = pl.pallas_call(
        kernel,
        grid_spec=pltpu.PrefetchScalarGridSpec(
            num_scalar_prefetch=0,
            grid=(grid,),
            in_specs=act_specs + [wspec(w) for w in weights],
            out_specs=out_specs,
        ),
        out_shape=out_shape,
        compiler_params=pltpu.CompilerParams(
            dimension_semantics=("parallel",),     # grid >= 2 when n_bs >= 2 -> both v7x TCs
            vmem_limit_bytes=vmem_limit,
        ),
        cost_estimate=pl.CostEstimate(flops=int(flops), transcendentals=transcendentals,
                                      bytes_accessed=bytes_accessed),
    )
    center_p, attn_p = call(sf_p, ss_p, bw_p, bs_p, *weights)
    return center_p[:n_bs], attn_p[:n_bs, :, :n_base_cls]


def init_params(key, feat_dim, sem_dim=SEM_DIM):
    names = ["wm1", "bm1", "wm2", "bm2", "wvis_v", "wvis_s", "bvis",
             "wsem_v", "wsem_s", "bsem", "wq", "wk", "wv", "wqs", "wks", "wfc"]
    ks = dict(zip(names, jax.random.split(key, len(names))))

    def nrm(k, shape, std):
        return jax.random.normal(k, shape, jnp.float32) * std

    d_k = feat_dim  # n_head = 1
    return {
        "wm1": nrm(ks["wm1"], (sem_dim, sem_dim), 0.05),
        "bm1": nrm(ks["bm1"], (1, sem_dim), 0.02),
        "wm2": nrm(ks["wm2"], (sem_dim, sem_dim), 0.05),
        "bm2": nrm(ks["bm2"], (1, sem_dim), 0.02),
        # task_visfuse: Linear(feat+300, feat), weight split along the input axis
        "wvis_v": nrm(ks["wvis_v"], (feat_dim, feat_dim), 0.05),
        "wvis_s": nrm(ks["wvis_s"], (sem_dim, feat_dim), 0.05),
        "bvis": nrm(ks["bvis"], (1, feat_dim), 0.02),
        # task_semfuse: Linear(feat+300, 300), weight split along the input axis
        "wsem_v": nrm(ks["wsem_v"], (feat_dim, sem_dim), 0.05),
        "wsem_s": nrm(ks["wsem_s"], (sem_dim, sem_dim), 0.05),
        "bsem": nrm(ks["bsem"], (1, sem_dim), 0.02),
        # MultiHeadAttention projections (stored (in, out), i.e. transposed vs torch)
        "wq": nrm(ks["wq"], (feat_dim, d_k), float(np.sqrt(2.0 / (feat_dim + d_k)))),
        "wk": nrm(ks["wk"], (feat_dim, d_k), float(np.sqrt(2.0 / (feat_dim + d_k)))),
        "wv": nrm(ks["wv"], (feat_dim, d_k), float(np.sqrt(2.0 / (feat_dim + d_k)))),
        "wqs": nrm(ks["wqs"], (sem_dim, d_k), float(np.sqrt(2.0 / 600.0))),
        "wks": nrm(ks["wks"], (sem_dim, d_k), float(np.sqrt(2.0 / 600.0))),
        "wfc": nrm(ks["wfc"], (d_k, feat_dim), float(np.sqrt(2.0 / (feat_dim + d_k)))),
    }


def reference_np(support_feat, base_weights, support_seman, base_seman, params, nway):
    """Pure numpy (float64) re-implementation of the PyTorch forward (eval mode)."""
    p = {k: np.asarray(v, np.float64) for k, v in params.items()}
    sf = np.asarray(support_feat, np.float64)
    bw0 = np.asarray(base_weights, np.float64)
    ss0 = np.asarray(support_seman, np.float64)
    bs0 = np.asarray(base_seman, np.float64)
    n_bs, nbc, feat = bw0.shape
    sem = bs0.shape[-1]
    B = n_bs * nway

    def map_sem(x):
        h = x @ p["wm1"] + p["bm1"]
        h = np.where(h >= 0, h, 0.1 * h)
        return h @ p["wm2"] + p["bm2"]

    def sigmoid(x):
        return 1.0 / (1.0 + np.exp(-x))

    bw = np.broadcast_to(bw0[:, None], (n_bs, nway, nbc, feat)).reshape(B, nbc, feat)
    sfb = sf.reshape(B, 1, feat)
    ss = map_sem(ss0).reshape(B, 1, sem)
    bsc = map_sem(bs0)
    bs = np.broadcast_to(bsc[:, None], (n_bs, nway, nbc, sem)).reshape(B, nbc, sem)

    avg = np.mean(np.concatenate([bw, bs], -1), axis=1, keepdims=True)
    wvis = np.concatenate([p["wvis_v"], p["wvis_s"]], axis=0)
    wsem = np.concatenate([p["wsem_v"], p["wsem_s"]], axis=0)
    gate_vis = sigmoid(avg @ wvis + p["bvis"]) + 1.0
    gate_sem = sigmoid(avg @ wsem + p["bsem"]) + 1.0
    bw_g = bw * gate_vis
    bs_g = bs * gate_sem

    q = sfb @ p["wq"]; k = bw_g @ p["wk"]; v = bw @ p["wv"]
    q_sem = ss @ p["wqs"]; k_sem = bs_g @ p["wks"]
    q2 = q + q_sem; k2 = k + k_sem
    score = np.einsum("bqd,bkd->bqk", q2, k2) / np.sqrt(feat)
    e = np.exp(score - score.max(-1, keepdims=True))
    attn = e / e.sum(-1, keepdims=True)
    out = attn @ v
    out = out @ p["wfc"] + sfb
    return out.reshape(n_bs, nway, feat), score.reshape(n_bs, nway, nbc)


if __name__ == "__main__":
    # Small demo shapes: 2 episodes, 4-way, 12 base classes (exercises the base-class padding
    # & softmax masking path: 12 -> 16), feat_dim = 128 (lane-aligned), sem_dim = 300 -> 384.
    n_bs, nway, n_base_cls, feat_dim = 2, 4, 12, 128

    key = jax.random.PRNGKey(0)
    k1, k2, k3, k4, kp = jax.random.split(key, 5)
    support_feat = jax.random.normal(k1, (n_bs, nway, feat_dim), jnp.float32)
    base_weights = jax.random.normal(k2, (n_bs, n_base_cls, feat_dim), jnp.float32)
    support_seman = jax.random.normal(k3, (n_bs, nway, SEM_DIM), jnp.float32)
    base_seman = jax.random.normal(k4, (n_bs, n_base_cls, SEM_DIM), jnp.float32)
    params = init_params(kp, feat_dim)

    support_center, support_attn = support_calibrator(
        support_feat, base_weights, support_seman, base_seman, params, nway=nway)
    jax.block_until_ready((support_center, support_attn))

    ref_center, ref_attn = reference_np(
        support_feat, base_weights, support_seman, base_seman, params, nway)

    assert support_center.shape == (n_bs, nway, feat_dim)
    assert support_attn.shape == (n_bs, nway, n_base_cls)
    # Tolerance accounts for bf16 MXU inputs (weights + activations, f32 accumulation) vs the
    # f64 reference.
    assert np.allclose(np.asarray(support_center), ref_center, atol=4e-2, rtol=4e-2), \
        "support_center mismatch"
    assert np.allclose(np.asarray(support_attn), ref_attn, atol=4e-2, rtol=4e-2), \
        "support_attn mismatch"

    print("KERNEL_OK")
</pallas_src>

<mosaic_0001>
module attributes {stable_mosaic.version = 11 : i64} {
  func.func @_k(%arg0: i32, %arg1: memref<8x128xf32, #tpu.memory_space<vmem>>, %arg2: memref<8x128xf32, #tpu.memory_space<vmem>>, %arg3: memref<8x128xf32, #tpu.memory_space<vmem>>) attributes {dimension_semantics = [#tpu.dimension_semantics<arbitrary>], iteration_bounds = array<i64: 2>, scalar_prefetch = 0 : i64, scratch_operands = 0 : i64, tpu.core_type = #tpu.core_type<tc>, window_params = [{pipeline_mode = #tpu.pipeline_mode<synchronous>, transform_indices = @transform_0, window_bounds = array<i64: 8, 128>}, {transform_indices = @transform_1, window_bounds = array<i64: 8, 128>}, {transform_indices = @transform_2, window_bounds = array<i64: 8, 128>}]} {
    %c0 = arith.constant 0 : index
    %c0_0 = arith.constant 0 : index
    %0 = vector.load %arg2[%c0, %c0_0] : memref<8x128xf32, #tpu.memory_space<vmem>>, vector<8x128xf32>
    %c0_1 = arith.constant 0 : index
    %c0_2 = arith.constant 0 : index
    %1 = vector.load %arg1[%c0_1, %c0_2] : memref<8x128xf32, #tpu.memory_space<vmem>>, vector<8x128xf32>
    %2 = arith.addf %0, %1 : vector<8x128xf32>
    %c0_3 = arith.constant 0 : index
    %c0_4 = arith.constant 0 : index
    %3 = vector.load %arg3[%c0_3, %c0_4] : memref<8x128xf32, #tpu.memory_space<vmem>>, vector<8x128xf32>
    tpu.vector_store %arg3[%c0_3, %c0_4], %2 {strides = array<i32>} : memref<8x128xf32, #tpu.memory_space<vmem>>, vector<8x128xf32>,
    return
  }
  func.func @transform_0(%arg0: i32) -> (i32, i32) {
    %c0_i32 = arith.constant 0 : i32
    %c0_i32_0 = arith.constant 0 : i32
    %c0_i32_1 = arith.constant 0 : i32
    return %c0_i32, %c0_i32_0 : i32, i32
  }
  func.func @transform_1(%arg0: i32) -> (i32, i32) {
    %c0_i32 = arith.constant 0 : i32
    %c0_i32_0 = arith.constant 0 : i32
    return %arg0, %c0_i32 : i32, i32
  }
  func.func @transform_2(%arg0: i32) -> (i32, i32) {
    %c0_i32 = arith.constant 0 : i32
    %c0_i32_0 = arith.constant 0 : i32
    return %arg0, %c0_i32 : i32, i32
  }
}

module attributes {stable_mosaic.version = 11 : i64} {
  func.func @_support_calibrator_kernel(%arg0: i32, %arg1: memref<1x4x128xf32, #tpu.memory_space<vmem>>, %arg2: memref<1x4x384xf32, #tpu.memory_space<vmem>>, %arg3: memref<1x16x128xf32, #tpu.memory_space<vmem>>, %arg4: memref<1x16x384xf32, #tpu.memory_space<vmem>>, %arg5: memref<384x384xbf16, #tpu.memory_space<vmem>>, %arg6: memref<1x384xf32, #tpu.memory_space<vmem>>, %arg7: memref<384x384xbf16, #tpu.memory_space<vmem>>, %arg8: memref<1x384xf32, #tpu.memory_space<vmem>>, %arg9: memref<128x512xbf16, #tpu.memory_space<vmem>>, %arg10: memref<384x512xbf16, #tpu.memory_space<vmem>>, %arg11: memref<1x512xf32, #tpu.memory_space<vmem>>, %arg12: memref<128x128xbf16, #tpu.memory_space<vmem>>, %arg13: memref<384x128xbf16, #tpu.memory_space<vmem>>, %arg14: memref<128x128xbf16, #tpu.memory_space<vmem>>, %arg15: memref<384x128xbf16, #tpu.memory_space<vmem>>, %arg16: memref<128x128xbf16, #tpu.memory_space<vmem>>, %arg17: memref<128x128xbf16, #tpu.memory_space<vmem>>, %arg18: memref<1x4x128xf32, #tpu.memory_space<vmem>>, %arg19: memref<1x4x16xf32, #tpu.memory_space<vmem>>) attributes {dimension_semantics = [#tpu.dimension_semantics<parallel>], iteration_bounds = array<i64: 2>, scalar_prefetch = 0 : i64, scratch_operands = 0 : i64, tpu.core_type = #tpu.core_type<tc>, window_params = [{transform_indices = @transform_0, window_bounds = array<i64: 1, 4, 128>}, {transform_indices = @transform_1, window_bounds = array<i64: 1, 4, 384>}, {transform_indices = @transform_2, window_bounds = array<i64: 1, 16, 128>}, {transform_indices = @transform_3, window_bounds = array<i64: 1, 16, 384>}, {pipeline_mode = #tpu.pipeline_mode<synchronous>, transform_indices = @transform_4, window_bounds = array<i64: 384, 384>}, {pipeline_mode = #tpu.pipeline_mode<synchronous>, transform_indices = @transform_5, window_bounds = array<i64: 1, 384>}, {pipeline_mode = #tpu.pipeline_mode<synchronous>, transform_indices = @transform_6, window_bounds = array<i64: 384, 384>}, {pipeline_mode = #tpu.pipeline_mode<synchronous>, transform_indices = @transform_7, window_bounds = array<i64: 1, 384>}, {pipeline_mode = #tpu.pipeline_mode<synchronous>, transform_indices = @transform_8, window_bounds = array<i64: 128, 512>}, {pipeline_mode = #tpu.pipeline_mode<synchronous>, transform_indices = @transform_9, window_bounds = array<i64: 384, 512>}, {pipeline_mode = #tpu.pipeline_mode<synchronous>, transform_indices = @transform_10, window_bounds = array<i64: 1, 512>}, {pipeline_mode = #tpu.pipeline_mode<synchronous>, transform_indices = @transform_11, window_bounds = array<i64: 128, 128>}, {pipeline_mode = #tpu.pipeline_mode<synchronous>, transform_indices = @transform_12, window_bounds = array<i64: 384, 128>}, {pipeline_mode = #tpu.pipeline_mode<synchronous>, transform_indices = @transform_13, window_bounds = array<i64: 128, 128>}, {pipeline_mode = #tpu.pipeline_mode<synchronous>, transform_indices = @transform_14, window_bounds = array<i64: 384, 128>}, {pipeline_mode = #tpu.pipeline_mode<synchronous>, transform_indices = @transform_15, window_bounds = array<i64: 128, 128>}, {pipeline_mode = #tpu.pipeline_mode<synchronous>, transform_indices = @transform_16, window_bounds = array<i64: 128, 128>}, {transform_indices = @transform_17, window_bounds = array<i64: 1, 4, 128>}, {transform_indices = @transform_18, window_bounds = array<i64: 1, 4, 16>}]} {
    %c0 = arith.constant 0 : index
    %c0_0 = arith.constant 0 : index
    %c0_1 = arith.constant 0 : index
    %0 = vector.load %arg1[%c0, %c0_0, %c0_1] : memref<1x4x128xf32, #tpu.memory_space<vmem>>, vector<1x4x128xf32>
    %1 = vector.shape_cast %0 : vector<1x4x128xf32> to vector<4x128xf32>
    %c0_2 = arith.constant 0 : index
    %c0_3 = arith.constant 0 : index
    %c0_4 = arith.constant 0 : index
    %2 = vector.load %arg2[%c0_2, %c0_3, %c0_4] : memref<1x4x384xf32, #tpu.memory_space<vmem>>, vector<1x4x384xf32>
    %3 = vector.shape_cast %2 : vector<1x4x384xf32> to vector<4x384xf32>
    %c0_5 = arith.constant 0 : index
    %c0_6 = arith.constant 0 : index
    %c0_7 = arith.constant 0 : index
    %4 = vector.load %arg3[%c0_5, %c0_6, %c0_7] : memref<1x16x128xf32, #tpu.memory_space<vmem>>, vector<1x16x128xf32>
    %5 = vector.shape_cast %4 : vector<1x16x128xf32> to vector<16x128xf32>
    %c0_8 = arith.constant 0 : index
    %c0_9 = arith.constant 0 : index
    %c0_10 = arith.constant 0 : index
    %6 = vector.load %arg4[%c0_8, %c0_9, %c0_10] : memref<1x16x384xf32, #tpu.memory_space<vmem>>, vector<1x16x384xf32>
    %7 = vector.shape_cast %6 : vector<1x16x384xf32> to vector<16x384xf32>
    %8 = arith.truncf %3 : vector<4x384xf32> to vector<4x384xbf16>
    %c0_11 = arith.constant 0 : index
    %c0_12 = arith.constant 0 : index
    %9 = vector.load %arg5[%c0_11, %c0_12] : memref<384x384xbf16, #tpu.memory_space<vmem>>, vector<384x384xbf16>
    %cst = arith.constant dense<0.000000e+00> : vector<4x384xf32>
    %10 = tpu.matmul %8, %9, %cst {dimension_numbers = #tpu.dot_dimension_numbers<[1], [0], [0], [1], [0, 0, 1, 1], [], []>} : vector<4x384xbf16>, vector<384x384xbf16>, vector<4x384xf32> -> vector<4x384xf32>
    %c0_13 = arith.constant 0 : index
    %c0_14 = arith.constant 0 : index
    %11 = vector.load %arg6[%c0_13, %c0_14] : memref<1x384xf32, #tpu.memory_space<vmem>>, vector<1x384xf32>
    %12 = vector.broadcast %11 : vector<1x384xf32> to vector<4x384xf32>
    %13 = arith.addf %10, %12 : vector<4x384xf32>
    %cst_15 = arith.constant 0.000000e+00 : f32
    %14 = vector.broadcast %cst_15 : f32 to vector<4x384xf32>
    %15 = arith.cmpf oge, %13, %14 : vector<4x384xf32>
    %cst_16 = arith.constant 1.000000e-01 : f32
    %16 = vector.broadcast %cst_16 : f32 to vector<4x384xf32>
    %17 = arith.mulf %16, %13 : vector<4x384xf32>
    %18 = arith.select %15, %13, %17 : vector<4x384xi1>, vector<4x384xf32>
    %19 = arith.truncf %18 : vector<4x384xf32> to vector<4x384xbf16>
    %c0_17 = arith.constant 0 : index
    %c0_18 = arith.constant 0 : index
    %20 = vector.load %arg7[%c0_17, %c0_18] : memref<384x384xbf16, #tpu.memory_space<vmem>>, vector<384x384xbf16>
    %cst_19 = arith.constant dense<0.000000e+00> : vector<4x384xf32>
    %21 = tpu.matmul %19, %20, %cst_19 {dimension_numbers = #tpu.dot_dimension_numbers<[1], [0], [0], [1], [0, 0, 1, 1], [], []>} : vector<4x384xbf16>, vector<384x384xbf16>, vector<4x384xf32> -> vector<4x384xf32>
    %c0_20 = arith.constant 0 : index
    %c0_21 = arith.constant 0 : index
    %22 = vector.load %arg8[%c0_20, %c0_21] : memref<1x384xf32, #tpu.memory_space<vmem>>, vector<1x384xf32>
    %23 = vector.broadcast %22 : vector<1x384xf32> to vector<4x384xf32>
    %24 = arith.addf %21, %23 : vector<4x384xf32>
    %25 = arith.truncf %7 : vector<16x384xf32> to vector<16x384xbf16>
    %c0_22 = arith.constant 0 : index
    %c0_23 = arith.constant 0 : index
    %26 = vector.load %arg5[%c0_22, %c0_23] : memref<384x384xbf16, #tpu.memory_space<vmem>>, vector<384x384xbf16>
    %cst_24 = arith.constant dense<0.000000e+00> : vector<16x384xf32>
    %27 = tpu.matmul %25, %26, %cst_24 {dimension_numbers = #tpu.dot_dimension_numbers<[1], [0], [0], [1], [0, 0, 1, 1], [], []>} : vector<16x384xbf16>, vector<384x384xbf16>, vector<16x384xf32> -> vector<16x384xf32>
    %c0_25 = arith.constant 0 : index
    %c0_26 = arith.constant 0 : index
    %28 = vector.load %arg6[%c0_25, %c0_26] : memref<1x384xf32, #tpu.memory_space<vmem>>, vector<1x384xf32>
    %29 = vector.broadcast %28 : vector<1x384xf32> to vector<16x384xf32>
    %30 = arith.addf %27, %29 : vector<16x384xf32>
    %cst_27 = arith.constant 0.000000e+00 : f32
    %31 = vector.broadcast %cst_27 : f32 to vector<16x384xf32>
    %32 = arith.cmpf oge, %30, %31 : vector<16x384xf32>
    %cst_28 = arith.constant 1.000000e-01 : f32
    %33 = vector.broadcast %cst_28 : f32 to vector<16x384xf32>
    %34 = arith.mulf %33, %30 : vector<16x384xf32>
    %35 = arith.select %32, %30, %34 : vector<16x384xi1>, vector<16x384xf32>
    %36 = arith.truncf %35 : vector<16x384xf32> to vector<16x384xbf16>
    %c0_29 = arith.constant 0 : index
    %c0_30 = arith.constant 0 : index
    %37 = vector.load %arg7[%c0_29, %c0_30] : memref<384x384xbf16, #tpu.memory_space<vmem>>, vector<384x384xbf16>
    %cst_31 = arith.constant dense<0.000000e+00> : vector<16x384xf32>
    %38 = tpu.matmul %36, %37, %cst_31 {dimension_numbers = #tpu.dot_dimension_numbers<[1], [0], [0], [1], [0, 0, 1, 1], [], []>} : vector<16x384xbf16>, vector<384x384xbf16>, vector<16x384xf32> -> vector<16x384xf32>
    %c0_32 = arith.constant 0 : index
    %c0_33 = arith.constant 0 : index
    %39 = vector.load %arg8[%c0_32, %c0_33] : memref<1x384xf32, #tpu.memory_space<vmem>>, vector<1x384xf32>
    %40 = vector.broadcast %39 : vector<1x384xf32> to vector<16x384xf32>
    %41 = arith.addf %38, %40 : vector<16x384xf32>
    %42 = vector.shape_cast %41 : vector<16x384xf32> to vector<1x16x384xf32>
    %43 = tpu.iota {dimensions = array<i32: 1>} : vector<1x16x1xi32>
    %c12_i32 = arith.constant 12 : i32
    %44 = vector.broadcast %c12_i32 : i32 to vector<1x16x1xi32>
    %45 = arith.cmpi slt, %43, %44 : vector<1x16x1xi32>
    %cst_34 = arith.constant 0.000000e+00 : f32
    %46 = vector.shape_cast %45 : vector<1x16x1xi1> to vector<1x16x1xi1>
    %47 = vector.broadcast %46 : vector<1x16x1xi1> to vector<1x16x384xi1>
    %48 = vector.broadcast %cst_34 : f32 to vector<1x16x384xf32>
    %49 = arith.select %47, %42, %48 : vector<1x16x384xi1>, vector<1x16x384xf32>
    %cst_35 = arith.constant dense<0.000000e+00> : vector<1x128xf32>
    %50 = vector.multi_reduction <add>, %4, %cst_35 [1] : vector<1x16x128xf32> to vector<1x128xf32>
    %cst_36 = arith.constant 0.0833333358 : f32
    %51 = vector.broadcast %cst_36 : f32 to vector<1x128xf32>
    %52 = arith.mulf %50, %51 : vector<1x128xf32>
    %cst_37 = arith.constant dense<0.000000e+00> : vector<1x384xf32>
    %53 = vector.multi_reduction <add>, %49, %cst_37 [1] : vector<1x16x384xf32> to vector<1x384xf32>
    %cst_38 = arith.constant 0.0833333358 : f32
    %54 = vector.broadcast %cst_38 : f32 to vector<1x384xf32>
    %55 = arith.mulf %53, %54 : vector<1x384xf32>
    %56 = arith.truncf %52 : vector<1x128xf32> to vector<1x128xbf16>
    %c0_39 = arith.constant 0 : index
    %c0_40 = arith.constant 0 : index
    %57 = vector.load %arg9[%c0_39, %c0_40] : memref<128x512xbf16, #tpu.memory_space<vmem>>, vector<128x512xbf16>
    %cst_41 = arith.constant dense<0.000000e+00> : vector<1x512xf32>
    %58 = tpu.matmul %56, %57, %cst_41 {dimension_numbers = #tpu.dot_dimension_numbers<[1], [0], [0], [1], [0, 0, 1, 1], [], []>} : vector<1x128xbf16>, vector<128x512xbf16>, vector<1x512xf32> -> vector<1x512xf32>
    %59 = arith.truncf %55 : vector<1x384xf32> to vector<1x384xbf16>
    %c0_42 = arith.constant 0 : index
    %c0_43 = arith.constant 0 : index
    %60 = vector.load %arg10[%c0_42, %c0_43] : memref<384x512xbf16, #tpu.memory_space<vmem>>, vector<384x512xbf16>
    %cst_44 = arith.constant dense<0.000000e+00> : vector<1x512xf32>
    %61 = tpu.matmul %59, %60, %cst_44 {dimension_numbers = #tpu.dot_dimension_numbers<[1], [0], [0], [1], [0, 0, 1, 1], [], []>} : vector<1x384xbf16>, vector<384x512xbf16>, vector<1x512xf32> -> vector<1x512xf32>
    %62 = arith.addf %58, %61 : vector<1x512xf32>
    %c0_45 = arith.constant 0 : index
    %c0_46 = arith.constant 0 : index
    %63 = vector.load %arg11[%c0_45, %c0_46] : memref<1x512xf32, #tpu.memory_space<vmem>>, vector<1x512xf32>
    %64 = arith.addf %62, %63 : vector<1x512xf32>
    %65 = arith.negf %64 : vector<1x512xf32>
    %66 = math.exp %65 : vector<1x512xf32>
    %cst_47 = arith.constant 1.000000e+00 : f32
    %67 = vector.broadcast %cst_47 : f32 to vector<1x512xf32>
    %68 = arith.addf %67, %66 : vector<1x512xf32>
    %69 = arith.divf %67, %68 : vector<1x512xf32>
    %cst_48 = arith.constant 1.000000e+00 : f32
    %70 = vector.broadcast %cst_48 : f32 to vector<1x512xf32>
    %71 = arith.addf %69, %70 : vector<1x512xf32>
    %72 = vector.extract_strided_slice %71 {offsets = [0, 0], sizes = [1, 128], strides = [1, 1]} : vector<1x512xf32> to vector<1x128xf32>
    %73 = vector.extract_strided_slice %71 {offsets = [0, 128], sizes = [1, 384], strides = [1, 1]} : vector<1x512xf32> to vector<1x384xf32>
    %74 = vector.shape_cast %72 : vector<1x128xf32> to vector<1x1x128xf32>
    %75 = vector.broadcast %74 : vector<1x1x128xf32> to vector<1x16x128xf32>
    %76 = arith.mulf %4, %75 : vector<1x16x128xf32>
    %77 = vector.shape_cast %76 : vector<1x16x128xf32> to vector<16x128xf32>
    %78 = vector.shape_cast %73 : vector<1x384xf32> to vector<1x1x384xf32>
    %79 = vector.broadcast %78 : vector<1x1x384xf32> to vector<1x16x384xf32>
    %80 = arith.mulf %49, %79 : vector<1x16x384xf32>
    %81 = vector.shape_cast %80 : vector<1x16x384xf32> to vector<16x384xf32>
    %82 = arith.truncf %1 : vector<4x128xf32> to vector<4x128xbf16>
    %c0_49 = arith.constant 0 : index
    %c0_50 = arith.constant 0 : index
    %83 = vector.load %arg12[%c0_49, %c0_50] : memref<128x128xbf16, #tpu.memory_space<vmem>>, vector<128x128xbf16>
    %cst_51 = arith.constant dense<0.000000e+00> : vector<4x128xf32>
    %84 = tpu.matmul %82, %83, %cst_51 {dimension_numbers = #tpu.dot_dimension_numbers<[1], [0], [0], [1], [0, 0, 1, 1], [], []>} : vector<4x128xbf16>, vector<128x128xbf16>, vector<4x128xf32> -> vector<4x128xf32>
    %85 = arith.truncf %24 : vector<4x384xf32> to vector<4x384xbf16>
    %c0_52 = arith.constant 0 : index
    %c0_53 = arith.constant 0 : index
    %86 = vector.load %arg13[%c0_52, %c0_53] : memref<384x128xbf16, #tpu.memory_space<vmem>>, vector<384x128xbf16>
    %cst_54 = arith.constant dense<0.000000e+00> : vector<4x128xf32>
    %87 = tpu.matmul %85, %86, %cst_54 {dimension_numbers = #tpu.dot_dimension_numbers<[1], [0], [0], [1], [0, 0, 1, 1], [], []>} : vector<4x384xbf16>, vector<384x128xbf16>, vector<4x128xf32> -> vector<4x128xf32>
    %88 = arith.addf %84, %87 : vector<4x128xf32>
    %89 = arith.truncf %77 : vector<16x128xf32> to vector<16x128xbf16>
    %c0_55 = arith.constant 0 : index
    %c0_56 = arith.constant 0 : index
    %90 = vector.load %arg14[%c0_55, %c0_56] : memref<128x128xbf16, #tpu.memory_space<vmem>>, vector<128x128xbf16>
    %cst_57 = arith.constant dense<0.000000e+00> : vector<16x128xf32>
    %91 = tpu.matmul %89, %90, %cst_57 {dimension_numbers = #tpu.dot_dimension_numbers<[1], [0], [0], [1], [0, 0, 1, 1], [], []>} : vector<16x128xbf16>, vector<128x128xbf16>, vector<16x128xf32> -> vector<16x128xf32>
    %92 = arith.truncf %81 : vector<16x384xf32> to vector<16x384xbf16>
    %c0_58 = arith.constant 0 : index
    %c0_59 = arith.constant 0 : index
    %93 = vector.load %arg15[%c0_58, %c0_59] : memref<384x128xbf16, #tpu.memory_space<vmem>>, vector<384x128xbf16>
    %cst_60 = arith.constant dense<0.000000e+00> : vector<16x128xf32>
    %94 = tpu.matmul %92, %93, %cst_60 {dimension_numbers = #tpu.dot_dimension_numbers<[1], [0], [0], [1], [0, 0, 1, 1], [], []>} : vector<16x384xbf16>, vector<384x128xbf16>, vector<16x128xf32> -> vector<16x128xf32>
    %95 = arith.addf %91, %94 : vector<16x128xf32>
    %96 = arith.truncf %5 : vector<16x128xf32> to vector<16x128xbf16>
    %c0_61 = arith.constant 0 : index
    %c0_62 = arith.constant 0 : index
    %97 = vector.load %arg16[%c0_61, %c0_62] : memref<128x128xbf16, #tpu.memory_space<vmem>>, vector<128x128xbf16>
    %cst_63 = arith.constant dense<0.000000e+00> : vector<16x128xf32>
    %98 = tpu.matmul %96, %97, %cst_63 {dimension_numbers = #tpu.dot_dimension_numbers<[1], [0], [0], [1], [0, 0, 1, 1], [], []>} : vector<16x128xbf16>, vector<128x128xbf16>, vector<16x128xf32> -> vector<16x128xf32>
    %99 = vector.shape_cast %88 : vector<4x128xf32> to vector<1x4x128xf32>
    %100 = arith.truncf %99 : vector<1x4x128xf32> to vector<1x4x128xbf16>
    %101 = vector.shape_cast %95 : vector<16x128xf32> to vector<1x16x128xf32>
    %102 = arith.truncf %101 : vector<1x16x128xf32> to vector<1x16x128xbf16>
    %103 = vector.shape_cast %98 : vector<16x128xf32> to vector<1x16x128xf32>
    %104 = arith.truncf %103 : vector<1x16x128xf32> to vector<1x16x128xbf16>
    "tpu.trace_start"() <{level = 10 : i32, message = "eqd,ekd->eqk"}> : () -> ()
    %cst_64 = arith.constant dense<0.000000e+00> : vector<1x4x16xf32>
    %105 = tpu.matmul %100, %102, %cst_64 {dimension_numbers = #tpu.dot_dimension_numbers<[2], [2], [1], [1], [0, 0, 0, 1, 1, 1], [0], [0]>} : vector<1x4x128xbf16>, vector<1x16x128xbf16>, vector<1x4x16xf32> -> vector<1x4x16xf32>
    "tpu.trace_stop"() : () -> ()
    %cst_65 = arith.constant 0.0883883461 : f32
    %106 = vector.broadcast %cst_65 : f32 to vector<1x4x16xf32>
    %107 = arith.mulf %105, %106 : vector<1x4x16xf32>
    %108 = tpu.iota {dimensions = array<i32: 2>} : vector<1x4x16xi32>
    %c12_i32_66 = arith.constant 12 : i32
    %109 = vector.broadcast %c12_i32_66 : i32 to vector<1x4x16xi32>
    %110 = arith.cmpi slt, %108, %109 : vector<1x4x16xi32>
    %cst_67 = arith.constant -1.000000e+30 : f32
    %111 = vector.broadcast %cst_67 : f32 to vector<1x4x16xf32>
    %112 = arith.select %110, %107, %111 : vector<1x4x16xi1>, vector<1x4x16xf32>
    %cst_68 = arith.constant dense<0xFF800000> : vector<1x4xf32>
    %113 = vector.multi_reduction <maximumf>, %112, %cst_68 [2] : vector<1x4x16xf32> to vector<1x4xf32>
    %114 = vector.shape_cast %113 : vector<1x4xf32> to vector<1x4x1xf32>
    %115 = vector.broadcast %114 : vector<1x4x1xf32> to vector<1x4x16xf32>
    %116 = arith.subf %112, %115 : vector<1x4x16xf32>
    %117 = math.exp %116 : vector<1x4x16xf32>
    %cst_69 = arith.constant dense<0.000000e+00> : vector<1x4xf32>
    %118 = vector.multi_reduction <add>, %117, %cst_69 [2] : vector<1x4x16xf32> to vector<1x4xf32>
    %119 = vector.shape_cast %118 : vector<1x4xf32> to vector<1x4x1xf32>
    %120 = tpu.reciprocal %119 {approx = true} : vector<1x4x1xf32> -> vector<1x4x1xf32>
    %121 = vector.broadcast %120 : vector<1x4x1xf32> to vector<1x4x16xf32>
    %122 = arith.mulf %117, %121 : vector<1x4x16xf32>
    %123 = arith.truncf %122 : vector<1x4x16xf32> to vector<1x4x16xbf16>
    "tpu.trace_start"() <{level = 10 : i32, message = "eqk,ekd->eqd"}> : () -> ()
    %cst_70 = arith.constant dense<0.000000e+00> : vector<1x4x128xf32>
    %124 = tpu.matmul %123, %104, %cst_70 {dimension_numbers = #tpu.dot_dimension_numbers<[2], [1], [1], [2], [0, 0, 0, 1, 1, 2], [0], [0]>} : vector<1x4x16xbf16>, vector<1x16x128xbf16>, vector<1x4x128xf32> -> vector<1x4x128xf32>
    "tpu.trace_stop"() : () -> ()
    %125 = vector.shape_cast %124 : vector<1x4x128xf32> to vector<4x128xf32>
    %126 = arith.truncf %125 : vector<4x128xf32> to vector<4x128xbf16>
    %c0_71 = arith.constant 0 : index
    %c0_72 = arith.constant 0 : index
    %127 = vector.load %arg17[%c0_71, %c0_72] : memref<128x128xbf16, #tpu.memory_space<vmem>>, vector<128x128xbf16>
    %cst_73 = arith.constant dense<0.000000e+00> : vector<4x128xf32>
    %128 = tpu.matmul %126, %127, %cst_73 {dimension_numbers = #tpu.dot_dimension_numbers<[1], [0], [0], [1], [0, 0, 1, 1], [], []>} : vector<4x128xbf16>, vector<128x128xbf16>, vector<4x128xf32> -> vector<4x128xf32>
    %129 = arith.addf %128, %1 : vector<4x128xf32>
    %130 = vector.shape_cast %129 : vector<4x128xf32> to vector<1x4x128xf32>
    %c0_74 = arith.constant 0 : index
    %c0_75 = arith.constant 0 : index
    %c0_76 = arith.constant 0 : index
    %131 = vector.load %arg18[%c0_74, %c0_75, %c0_76] : memref<1x4x128xf32, #tpu.memory_space<vmem>>, vector<1x4x128xf32>
    tpu.vector_store %arg18[%c0_74, %c0_75, %c0_76], %130 {strides = array<i32>} : memref<1x4x128xf32, #tpu.memory_space<vmem>>, vector<1x4x128xf32>,
    %c0_77 = arith.constant 0 : index
    %c0_78 = arith.constant 0 : index
    %c0_79 = arith.constant 0 : index
    %132 = vector.load %arg19[%c0_77, %c0_78, %c0_79] : memref<1x4x16xf32, #tpu.memory_space<vmem>>, vector<1x4x16xf32>
    tpu.vector_store %arg19[%c0_77, %c0_78, %c0_79], %107 {strides = array<i32>} : memref<1x4x16xf32, #tpu.memory_space<vmem>>, vector<1x4x16xf32>,
    return
  }
  func.func @transform_0(%arg0: i32) -> (i32, i32, i32) {
    %c0_i32 = arith.constant 0 : i32
    %c0_i32_0 = arith.constant 0 : i32
    %c0_i32_1 = arith.constant 0 : i32
    return %arg0, %c0_i32, %c0_i32_0 : i32, i32, i32
  }
  func.func @transform_1(%arg0: i32) -> (i32, i32, i32) {
    %c0_i32 = arith.constant 0 : i32
    %c0_i32_0 = arith.constant 0 : i32
    %c0_i32_1 = arith.constant 0 : i32
    return %arg0, %c0_i32, %c0_i32_0 : i32, i32, i32
  }
  func.func @transform_2(%arg0: i32) -> (i32, i32, i32) {
    %c0_i32 = arith.constant 0 : i32
    %c0_i32_0 = arith.constant 0 : i32
    %c0_i32_1 = arith.constant 0 : i32
    return %arg0, %c0_i32, %c0_i32_0 : i32, i32, i32
  }
  func.func @transform_3(%arg0: i32) -> (i32, i32, i32) {
    %c0_i32 = arith.constant 0 : i32
    %c0_i32_0 = arith.constant 0 : i32
    %c0_i32_1 = arith.constant 0 : i32
    return %arg0, %c0_i32, %c0_i32_0 : i32, i32, i32
  }
  func.func @transform_4(%arg0: i32) -> (i32, i32) {
    %c0_i32 = arith.constant 0 : i32
    %c0_i32_0 = arith.constant 0 : i32
    %c0_i32_1 = arith.constant 0 : i32
    return %c0_i32, %c0_i32_0 : i32, i32
  }
  func.func @transform_5(%arg0: i32) -> (i32, i32) {
    %c0_i32 = arith.constant 0 : i32
    %c0_i32_0 = arith.constant 0 : i32
    %c0_i32_1 = arith.constant 0 : i32
    return %c0_i32, %c0_i32_0 : i32, i32
  }
  func.func @transform_6(%arg0: i32) -> (i32, i32) {
    %c0_i32 = arith.constant 0 : i32
    %c0_i32_0 = arith.constant 0 : i32
    %c0_i32_1 = arith.constant 0 : i32
    return %c0_i32, %c0_i32_0 : i32, i32
  }
  func.func @transform_7(%arg0: i32) -> (i32, i32) {
    %c0_i32 = arith.constant 0 : i32
    %c0_i32_0 = arith.constant 0 : i32
    %c0_i32_1 = arith.constant 0 : i32
    return %c0_i32, %c0_i32_0 : i32, i32
  }
  func.func @transform_8(%arg0: i32) -> (i32, i32) {
    %c0_i32 = arith.constant 0 : i32
    %c0_i32_0 = arith.constant 0 : i32
    %c0_i32_1 = arith.constant 0 : i32
    return %c0_i32, %c0_i32_0 : i32, i32
  }
  func.func @transform_9(%arg0: i32) -> (i32, i32) {
    %c0_i32 = arith.constant 0 : i32
    %c0_i32_0 = arith.constant 0 : i32
    %c0_i32_1 = arith.constant 0 : i32
    return %c0_i32, %c0_i32_0 : i32, i32
  }
  func.func @transform_10(%arg0: i32) -> (i32, i32) {
    %c0_i32 = arith.constant 0 : i32
    %c0_i32_0 = arith.constant 0 : i32
    %c0_i32_1 = arith.constant 0 : i32
    return %c0_i32, %c0_i32_0 : i32, i32
  }
  func.func @transform_11(%arg0: i32) -> (i32, i32) {
    %c0_i32 = arith.constant 0 : i32
    %c0_i32_0 = arith.constant 0 : i32
    %c0_i32_1 = arith.constant 0 : i32
    return %c0_i32, %c0_i32_0 : i32, i32
  }
  func.func @transform_12(%arg0: i32) -> (i32, i32) {
    %c0_i32 = arith.constant 0 : i32
    %c0_i32_0 = arith.constant 0 : i32
    %c0_i32_1 = arith.constant 0 : i32
    return %c0_i32, %c0_i32_0 : i32, i32
  }
  func.func @transform_13(%arg0: i32) -> (i32, i32) {
    %c0_i32 = arith.constant 0 : i32
    %c0_i32_0 = arith.constant 0 : i32
    %c0_i32_1 = arith.constant 0 : i32
    return %c0_i32, %c0_i32_0 : i32, i32
  }
  func.func @transform_14(%arg0: i32) -> (i32, i32) {
    %c0_i32 = arith.constant 0 : i32
    %c0_i32_0 = arith.constant 0 : i32
    %c0_i32_1 = arith.constant 0 : i32
    return %c0_i32, %c0_i32_0 : i32, i32
  }
  func.func @transform_15(%arg0: i32) -> (i32, i32) {
    %c0_i32 = arith.constant 0 : i32
    %c0_i32_0 = arith.constant 0 : i32
    %c0_i32_1 = arith.constant 0 : i32
    return %c0_i32, %c0_i32_0 : i32, i32
  }
  func.func @transform_16(%arg0: i32) -> (i32, i32) {
    %c0_i32 = arith.constant 0 : i32
    %c0_i32_0 = arith.constant 0 : i32
    %c0_i32_1 = arith.constant 0 : i32
    return %c0_i32, %c0_i32_0 : i32, i32
  }
  func.func @transform_17(%arg0: i32) -> (i32, i32, i32) {
    %c0_i32 = arith.constant 0 : i32
    %c0_i32_0 = arith.constant 0 : i32
    %c0_i32_1 = arith.constant 0 : i32
    return %arg0, %c0_i32, %c0_i32_0 : i32, i32, i32
  }
  func.func @transform_18(%arg0: i32) -> (i32, i32, i32) {
    %c0_i32 = arith.constant 0 : i32
    %c0_i32_0 = arith.constant 0 : i32
    %c0_i32_1 = arith.constant 0 : i32
    return %arg0, %c0_i32, %c0_i32_0 : i32, i32, i32
  }
}

</mosaic_0001>

<bundles_post_ra>
// kernel: tpu_custom_call.1
= control target key start
LH: loop header
LB: loop body
LE: loop exit
PB: predicated region body
PF: predicated region fallthrough
CT: control target
= control target key end

     0   :  { %7 = vsyncpa [#allocation3], 0  ;;  %s692_s0 = inlined_call_operand.hbm [shape: f32[8,128], index: 0, kind: input, shape index: {}]   ;;  %s693_s1 = inlined_call_operand.hbm [shape: f32[16,128], index: 1, kind: input, shape index: {}]   ;;  %s694_s2 = inlined_call_operand.hbm [shape: f32[16,128], index: 2, kind: output, shape index: {}]  }
   0x1   :  { %8 = vsyncpa [#allocation6], 0 }
   0x2   :  { %10 = vsyncpa [#allocation6 + $0x1], 0 }
   0x3   :  { %11 = vsyncpa [#allocation4], 0 }
   0x4   :  { %13 = vsyncpa [#allocation4 + $0x1], 0  ;;  %s491_s9 = smov 0   ;;  %s493_s10 = smov 0  }
   0x5   :  { %s495_s11 = smov 0   ;;  %s497_s12 = smov 0  }
   0x6 LB: > { %s512_s13 = sadd.s32 4294967295, %s471_s12   ;;  %s272_s14 = sadd.s32 4294967294, %s471_s12   ;;  %s471_s12 = sphi %s497_s12, %s718_s12   ;;  %s467_s11 = sphi %s495_s11, %s717_s11   ;;  %s463_s10 = sphi %s493_s10, %s716_s10   ;;  %s459_s9 = sphi %s491_s9, %s715_s9  }
   0x7   : > { %p60_p0 = scmp.ne.s32.totalorder %s463_s10, %s459_s9  ;;  %p695_p1 = scmp.eq.s32.totalorder %s512_s13, 0 }
   0x8   : > { %p90_p3 = scmp.eq.s32.totalorder %s272_s14, 1  ;;  %p273_p5 = scmp.ge.s32.totalorder %s471_s12, 1 }
   0x9   : > { %p521_p4 = por %p695_p1, %p60_p0  ;;  %p97_p7 = scmp.lt.s32.totalorder %s471_s12, 3 }
   0xa   : > { %p526_p6 = por %p90_p3, %p60_p0  ;;  %s473_s18 = smov [#allocation2]  }
   0xb   : > { %s698_s15 = scalar_select %p521_p4, 1, 0 }
   0xc   : > { %s699_s16 = scalar_select %p526_p6, 1, 0 }
   0xd   : > { %p531_p8 = pnand %p273_p5, %p97_p7  ;;  %s110_s19 = sshll.u32 %s473_s18, 4  ;;  %s111_s19 = int_to_ptr.vmem [resolvable:$true] %s110_s19 }
   0xe   : > { %s539_s20 = sadd.s32 1, %s471_s12   ;;  %s47_s24 = sadd.s32 1, %s467_s11 }
   0xf   : > { %s700_s17 = scalar_select %p531_p8, 1, 0 }
  0x10   : > { %p294_p10 = pneg %p531_p8  ;;  %s44_s22 = ssub.s32 %s471_s12, %s539_s20 }
  0x11   : > { %p549_p12 = scmp.eq.s32.totalorder %s44_s22, 0  ;;  %s343_s27 = scalar_lea.hbm %s692_s0, 128 }
  0x12   : > { %p543_p11 = pnand %p294_p10, %p695_p1  ;;  %p344_p0 = scmp.ne.s32.totalorder %s692_s0, %s343_s27 }
  0x13   : > { %s702_s23 = scalar_select %p549_p12, 1, 0 }
  0x14   : > { %p345_p3 = pneg %p543_p11  ;;  %p350_p10 = scmp.lt.u32.totalorder %s343_s27, %s692_s0 }
  0x16   : > { %p346_p5 = pnand %p345_p3, %p344_p0 }
  0x18   : > { %p347_p7 = pneg %p346_p5 }
  0x1a   : > { %p352_p9 = pnand %p350_p10, %p347_p7 }
  0x1c   : > { %355 = shalt.err (!%p352_p9)
}
  0x1d   : > { %s356_s4 = scalar_lea.vmem %s111_s19, 128  ;;  %p364_p6 = scmp.lt.s32.totalorder %s111_s19, %s111_s19 }
  0x1e   : > { %p357_p1 = scmp.ne.s32.totalorder %s111_s19, %s356_s4  ;;  %p365_p4 = scmp.lt.s32.totalorder %s356_s4, %s356_s4 }
  0x20   : > { %p359_p2 = pnand %p357_p1, %p345_p3  ;;  %p366_p8 = por %p365_p4, %p364_p6 }
  0x22   : > { %p360_p13 = pneg %p359_p2 }
  0x24   : > { %p367_p12 = pnand %p366_p8, %p360_p13 }
  0x26   : > { %370 = shalt.err (!%p367_p12)
}
  0x27   : > { %297 = dma.hbm_to_vmem [thread:$0]  (!%p543_p11), %s692_s0, 128, %s111_s19, [#allocation3]  }
  0x28   : > { %p703_p1 = scmp.ne.s32.totalorder %s702_s23, 0  ;;  %p55_p2 = scmp.eq.s32.totalorder %s471_s12, 0 }
  0x29   : > { %p704_p4 = scmp.ne.s32.totalorder %s467_s11, %s463_s10  ;;  %p705_p6 = scmp.eq.s32.totalorder %s512_s13, 1 }
  0x2a   : > { %s575_s7 = scalar_select %p703_p1, %s467_s11, %s47_s24  }
  0x2b   : > { %p583_p8 = por %p705_p6, %p704_p4  ;;  %p307_p9 = scmp.lt.s32.totalorder %s471_s12, 2 }
  0x2c   : > { %s121_s14 = sand.u32 1, %s467_s11   ;;  %p707_p12 = pmov %p704_p4 }
  0x2d   : > { %s276_s18 = sshll.u32 %s121_s14, 3  ;;  %s277_s21 = sshll.u32 %s471_s12, 7 }
  0x2e   : > { %p56_p13 = por %p55_p2, %p707_p12  ;;  %s596_s19 = scalar_lea.hbm %s693_s1, %s277_s21 }
  0x2f   : > { %s125_s23 = scalar_lea.vmem [#allocation5], %s276_s18  ;;  %s122_s27 = scalar_lea.sflag [#allocation6], %s121_s14 }
  0x30   : > { %s132_s24 = sshll.u32 %s125_s23, 4  ;;  %p598_p11 = pnand %p307_p9, %p56_p13  ;;  %s602_s24 = int_to_ptr.vmem [resolvable:$true] %s132_s24 }
  0x31   : > { %s371_s28 = scalar_lea.hbm %s596_s19, 128  ;;  %s376_s3 = scalar_lea.hbm %s693_s1, 256 }
  0x32   : > { %p372_p0 = scmp.ne.s32.totalorder %s596_s19, %s371_s28  ;;  %p373_p3 = pneg %p598_p11 }
  0x33   : > { %p377_p10 = scmp.lt.u32.totalorder %s596_s19, %s693_s1  ;;  %p378_p1 = scmp.lt.u32.totalorder %s376_s3, %s371_s28 }
  0x34   : > { %p374_p5 = pnand %p373_p3, %p372_p0  ;;  %p380_p4 = scmp.lt.u32.totalorder %s371_s28, %s596_s19 }
  0x35   : > { %p379_p2 = por %p378_p1, %p377_p10 }
  0x36   : > { %p375_p7 = pneg %p374_p5 }
  0x37   : > { %p381_p6 = por %p380_p4, %p379_p2 }
  0x39   : > { %p382_p9 = pnand %p381_p6, %p375_p7 }
  0x3b   : > { %385 = shalt.err (!%p382_p9)
}
  0x3c   : > { %s386_s6 = scalar_lea.vmem %s602_s24, 128  ;;  %s474_s14 = smov [#allocation5]  }
  0x3d   : > { %p387_p12 = scmp.ne.s32.totalorder %s602_s24, %s386_s6  ;;  %s391_s18 = sshll.u32 %s474_s14, 4  ;;  %s392_s18 = int_to_ptr.vmem [resolvable:$false] %s391_s18 }
  0x3e   : > { %s393_s21 = scalar_lea.vmem %s392_s18, 256  ;;  %p394_p5 = scmp.lt.s32.totalorder %s602_s24, %s392_s18 }
  0x3f   : > { %p389_p13 = pnand %p387_p12, %p373_p3  ;;  %p395_p10 = scmp.lt.s32.totalorder %s393_s21, %s386_s6 }
  0x41   : > { %p390_p0 = pneg %p389_p13  ;;  %p396_p1 = por %p395_p10, %p394_p5 }
  0x43   : > { %p397_p2 = pnand %p396_p1, %p390_p0 }
  0x45   : > { %400 = shalt.err (!%p397_p2)
}
  0x46   : > { %301 = dma.hbm_to_vmem [thread:$0]  (!%p598_p11), %s596_s19, 128, %s602_s24, %s122_s27  }
  0x47   : > { %p709_p7 = scmp.ne.s32.totalorder %s700_s17, 0 }
  0x48   : > { %p710_p3 = scmp.eq.s32.totalorder (!%p709_p7), %s512_s13, 0 }
  0x49   : > { %141 = sbr.rel (%p709_p7) target bundleno = 110 (0x6e), region = 28 }
  0x50   : > { %446 = dma.done.wait (%p710_p3), [#allocation3], 128   ;;  %p711_p4 = pmov %p710_p3 }
  0x51   : > { %s636_s22 = sand.u32 1, %s463_s10   ;;  %p712_p6 = scmp.ne.s32.totalorder %s698_s15, 0 }
  0x52   : > { %448 = vsyncadd (%p711_p4), [#allocation3], 4294967168  ;;  %s280_s25 = sshll.u32 %s636_s22, 3  ;;  %s148_s23 = scalar_lea.sflag [#allocation6], %s636_s22 }
  0x53   : > { %s151_s26 = scalar_lea.vmem [#allocation5], %s280_s25 }
  0x54   : > { %450 = dma.done.wait (%p712_p6), %s148_s23, 128  }
  0x55   : > { %452 = vsyncadd (%p712_p6), %s148_s23, 4294967168  ;;  %s171_s17 = scalar_lea.vmem [#allocation7], %s280_s25  ;;  %s283_s24 = sshll.u32 %s512_s13, 7  ;;  %v172_v0 = vld [vmem:[%s151_s26] sm:$0xff]  ;;  %v173_v1 = vld [vmem:[#allocation2] sm:$0xff] }
  0x56   : > { %s190_s19 = sshll.u32 %s171_s17, 4  ;;  %v174_v2 = vadd.f32 %v173_v1, %v172_v0  ;;  %s650_s29 = scalar_lea.hbm %s694_s2, %s283_s24  ;;  %s645_s19 = int_to_ptr.vmem [resolvable:$true] %s190_s19 }
  0x57   : > { %s177_s15 = scalar_lea.sflag [#allocation4], %s636_s22  ;;  %s401_s30 = scalar_lea.vmem %s645_s19, 128 }
  0x58   : > { %175 = vst [vmem:[%s171_s17] sm:$0xff] %v174_v2  ;;  %p402_p11 = scmp.ne.s32.totalorder %s645_s19, %s401_s30  ;;  %s475_s13 = smov [#allocation7]  }
  0x59   : > { %s405_s3 = sshll.u32 %s475_s13, 4  ;;  %s406_s3 = int_to_ptr.vmem [resolvable:$false] %s405_s3 }
  0x5a   : > { %p403_p9 = pnand %p402_p11, %p583_p8  ;;  %s407_s4 = scalar_lea.vmem %s406_s3, 256 }
  0x5b   : > { %p408_p13 = scmp.lt.s32.totalorder %s645_s19, %s406_s3  ;;  %p409_p0 = scmp.lt.s32.totalorder %s407_s4, %s401_s30 }
  0x5c   : > { %p404_p12 = pneg %p403_p9 }
  0x5d   : > { %p410_p5 = por %p409_p0, %p408_p13 }
  0x5f   : > { %p411_p10 = pnand %p410_p5, %p404_p12 }
  0x61   : > { %414 = shalt.err (!%p411_p10)
}
  0x62   : > { %s415_s5 = scalar_lea.hbm %s650_s29, 128  ;;  %s419_s18 = scalar_lea.hbm %s694_s2, 256 }
  0x63   : > { %p416_p1 = scmp.ne.s32.totalorder %s650_s29, %s415_s5  ;;  %p420_p3 = scmp.lt.u32.totalorder %s650_s29, %s694_s2 }
  0x64   : > { %p421_p4 = scmp.lt.u32.totalorder %s419_s18, %s415_s5  ;;  %p423_p11 = scmp.lt.u32.totalorder %s415_s5, %s650_s29 }
  0x65   : > { %p417_p2 = pnand %p416_p1, %p583_p8 }
  0x66   : > { %p422_p6 = por %p421_p4, %p420_p3 }
  0x67   : > { %p418_p7 = pneg %p417_p2 }
  0x68   : > { %p424_p9 = por %p423_p11, %p422_p6 }
  0x6a   : > { %p425_p12 = pnand %p424_p9, %p418_p7 }
  0x6c   : > { %428 = shalt.err (!%p425_p12)
}
  0x6d   : > { %292 = dma.vmem_to_hbm [thread:$0]  (%p583_p8), %s645_s19, 128, %s650_s29, %s177_s15  }
  0x6e PF: > { %s202_s25 = sand.u32 1, %s459_s9   ;;  %p713_p13 = scmp.ne.s32.totalorder %s699_s16, 0 }
  0x6f   : > { %p714_p0 = scmp.ge.s32.totalorder %s471_s12, 2  ;;  %s203_s23 = scalar_lea.sflag [#allocation4], %s202_s25 }
  0x71   : > { %p303_p5 = pnand %p714_p0, %p713_p13 }
  0x73   : > { %454 = dma.done.wait (!%p303_p5), %s203_s23, 128  }
  0x74   : > { %456 = vsyncadd (!%p303_p5), %s203_s23, 4294967168  ;;  %p16_p10 = scmp.ge.s32.totalorder %s539_s20, 4   ;;  %s715_s9 = smov %s463_s10 }
  0x75   : > { %s716_s10 = smov %s467_s11  ;;  %s717_s11 = smov %s575_s7 }
  0x76   : > { %s718_s12 = smov %s539_s20  ;;  %18 = sbr.rel (!%p16_p10) target bundleno = 6 (0x6), region = 78 }
  0x7d   :  { %208 = vsyncpa [#allocation3], 1 }
  0x7e   :  { %210 = vsyncpa [#allocation3 + $0x1], 1 }
  0x7f   :  { %211 = vsyncpa [#allocation6], 1 }
  0x80   :  { %213 = vsyncpa [#allocation6 + $0x1], 1 }
  0x81   :  { %214 = vsyncpa [#allocation4], 1 }
  0x82   :  { %216 = vsyncpa [#allocation4 + $0x1], 1 }

// kernel: support_calibrator.1
= control target key start
LH: loop header
LB: loop body
LE: loop exit
PB: predicated region body
PF: predicated region fallthrough
CT: control target
= control target key end

     0   :  { %s8384_s0 = inlined_call_operand.vmem [shape: f32[2,4,128], index: 0, kind: input, shape index: {}]   ;;  %s8385_s1 = inlined_call_operand.vmem [shape: f32[2,4,384], index: 1, kind: input, shape index: {}]   ;;  %s8386_s2 = inlined_call_operand.vmem [shape: f32[2,16,128], index: 2, kind: input, shape index: {}]   ;;  %s8387_s3 = inlined_call_operand.vmem [shape: f32[2,16,384], index: 3, kind: input, shape index: {}]   ;;  %s8388_s4 = inlined_call_operand.vmem [shape: bf16[384,384], index: 4, kind: input, shape index: {}]   ;;  %s8389_s5 = inlined_call_operand.vmem [shape: f32[1,384], index: 5, kind: input, shape index: {}]   ;;  %s8390_s6 = inlined_call_operand.vmem [shape: bf16[384,384], index: 6, kind: input, shape index: {}]   ;;  %s8391_s7 = inlined_call_operand.vmem [shape: f32[1,384], index: 7, kind: input, shape index: {}]   ;;  %s8392_s8 = inlined_call_operand.vmem [shape: bf16[128,512], index: 8, kind: input, shape index: {}]   ;;  %s8393_s9 = inlined_call_operand.vmem [shape: bf16[384,512], index: 9, kind: input, shape index: {}]   ;;  %s8394_s10 = inlined_call_operand.vmem [shape: f32[1,512], index: 10, kind: input, shape index: {}]   ;;  %s8395_s11 = inlined_call_operand.vmem [shape: bf16[128,128], index: 11, kind: input, shape index: {}]   ;;  %s8396_s12 = inlined_call_operand.vmem [shape: bf16[384,128], index: 12, kind: input, shape index: {}]   ;;  %s8397_s13 = inlined_call_operand.vmem [shape: bf16[128,128], index: 13, kind: input, shape index: {}]   ;;  %s8398_s14 = inlined_call_operand.vmem [shape: bf16[384,128], index: 14, kind: input, shape index: {}]   ;;  %s8399_s15 = inlined_call_operand.vmem [shape: bf16[128,128], index: 15, kind: input, shape index: {}]   ;;  %s8400_s16 = inlined_call_operand.vmem [shape: bf16[128,128], index: 16, kind: input, shape index: {}]   ;;  %s8401_s17 = inlined_call_operand.hbm [shape: f32[2,4,128], index: 17, kind: output, shape index: {0}]   ;;  %s8402_s18 = inlined_call_operand.hbm [shape: f32[2,4,16], index: 18, kind: output, shape index: {1}]  }
   0x1   :  { %8410 = sst [smem:[#allocation14_spill]] %s8384_s0 }
   0x2   :  { %8411 = sst [smem:[#allocation15_spill]] %s8385_s1 }
   0x3   :  { %8412 = sst [smem:[#allocation16_spill]] %s8386_s2 }
   0x4   :  { %8413 = sst [smem:[#allocation17_spill]] %s8387_s3 }
   0x5   :  { %8414 = sst [smem:[#allocation18_spill]] %s8401_s17 }
   0x6   :  { %24 = vsyncpa [#allocation3], 0 }
   0x7   :  { %26 = vsyncpa [#allocation3 + $0x1], 0 }
   0x8   :  { %27 = vsyncpa [#allocation5], 0 }
   0x9   :  { %29 = vsyncpa [#allocation5 + $0x1], 0  ;;  %s6421_s27 = smov 0   ;;  %s6423_s28 = smov 0  }
   0xa   :  { %s6425_s29 = smov 0   ;;  %s6427_s30 = smov 0  }
   0xb LB: > { %8415 = sst [smem:[#allocation8_spill]] %s6307_s27  ;;  %s6442_s0 = sadd.s32 4294967295, %s6319_s30   ;;  %s6319_s30 = sphi %s6427_s30, %s8431_s30   ;;  %s6315_s29 = sphi %s6425_s29, %s8433_s29   ;;  %s6311_s28 = sphi %s6423_s28, %s8435_s28   ;;  %s6307_s27 = sphi %s6421_s27, %s8434_s27  }
   0xc   : > { %8416 = sst [smem:[#allocation9_spill]] %s6315_s29  ;;  %s4733_s19 = sadd.s32 4294967294, %s6319_s30  }
   0xd   : > { %8417 = sst [smem:[#allocation10_spill]] %s6319_s30  ;;  %s6446_s1 = sadd.s32 1, %s6319_s30  }
   0xe   : > { %8418 = sst [smem:[#allocation11_spill]] %s6446_s1  ;;  %s419_s20 = sadd.s32 1, %s6315_s29 }
   0xf   : > { %s416_s21 = ssub.s32 %s6319_s30, %s6446_s1  ;;  %p429_p0 = scmp.ne.s32.totalorder %s6315_s29, %s6311_s28 }
  0x10   : > { %p417_p1 = scmp.eq.s32.totalorder %s416_s21, 0  ;;  %p430_p2 = scmp.eq.s32.totalorder %s6442_s0, 1 }
  0x11   : > { %p435_p3 = scmp.ne.s32.totalorder %s6311_s28, %s6307_s27  ;;  %p436_p4 = scmp.eq.s32.totalorder %s4733_s19, 1 }
  0x12   : > { %s6457_s22 = scalar_select %p417_p1, %s6315_s29, %s419_s20  }
  0x13   : > { %p6459_p5 = por %p430_p2, %p429_p0  ;;  %p6463_p6 = por %p436_p4, %p435_p3 }
  0x14   : > { %8419 = sst [smem:[#allocation12_spill]] %s6457_s22  ;;  %p4736_p7 = scmp.ge.s32.totalorder %s6319_s30, 1 }
  0x15   : > { %s8421_s23 = scalar_select %p6463_p6, 1, 0 }
  0x16   : > { %p550_p8 = scmp.lt.s32.totalorder %s6319_s30, 3 }
  0x17   : > { %8422 = sst [smem:[#allocation13_spill]] %s8421_s23 }
  0x18   : > { %p551_p9 = pnand %p4736_p7, %p550_p8 }
  0x19   : > { %v5634_v0 = vld [vmem:[%s8388_s4 + $0x4] ss:$12 sps:$4 sm:$0xff] (!%p551_p9)   ;;  %v5636_v1 = vld [vmem:[%s8388_s4] ss:$12 sps:$4 sm:$0xff] (!%p551_p9)   ;;  %v5637_v2 = vld [vmem:[%s8388_s4 + $0x1c] ss:$12 sps:$4 sm:$0xff] (!%p551_p9)  }
  0x1a   : > { %554 = sbr.rel (%p551_p9) target bundleno = 2570 (0xa0a), region = 88  ;;  %1157 = vmatprep.subr.bf16.mxu0 (!%p551_p9), %v5634_v0  ;;  %v5639_v3 = vld [vmem:[%s8388_s4 + $0x18] ss:$12 sps:$4 sm:$0xff] (!%p551_p9)   ;;  %v5640_v4 = vld [vmem:[%s8388_s4 + $0x34] ss:$12 sps:$4 sm:$0xff] (!%p551_p9)   ;;  %p623_p10 = scmp.lt.s32.totalorder (!%p551_p9), %s6442_s0, 1 }
  0x1b   : > { %1158 = vmatpush1.bf16.msra.mxu0 (!%p551_p9), %v5636_v1  ;;  %v5642_v5 = vld [vmem:[%s8388_s4 + $0x30] ss:$12 sps:$4 sm:$0xff] (!%p551_p9)   ;;  %v5643_v6 = vld [vmem:[%s8388_s4 + $0x4c] ss:$12 sps:$4 sm:$0xff] (!%p551_p9)   ;;  %v5645_v7 = vld [vmem:[%s8388_s4 + $0x48] ss:$12 sps:$4 sm:$0xff] (!%p551_p9)  }
  0x1c   : > { %1159 = vmatprep.subr.bf16.mxu0 (!%p551_p9), %v5637_v2  ;;  %v5646_v8 = vld [vmem:[%s8388_s4 + $0x64] ss:$12 sps:$4 sm:$0xff] (!%p551_p9)   ;;  %v5648_v9 = vld [vmem:[%s8388_s4 + $0x60] ss:$12 sps:$4 sm:$0xff] (!%p551_p9)   ;;  %v5664_v10 = vld [vmem:[%s8388_s4 + $0xc8] ss:$12 sps:$4 sm:$0xff] (!%p551_p9)  }
  0x1d   : > { %v5665_v11 = vld [vmem:[%s8388_s4 + $0x8] ss:$12 sps:$4 sm:$0xff] (!%p551_p9)   ;;  %5108 = vmatprep.subr.bf16.mxu1 (!%p551_p9), %v5664_v10  ;;  %v5669_v13 = vld [vmem:[%s8388_s4 + $0xe0] ss:$12 sps:$4 sm:$0xff] (!%p551_p9)   ;;  %v5651_v15 = vld [vmem:[%s8388_s4 + $0x78] ss:$12 sps:$4 sm:$0xff] (!%p551_p9)  }
  0x1e   : > { %v5649_v12 = vld [vmem:[%s8388_s4 + $0x7c] ss:$12 sps:$4 sm:$0xff] (!%p551_p9)   ;;  %5109 = vmatpush3.bf16.msra.mxu1 (!%p551_p9), %v5665_v11  ;;  %v5670_v14 = vld [vmem:[%s8388_s4 + $0x20] ss:$12 sps:$4 sm:$0xff] (!%p551_p9)   ;;  %v5674_v17 = vld [vmem:[%s8388_s4 + $0xf8] ss:$12 sps:$4 sm:$0xff] (!%p551_p9)  }
  0x1f   : > { %1160 = vmatpush1.bf16.msra.mxu0 (!%p551_p9), %v5639_v3  ;;  %v5652_v16 = vld [vmem:[%s8388_s4 + $0x94] ss:$12 sps:$4 sm:$0xff] (!%p551_p9)   ;;  %5110 = vmatprep.subr.bf16.mxu1 (!%p551_p9), %v5669_v13  ;;  %v5675_v18 = vld [vmem:[%s8388_s4 + $0x38] ss:$12 sps:$4 sm:$0xff] (!%p551_p9)   ;;  %v5654_v19 = vld [vmem:[%s8388_s4 + $0x90] ss:$12 sps:$4 sm:$0xff] (!%p551_p9)  }
  0x20   : > { %1161 = vmatprep.subr.bf16.mxu0 (!%p551_p9), %v5640_v4  ;;  %v5655_v20 = vld [vmem:[%s8388_s4 + $0xac] ss:$12 sps:$4 sm:$0xff] (!%p551_p9)   ;;  %v5679_v21 = vld [vmem:[%s8388_s4 + $0x110] ss:$12 sps:$4 sm:$0xff] (!%p551_p9)   ;;  %v5657_v23 = vld [vmem:[%s8388_s4 + $0xa8] ss:$12 sps:$4 sm:$0xff] (!%p551_p9)  }
  0x21   : > { %s6531_s24 = scalar_select %p623_p10, %s6442_s0, 1  ;;  %v5680_v22 = vld [vmem:[%s8388_s4 + $0x50] ss:$12 sps:$4 sm:$0xff]   ;;  %v5684_v24 = vld [vmem:[%s8388_s4 + $0x128] ss:$12 sps:$4 sm:$0xff]   ;;  %v6321_v46 = vmov 0.0  }
  0x22   : > { %5111 = vmatpush3.bf16.msra.mxu1 %v5670_v14  ;;  %v5658_v25 = vld [vmem:[%s8388_s4 + $0xc4] ss:$12 sps:$4 sm:$0xff]   ;;  %v5685_v26 = vld [vmem:[%s8388_s4 + $0x68] ss:$12 sps:$4 sm:$0xff]   ;;  %v5689_v27 = vld [vmem:[%s8388_s4 + $0x140] ss:$12 sps:$4 sm:$0xff]  }
  0x23   : > { %1162 = vmatpush1.bf16.msra.mxu0 %v5642_v5  ;;  %5112 = vmatprep.subr.bf16.mxu1 %v5674_v17  ;;  %s5585_s19 = smul.u32 12, %s6531_s24  ;;  %v5660_v28 = vld [vmem:[%s8388_s4 + $0xc0] ss:$12 sps:$4 sm:$0xff]   ;;  %v5661_v29 = vld [vmem:[%s8388_s4 + $0xdc] ss:$12 sps:$4 sm:$0xff]   ;;  %s8423_s17 = sld [smem:[#allocation15_spill]] }
  0x24   : > { %1163 = vmatprep.subr.bf16.mxu0 %v5643_v6  ;;  %v5690_v30 = vld [vmem:[%s8388_s4 + $0x80] ss:$12 sps:$4 sm:$0xff]   ;;  %v5694_v31 = vld [vmem:[%s8388_s4 + $0x158] ss:$12 sps:$4 sm:$0xff]   ;;  %v5700_v38 = vld [vmem:[%s8388_s4 + $0x170] ss:$12 sps:$4 sm:$0xff]  }
  0x25   : > { %v5663_v32 = vld [vmem:[%s8388_s4 + $0xd8] ss:$12 sps:$4 sm:$0xff]   ;;  %v5666_v34 = vld [vmem:[%s8388_s4 + $0xf4] ss:$12 sps:$4 sm:$0xff]   ;;  %v5668_v39 = vld [vmem:[%s8388_s4 + $0xf0] ss:$12 sps:$4 sm:$0xff]  }
  0x26   : > { %5113 = vmatpush3.bf16.msra.mxu1 %v5675_v18  ;;  %v5695_v36 = vld [vmem:[%s8388_s4 + $0x98] ss:$12 sps:$4 sm:$0xff]   ;;  %v5701_v41 = vld [vmem:[%s8388_s4 + $0xb0] ss:$12 sps:$4 sm:$0xff]   ;;  %v5673_v42 = vld [vmem:[%s8388_s4 + $0x108] ss:$12 sps:$4 sm:$0xff]  }
  0x27   : > { %1164 = vmatpush1.bf16.msra.mxu0 %v5645_v7  ;;  %5114 = vmatprep.subr.bf16.mxu1 %v5679_v21  ;;  %v5671_v40 = vld [vmem:[%s8388_s4 + $0x10c] ss:$12 sps:$4 sm:$0xff]   ;;  %v5676_v43 = vld [vmem:[%s8388_s4 + $0x124] ss:$12 sps:$4 sm:$0xff]   ;;  %v5705_v44 = vld [vmem:[%s8388_s4 + $0x188] ss:$12 sps:$4 sm:$0xff]  }
  0x28   : > { %1165 = vmatprep.subr.bf16.mxu0 %v5646_v8  ;;  %v5678_v47 = vld [vmem:[%s8388_s4 + $0x120] ss:$12 sps:$4 sm:$0xff]   ;;  %v5681_v48 = vld [vmem:[%s8388_s4 + $0x13c] ss:$12 sps:$4 sm:$0xff]   ;;  %vm6322_vm0 = vmmov 0   ;;  %v6323_v63 = vmov 0  }
  0x29   : > { %s6567_s20 = scalar_lea.vmem %s8423_s17, %s5585_s19  ;;  %v5709_v49 = vld [vmem:[%s8388_s4 + $0x1a0] ss:$12 sps:$4 sm:$0xff]   ;;  %v5683_v50 = vld [vmem:[%s8388_s4 + $0x138] ss:$12 sps:$4 sm:$0xff]   ;;  %v5688_v53 = vld [vmem:[%s8388_s4 + $0x150] ss:$12 sps:$4 sm:$0xff]  }
  0x2a   : > { %5115 = vmatpush3.bf16.msra.mxu1 %v5680_v22  ;;  %v644_v33 = vld [vmem:[%s6567_s20] sm:$0xff]  ;;  %v5691_v54 = vld [vmem:[%s8388_s4 + $0x16c] ss:$12 sps:$4 sm:$0xff]   ;;  %v5717_v55 = vld [vmem:[%s8388_s4 + $0x1d0] ss:$12 sps:$4 sm:$0xff]   ;;  %s5586_s1 = smul.u32 48, %s6531_s24 }
  0x2b   : > { %1166 = vmatpush1.bf16.msra.mxu0 %v5648_v9  ;;  %5116 = vmatprep.subr.bf16.mxu1 %v5684_v24  ;;  %v655_v35 = vcombine.high %v644_v33, %v644_v33  ;;  %v657_v45 = vpack.c.bf16 %v644_v33, %v644_v33  ;;  %v5686_v51 = vld [vmem:[%s8388_s4 + $0x154] ss:$12 sps:$4 sm:$0xff]   ;;  %v5713_v52 = vld [vmem:[%s8388_s4 + $0x1b8] ss:$12 sps:$4 sm:$0xff]   ;;  %v5704_v60 = vld [vmem:[%s8388_s4 + $0x19c] ss:$12 sps:$4 sm:$0xff]  }
  0x2c   : > { %1167 = vmatprep.subr.bf16.mxu0 %v5649_v12  ;;  %v5693_v56 = vld [vmem:[%s8388_s4 + $0x168] ss:$12 sps:$4 sm:$0xff]   ;;  %v5699_v57 = vld [vmem:[%s8388_s4 + $0x184] ss:$12 sps:$4 sm:$0xff]   ;;  %v5697_v59 = vld [vmem:[%s8388_s4 + $0x180] ss:$12 sps:$4 sm:$0xff]  }
  0x2d   : > { %v658_v37 = vpack.c.bf16 %v655_v35, %v655_v35  ;;  %v5721_v58 = vld [vmem:[%s8388_s4 + $0x1e8] ss:$12 sps:$4 sm:$0xff]   ;;  %v5725_v61 = vld [vmem:[%s8388_s4 + $0x200] ss:$12 sps:$4 sm:$0xff]   ;;  %v5702_v62 = vld [vmem:[%s8388_s4 + $0x198] ss:$12 sps:$4 sm:$0xff]  }
  0x2e   : > { %5117 = vmatpush3.bf16.msra.mxu1 %v5685_v26  ;;  %v5708_v0 = vld [vmem:[%s8388_s4 + $0x1b4] ss:$12 sps:$4 sm:$0xff]   ;;  %v5729_v1 = vld [vmem:[%s8388_s4 + $0x218] ss:$12 sps:$4 sm:$0xff]   ;;  %v5706_v2 = vld [vmem:[%s8388_s4 + $0x1b0] ss:$12 sps:$4 sm:$0xff]  }
  0x2f   : > { %1168 = vmatpush1.bf16.msra.mxu0 %v5651_v15  ;;  %5118 = vmatprep.subr.bf16.mxu1 %v5689_v27  ;;  %v5712_v3 = vld [vmem:[%s8388_s4 + $0x1cc] ss:$12 sps:$4 sm:$0xff]   ;;  %v645_v4 = vld [vmem:[%s6567_s20 + $0x8] sm:$0xf]  ;;  %v5730_v5 = vld [vmem:[%s8388_s4 + $0x230] ss:$12 sps:$4 sm:$0xff]  }
  0x30   : > { %1169 = vmatprep.subr.bf16.mxu0 %v5652_v16  ;;  %1189 = vmatprep.mubr.bf16.mxu0 %v658_v37  ;;  %v5733_v6 = vld [vmem:[%s8390_s6 + $0x4] ss:$12 sps:$4 sm:$0xff]   ;;  %v5710_v7 = vld [vmem:[%s8388_s4 + $0x1c8] ss:$12 sps:$4 sm:$0xff]   ;;  %v5731_v9 = vld [vmem:[%s8390_s6] ss:$12 sps:$4 sm:$0xff]   ;;  %v659_v10 = vpack.c.bf16 %v645_v4, %v645_v4 }
  0x31   : > { %1271 = vmatprep.mubr.bf16.mxu1 %v658_v37  ;;  %v5716_v8 = vld [vmem:[%s8388_s4 + $0x1e4] ss:$12 sps:$4 sm:$0xff]   ;;  %v5736_v11 = vld [vmem:[%s8390_s6 + $0x1c] ss:$12 sps:$4 sm:$0xff]   ;;  %v5714_v12 = vld [vmem:[%s8388_s4 + $0x1e0] ss:$12 sps:$4 sm:$0xff]  }
  0x32   : > { %5119 = vmatpush3.bf16.msra.mxu1 %v5690_v30  ;;  %v5720_v13 = vld [vmem:[%s8388_s4 + $0x1fc] ss:$12 sps:$4 sm:$0xff]   ;;  %v5734_v14 = vld [vmem:[%s8390_s6 + $0x18] ss:$12 sps:$4 sm:$0xff]   ;;  %v5739_v15 = vld [vmem:[%s8390_s6 + $0x34] ss:$12 sps:$4 sm:$0xff]  }
  0x33   : > { %1170 = vmatpush1.bf16.msra.mxu0 %v5654_v19  ;;  %5120 = vmatprep.subr.bf16.mxu1 %v5694_v31  ;;  %v5718_v16 = vld [vmem:[%s8388_s4 + $0x1f8] ss:$12 sps:$4 sm:$0xff]   ;;  %v5724_v17 = vld [vmem:[%s8388_s4 + $0x214] ss:$12 sps:$4 sm:$0xff]   ;;  %v5722_v18 = vld [vmem:[%s8388_s4 + $0x210] ss:$12 sps:$4 sm:$0xff]  }
  0x34   : > { %1171 = vmatprep.subr.bf16.mxu0 %v5655_v20  ;;  %v5737_v19 = vld [vmem:[%s8390_s6 + $0x30] ss:$12 sps:$4 sm:$0xff]   ;;  %v5742_v20 = vld [vmem:[%s8390_s6 + $0x4c] ss:$12 sps:$4 sm:$0xff]   ;;  %v5740_v22 = vld [vmem:[%s8390_s6 + $0x48] ss:$12 sps:$4 sm:$0xff]  }
  0x35   : > { %v5728_v21 = vld [vmem:[%s8388_s4 + $0x22c] ss:$12 sps:$4 sm:$0xff]   ;;  %v5726_v24 = vld [vmem:[%s8388_s4 + $0x228] ss:$12 sps:$4 sm:$0xff]   ;;  %v5773_v37 = vld [vmem:[%s8390_s6 + $0x110] ss:$12 sps:$4 sm:$0xff]  }
  0x36   : > { %5121 = vmatpush3.bf16.msra.mxu1 %v5695_v36  ;;  %v5743_v26 = vld [vmem:[%s8390_s6 + $0x60] ss:$12 sps:$4 sm:$0xff]   ;;  %v5748_v27 = vld [vmem:[%s8390_s6 + $0x7c] ss:$12 sps:$4 sm:$0xff]   ;;  %v5746_v30 = vld [vmem:[%s8390_s6 + $0x78] ss:$12 sps:$4 sm:$0xff]  }
  0x37   : > { %1172 = vmatpush1.bf16.msra.mxu0 %v5657_v23  ;;  %5122 = vmatprep.subr.bf16.mxu1 %v5700_v38  ;;  %v5745_v23 = vld [vmem:[%s8390_s6 + $0x64] ss:$12 sps:$4 sm:$0xff]   ;;  %v5751_v31 = vld [vmem:[%s8390_s6 + $0x94] ss:$12 sps:$4 sm:$0xff]   ;;  %v5754_v35 = vld [vmem:[%s8390_s6 + $0xac] ss:$12 sps:$4 sm:$0xff]  }
  0x38   : > { %1173 = vmatprep.subr.bf16.mxu0 %v5658_v25  ;;  %v5758_v25 = vld [vmem:[%s8390_s6 + $0xc8] ss:$12 sps:$4 sm:$0xff]   ;;  %v5768_v33 = vld [vmem:[%s8390_s6 + $0xf8] ss:$12 sps:$4 sm:$0xff]   ;;  %s8424_s3 = sld [smem:[#allocation17_spill]]  ;;  %s8425_s25 = sld [smem:[#allocation16_spill]] }
  0x39   : > { %v5769_v36 = vld [vmem:[%s8390_s6 + $0x38] ss:$12 sps:$4 sm:$0xff]   ;;  %v5752_v38 = vld [vmem:[%s8390_s6 + $0xa8] ss:$12 sps:$4 sm:$0xff]   ;;  %s4739_s21 = sshll.u32 %s6531_s24, 2  ;;  %s8426_s17 = sld [smem:[#allocation14_spill]] }
  0x3a   : > { %5123 = vmatpush3.bf16.msra.mxu1 %v5701_v41  ;;  %v5778_v41 = vld [vmem:[%s8390_s6 + $0x128] ss:$12 sps:$4 sm:$0xff]   ;;  %s8263_s19 = sand.u32 1, %s6311_s28   ;;  %vm4410_vm12 = vcmask 125952   ;;  %vm4423_vm13 = vcmask 130048   ;;  %s6324_s22 = smov [#allocation4]  }
  0x3b   : > { %1174 = vmatpush1.bf16.msra.mxu0 %v5660_v28  ;;  %5334 = vmatprep.subr.bf16.mxu1 %v6321_v46  ;;  %v5759_v28 = vld [vmem:[%s8390_s6 + $0x8] ss:$12 sps:$4 sm:$0xff]   ;;  %s6229_s23 = sshll.u32 %s6324_s22, 4  ;;  %s6230_s23 = int_to_ptr.vmem [resolvable:$false] %s6229_s23 }
  0x3c   : > { %1175 = vmatprep.subr.bf16.mxu0 %v5661_v29  ;;  %v5763_v29 = vld [vmem:[%s8390_s6 + $0xe0] ss:$12 sps:$4 sm:$0xff]   ;;  %s6231_s27 = scalar_lea.vmem %s6230_s23, 128 }
  0x3d   : > { %1272 = vmatmul.mubr.bf16.vlgmr.msra.gmra.mrb[0].mxu1 %v657_v45 }
  0x3e   : > { %5335 = vmatpush3.bf16.msra.mxu1 %v5705_v44  ;;  %5350 = vmatprep.mubr.msk.bf16.mxu1 %vm6322_vm0, %v6321_v46  ;;  %v5779_v44 = vld [vmem:[%s8390_s6 + $0x68] ss:$12 sps:$4 sm:$0xff]   ;;  %s7080_s26 = scalar_lea.vmem %s8424_s3, %s5586_s1  ;;  %s5107_s1 = sshll.u32 %s6531_s24, 4 }
  0x3f   : > { %1176 = vmatpush1.bf16.msra.mxu0 %v5663_v32  ;;  %5336 = vmatprep.subr.bf16.mxu1 %v6321_v46  ;;  %v5764_v32 = vld [vmem:[%s8390_s6 + $0x20] ss:$12 sps:$4 sm:$0xff]   ;;  %s636_s29 = scalar_lea.vmem %s8425_s25, %s5107_s1  ;;  %s626_s30 = scalar_lea.vmem %s8426_s17, %s4739_s21 }
  0x40   : > { %1177 = vmatprep.subr.bf16.mxu0 %v5666_v34  ;;  %v5749_v34 = vld [vmem:[%s8390_s6 + $0x90] ss:$12 sps:$4 sm:$0xff]   ;;  %s4737_s25 = sshll.u32 %s8263_s19, 2 }
  0x41   : > { %s8269_s24 = scalar_lea.vmem [#allocation4], %s4737_s25 }
  0x42   : > { %5337 = vmatpush3.bf16.msra.mxu1 %v5709_v49  ;;  %v5784_v49 = vld [vmem:[%s8390_s6 + $0x80] ss:$12 sps:$4 sm:$0xff]   ;;  %s4606_s17 = sshll.u32 %s8269_s24, 4  ;;  %s4607_s17 = int_to_ptr.vmem [resolvable:$true] %s4606_s17 }
  0x43   : > { %1178 = vmatpush1.bf16.msra.mxu0 %v5668_v39  ;;  %5338 = vmatprep.subr.bf16.mxu1 %v6321_v46  ;;  %v5757_v39 = vld [vmem:[%s8390_s6 + $0xc4] ss:$12 sps:$4 sm:$0xff]   ;;  %p6232_p0 = scmp.lt.s32.totalorder %s4607_s17, %s6230_s23 }
  0x44   : > { %1179 = vmatprep.subr.bf16.mxu0 %v5671_v40  ;;  %v5774_v40 = vld [vmem:[%s8390_s6 + $0x50] ss:$12 sps:$4 sm:$0xff]  }
  0x46   : > { %5339 = vmatpush3.bf16.msra.mxu1 %v5713_v52  ;;  %v6818_v52 = vld [vmem:[%s8390_s6 + $0x108] ss:$12 sps:$4 sm:$0xff]  }
  0x47   : > { %1180 = vmatpush1.bf16.msra.mxu0 %v5673_v42  ;;  %5340 = vmatprep.subr.bf16.mxu1 %v6321_v46  ;;  %v5755_v42 = vld [vmem:[%s8390_s6 + $0xc0] ss:$12 sps:$4 sm:$0xff]  }
  0x48   : > { %1181 = vmatprep.subr.bf16.mxu0 %v5676_v43  ;;  %v5762_v43 = vld [vmem:[%s8390_s6 + $0xdc] ss:$12 sps:$4 sm:$0xff]  }
  0x4a   : > { %5341 = vmatpush3.bf16.msra.mxu1 %v5717_v55  ;;  %v6834_v55 = vld [vmem:[%s8390_s6 + $0x13c] ss:$12 sps:$4 sm:$0xff]  }
  0x4b   : > { %1182 = vmatpush1.bf16.msra.mxu0 %v5678_v47  ;;  %5342 = vmatprep.subr.bf16.mxu1 %v6321_v46  ;;  %v5760_v47 = vld [vmem:[%s8390_s6 + $0xd8] ss:$12 sps:$4 sm:$0xff]  }
  0x4c   : > { %1183 = vmatprep.subr.bf16.mxu0 %v5681_v48  ;;  %v5767_v48 = vld [vmem:[%s8390_s6 + $0xf4] ss:$12 sps:$4 sm:$0xff]  }
  0x4e   : > { %5343 = vmatpush3.bf16.msra.mxu1 %v5721_v58  ;;  %v6854_v58 = vld [vmem:[%s8390_s6 + $0x158] ss:$12 sps:$4 sm:$0xff]  }
  0x4f   : > { %1184 = vmatpush1.bf16.msra.mxu0 %v5683_v50  ;;  %5344 = vmatprep.subr.bf16.mxu1 %v6321_v46  ;;  %v5765_v50 = vld [vmem:[%s8390_s6 + $0xf0] ss:$12 sps:$4 sm:$0xff]  }
  0x50   : > { %1185 = vmatprep.subr.bf16.mxu0 %v5686_v51  ;;  %v6813_v51 = vld [vmem:[%s8390_s6 + $0x10c] ss:$12 sps:$4 sm:$0xff]  }
  0x52   : > { %5345 = vmatpush3.bf16.msra.mxu1 %v5725_v61  ;;  %v6873_v61 = vld [vmem:[%s8390_s6 + $0x16c] ss:$12 sps:$4 sm:$0xff]  }
  0x53   : > { %1186 = vmatpush1.bf16.msra.mxu0 %v5688_v53  ;;  %5346 = vmatprep.subr.bf16.mxu1 %v6321_v46  ;;  %v6823_v53 = vld [vmem:[%s8390_s6 + $0x124] ss:$12 sps:$4 sm:$0xff]  }
  0x54   : > { %1187 = vmatprep.subr.bf16.mxu0 %v5691_v54  ;;  %v6829_v54 = vld [vmem:[%s8390_s6 + $0x120] ss:$12 sps:$4 sm:$0xff]  }
  0x56   : > { %5347 = vmatpush3.bf16.msra.mxu1 %v5729_v1  ;;  %v6888_v1 = vld [vmem:[%s8390_s6 + $0xb0] ss:$12 sps:$4 sm:$0xff]  }
  0x57   : > { %1188 = vmatpush1.bf16.msra.mxu0 %v5693_v56  ;;  %5348 = vmatprep.subr.bf16.mxu1 %v6321_v46  ;;  %v6841_v56 = vld [vmem:[%s8390_s6 + $0x138] ss:$12 sps:$4 sm:$0xff]  }
  0x58   : > { %1198 = vmatprep.subr.bf16.mxu0 %v5699_v57  ;;  %v6849_v57 = vld [vmem:[%s8390_s6 + $0x154] ss:$12 sps:$4 sm:$0xff]  }
  0x5a   : > { %1190 = vmatmul.mubr.bf16.vlgmr.msra.gmra.mrb[0].mxu0 %v657_v45  ;;  %5349 = vmatpush3.bf16.msra.mxu1 %v5730_v5  ;;  %v5783_v45 = vld [vmem:[%s8390_s6 + $0x140] ss:$12 sps:$4 sm:$0xff]  }
  0x5b   : > { %1199 = vmatpush1.bf16.msra.mxu0 %v5697_v59  ;;  %1230 = vmatprep.mubr.bf16.mxu0 %v6323_v63  ;;  %v6859_v59 = vld [vmem:[%s8390_s6 + $0x150] ss:$12 sps:$4 sm:$0xff]  }
  0x5c   : > { %1200 = vmatprep.subr.bf16.mxu0 %v5704_v60  ;;  %1828 = vmatprep.subr.bf16.mxu1 %v5733_v6  ;;  %v6864_v60 = vld [vmem:[%s8390_s6 + $0x98] ss:$12 sps:$4 sm:$0xff]  }
  0x5d   : > { %5351 = vmatmul.mubr.bf16.vlgmr.msra.gmra.mrb[4].mxu1 %v659_v10 }
  0x5e   : > { %1829 = vmatpush1.bf16.msra.mxu1 %v5731_v9 }
  0x5f   : > { %1201 = vmatpush1.bf16.msra.mxu0 %v5702_v62  ;;  %1830 = vmatprep.subr.bf16.mxu1 %v5736_v11  ;;  %v6878_v62 = vld [vmem:[%s8390_s6 + $0x170] ss:$12 sps:$4 sm:$0xff]   ;;  %v756_v11 = vld [vmem:[%s8389_s5] sm:$0x7] }
  0x60   : > { %1202 = vmatprep.subr.bf16.mxu0 %v5708_v0  ;;  %v6883_v0 = vld [vmem:[%s8390_s6 + $0x168] ss:$12 sps:$4 sm:$0xff]  }
  0x62   : > { %1831 = vmatpush1.bf16.msra.mxu1 %v5734_v14 }
  0x63   : > { %1203 = vmatpush1.bf16.msra.mxu0 %v5706_v2  ;;  %1832 = vmatprep.subr.bf16.mxu1 %v5739_v15  ;;  %v6897_v2 = vld [vmem:[%s8390_s6 + $0x184] ss:$12 sps:$4 sm:$0xff]  }
  0x64   : > { %1204 = vmatprep.subr.bf16.mxu0 %v5712_v3 }
  0x66   : > { %1833 = vmatpush1.bf16.msra.mxu1 %v5737_v19 }
  0x67   : > { %1205 = vmatpush1.bf16.msra.mxu0 %v5710_v7  ;;  %1834 = vmatprep.subr.bf16.mxu1 %v5742_v20 }
  0x68   : > { %1206 = vmatprep.subr.bf16.mxu0 %v5716_v8  ;;  %v758_v8 = vlaneseq }
  0x6a   : > { %1835 = vmatpush1.bf16.msra.mxu1 %v5740_v22  ;;  %v6902_v9 = vshrl.u32 %v758_v8, 7 }
  0x6b   : > { %1207 = vmatpush1.bf16.msra.mxu0 %v5714_v12  ;;  %1836 = vmatprep.subr.bf16.mxu1 %v5745_v23 }
  0x6c   : > { %1208 = vmatprep.subr.bf16.mxu0 %v5720_v13  ;;  %v6917_v19 = vsub.s32 0, %v6902_v9  ;;  %v6920_v20 = vsub.s32 1, %v6902_v9 }
  0x6e   : > { %1837 = vmatpush1.bf16.msra.mxu1 %v5743_v26  ;;  %v6926_v22 = vrot.slane %v756_v11, %v6920_v20 }
  0x6f   : > { %1209 = vmatpush1.bf16.msra.mxu0 %v5718_v16  ;;  %1838 = vmatprep.subr.bf16.mxu1 %v5748_v27 }
  0x70   : > { %1210 = vmatprep.subr.bf16.mxu0 %v5724_v17 }
  0x72   : > { %1839 = vmatpush1.bf16.msra.mxu1 %v5746_v30 }
  0x73   : > { %1211 = vmatpush1.bf16.msra.mxu0 %v5722_v18  ;;  %1840 = vmatprep.subr.bf16.mxu1 %v5751_v31 }
  0x74   : > { %1212 = vmatprep.subr.bf16.mxu0 %v5728_v21  ;;  %v6923_v21 = vrot.slane %v756_v11, %v6917_v19 }
  0x76   : > { %1841 = vmatpush1.bf16.msra.mxu1 %v5749_v34  ;;  %v6933_v34 = vld [vmem:[%s8390_s6 + $0x180] ss:$12 sps:$4 sm:$0xff]  }
  0x77   : > { %1213 = vmatpush1.bf16.msra.mxu0 %v5726_v24  ;;  %1842 = vmatprep.subr.bf16.mxu1 %v5754_v35  ;;  %v6938_v35 = vld [vmem:[%s8390_s6 + $0x188] ss:$12 sps:$4 sm:$0xff]  }
  0x78   : > { %5139 = vmatprep.subr.bf16.mxu0 %v5758_v25 }
  0x7a   : > { %1231 = vmatmul.mubr.bf16.vlgmr.msra.gmra.mrb[0].mxu0 %v659_v10  ;;  %1843 = vmatpush1.bf16.msra.mxu1 %v5752_v38  ;;  %v6905_v10 = vsub.s32 2, %v6902_v9  ;;  %v6950_v38 = vld [vmem:[%s8390_s6 + $0x198] ss:$12 sps:$4 sm:$0xff]  }
  0x7b   : > { %5140 = vmatpush3.bf16.msra.mxu0 %v5759_v28  ;;  %1844 = vmatprep.subr.bf16.mxu1 %v5757_v39  ;;  %v6955_v39 = vld [vmem:[%s8390_s6 + $0x1a0] ss:$12 sps:$4 sm:$0xff]  }
  0x7c   : > { %5141 = vmatprep.subr.bf16.mxu0 %v5763_v29  ;;  %v6911_v12 = vrot.slane %v756_v11, %v6905_v10  ;;  %v7061_v11 = vld [vmem:[%s8390_s6 + $0x22c] ss:$12 sps:$4 sm:$0xff]  }
  0x7e   : > { %1845 = vmatpush1.bf16.msra.mxu1 %v5755_v42  ;;  %v6977_v42 = vld [vmem:[%s8390_s6 + $0x1b8] ss:$12 sps:$4 sm:$0xff]  }
  0x7f   : > { %5142 = vmatpush3.bf16.msra.mxu0 %v5764_v32  ;;  %1846 = vmatprep.subr.bf16.mxu1 %v5762_v43  ;;  %v6984_v43 = vld [vmem:[%s8390_s6 + $0x1cc] ss:$12 sps:$4 sm:$0xff]  }
  0x80   : > { %5143 = vmatprep.subr.bf16.mxu0 %v5768_v33 }
  0x82   : > { %1847 = vmatpush1.bf16.msra.mxu1 %v5760_v47  ;;  %v7003_v47 = vld [vmem:[%s8390_s6 + $0x1e4] ss:$12 sps:$4 sm:$0xff]  }
  0x83   : > { %5144 = vmatpush3.bf16.msra.mxu0 %v5769_v36  ;;  %1848 = vmatprep.subr.bf16.mxu1 %v5767_v48  ;;  %v7010_v48 = vld [vmem:[%s8390_s6 + $0x1e0] ss:$12 sps:$4 sm:$0xff]  }
  0x84   : > { %5145 = vmatprep.subr.bf16.mxu0 %v5773_v37  ;;  %v6943_v37 = vld [vmem:[%s8390_s6 + $0x19c] ss:$12 sps:$4 sm:$0xff]  }
  0x86   : > { %1849 = vmatpush1.bf16.msra.mxu1 %v5765_v50  ;;  %v7022_v50 = vld [vmem:[%s8390_s6 + $0x1fc] ss:$12 sps:$4 sm:$0xff]  }
  0x87   : > { %5146 = vmatpush3.bf16.msra.mxu0 %v5774_v40  ;;  %1850 = vmatprep.subr.bf16.mxu1 %v6813_v51  ;;  %v6962_v40 = vld [vmem:[%s8390_s6 + $0x1b4] ss:$12 sps:$4 sm:$0xff]  }
  0x88   : > { %5147 = vmatprep.subr.bf16.mxu0 %v5778_v41  ;;  %v6972_v41 = vld [vmem:[%s8390_s6 + $0x1b0] ss:$12 sps:$4 sm:$0xff]  }
  0x8a   : > { %1851 = vmatpush1.bf16.msra.mxu1 %v6818_v52 }
  0x8b   : > { %5148 = vmatpush3.bf16.msra.mxu0 %v5779_v44  ;;  %1852 = vmatprep.subr.bf16.mxu1 %v6823_v53  ;;  %v6991_v44 = vld [vmem:[%s8390_s6 + $0x1c8] ss:$12 sps:$4 sm:$0xff]  }
  0x8c   : > { %5149 = vmatprep.subr.bf16.mxu0 %v5783_v45  ;;  %v6996_v45 = vld [vmem:[%s8390_s6 + $0x1d0] ss:$12 sps:$4 sm:$0xff]  }
  0x8e   : > { %1853 = vmatpush1.bf16.msra.mxu1 %v6829_v54 }
  0x8f   : > { %5150 = vmatpush3.bf16.msra.mxu0 %v5784_v49  ;;  %1854 = vmatprep.subr.bf16.mxu1 %v6834_v55  ;;  %v7015_v49 = vld [vmem:[%s8390_s6 + $0x1e8] ss:$12 sps:$4 sm:$0xff]  }
  0x90   : > { %5151 = vmatprep.subr.bf16.mxu0 %v6854_v58 }
  0x92   : > { %1855 = vmatpush1.bf16.msra.mxu1 %v6841_v56 }
  0x93   : > { %1856 = vmatprep.subr.bf16.mxu1 %v6849_v57  ;;  %5152 = vmatpush3.bf16.msra.mxu0 %v6864_v60 }
  0x94   : > { %5153 = vmatprep.subr.bf16.mxu0 %v6878_v62 }
  0x96   : > { %1857 = vmatpush1.bf16.msra.mxu1 %v6859_v59 }
  0x97   : > { %1858 = vmatprep.subr.bf16.mxu1 %v6873_v61  ;;  %5154 = vmatpush3.bf16.msra.mxu0 %v6888_v1 }
  0x98   : > { %5354 = vmatprep.subr.bf16.mxu0 %v6321_v46 }
  0x9a   : > { %1859 = vmatpush1.bf16.msra.mxu1 %v6883_v0 }
  0x9b   : > { %1869 = vmatprep.subr.bf16.mxu1 %v6897_v2 }
 0x110   : > { %v5124_v3 = vpop.f32.mrb[0].mxu1 }
 0x111   : > { %v5125_v4 = vpop.f32.mrb[1].mxu1 }
 0x112   : > { %v5126_v5 = vadd.f32 %v5125_v4, %v5124_v3  ;;  %v5127_v6 = vpop.f32.mrb[2].mxu1  ;;  %v7029_v3 = vld [vmem:[%s8390_s6 + $0x1f8] ss:$12 sps:$4 sm:$0xff]   ;;  %v7034_v4 = vld [vmem:[%s8390_s6 + $0x200] ss:$12 sps:$4 sm:$0xff]  }
 0x113   : > { %v5128_v7 = vpop.f32.mrb[3].mxu1  ;;  %v7048_v6 = vld [vmem:[%s8390_s6 + $0x210] ss:$12 sps:$4 sm:$0xff]  }
 0x114   : > { %v1274_v13 = vadd.f32 %v5126_v5, %v6911_v12  ;;  %v7041_v5 = vld [vmem:[%s8390_s6 + $0x214] ss:$12 sps:$4 sm:$0xff]   ;;  %v7053_v7 = vld [vmem:[%s8390_s6 + $0x218] ss:$12 sps:$4 sm:$0xff]  }
 0x130   : > { %v1313_v14 = vpop.f32.mrb[4].mxu1 }
 0x131   : > { %v6914_v15 = vadd.f32 %v1313_v14, %v1274_v13  ;;  %v5352_v16 = vpop.f32.mrb[5].mxu1  ;;  %v7070_v14 = vld [vmem:[%s8390_s6 + $0x228] ss:$12 sps:$4 sm:$0xff]  }
 0x132   : > { %v1316_v17 = vpop.f32.mrb[6].mxu1  ;;  %v7075_v16 = vld [vmem:[%s8390_s6 + $0x230] ss:$12 sps:$4 sm:$0xff]  }
 0x133   : > { %v5353_v18 = vpop.f32.mrb[7].mxu1  ;;  %v1324_v13 = vmul.f32 0.1, %v6914_v15  ;;  %vm1321_vm3 = vcmp.ge.f32.partialorder %v6914_v15, 0.0 }
 0x134   : > { %v649_v18 = vld [vmem:[%s7080_s26 + $0x8] sm:$0xff] }
 0x135   : > { %v1327_v17 = vsel %vm1321_vm3, %v6914_v15, %v1324_v13  ;;  %v6121_v15 = vld [vmem:[%s8388_s4] ss:$12 sps:$4 sm:$0xff]   ;;  %v6129_v13 = vld [vmem:[%s8388_s4 + $0x30] ss:$12 sps:$4 sm:$0xff]  }
 0x14d   : > { %v1232_v23 = vpop.f32.mrb[0].mxu0 }
 0x14e   : > { %v5546_v24 = vadd.f32 %v1232_v23, %v6923_v21  ;;  %v1234_v25 = vpop.f32.mrb[1].mxu0  ;;  %v652_v23 = vld [vmem:[%s7080_s26 + $0x20] sm:$0xff] }
 0x14f   : > { %v5547_v26 = vadd.f32 %v1234_v25, %v6926_v22  ;;  %v1236_v27 = vpop.f32.mrb[2].mxu0  ;;  %v6119_v25 = vld [vmem:[%s8388_s4 + $0x4] ss:$12 sps:$4 sm:$0xff]  }
 0x150   : > { %vm1319_vm1 = vcmp.ge.f32.partialorder %v5546_v24, 0.0  ;;  %v1322_v28 = vmul.f32 0.1, %v5546_v24  ;;  %v1237_v29 = vpop.f32.mrb[3].mxu0  ;;  %v1991_v27 = vpack.c.bf16 %v652_v23, %v649_v18  ;;  %v6131_v18 = vld [vmem:[%s8388_s4 + $0x4c] ss:$12 sps:$4 sm:$0xff]  }
 0x151   : > { %vm1320_vm2 = vcmp.ge.f32.partialorder %v5547_v26, 0.0  ;;  %v1323_v30 = vmul.f32 0.1, %v5547_v26  ;;  %v6123_v29 = vld [vmem:[%s8388_s4 + $0x1c] ss:$12 sps:$4 sm:$0xff]  }
 0x152   : > { %v1325_v31 = vsel %vm1319_vm1, %v5546_v24, %v1322_v28  ;;  %v1330_v24 = vpack.c.bf16 %v1327_v17, %v1327_v17  ;;  %v6122_v28 = vld [vmem:[%s8388_s4 + $0x8] ss:$12 sps:$4 sm:$0xff]   ;;  %v6130_v17 = vld [vmem:[%s8388_s4 + $0x38] ss:$12 sps:$4 sm:$0xff]   ;;  %v6132_v23 = vld [vmem:[%s8388_s4 + $0x110] ss:$12 sps:$4 sm:$0xff]  }
 0x153   : > { %v1326_v32 = vsel %vm1320_vm2, %v5547_v26, %v1323_v30  ;;  %v1328_v36 = vpack.c.bf16 %v1325_v31, %v1325_v31  ;;  %v6120_v26 = vld [vmem:[%s8388_s4 + $0xc8] ss:$12 sps:$4 sm:$0xff]   ;;  %v6124_v30 = vld [vmem:[%s8388_s4 + $0xe0] ss:$12 sps:$4 sm:$0xff]   ;;  %v6125_v31 = vld [vmem:[%s8388_s4 + $0x18] ss:$12 sps:$4 sm:$0xff]  }
 0x154   : > { %v1329_v33 = vpack.c.bf16 %v1326_v32, %v1326_v32  ;;  %v6126_v32 = vld [vmem:[%s8388_s4 + $0x20] ss:$12 sps:$4 sm:$0xff]  }
 0x156   : > { %1860 = vmatprep.mubr.bf16.mxu1 %v1329_v33  ;;  %1942 = vmatprep.mubr.bf16.mxu0 %v1329_v33  ;;  %v6127_v33 = vld [vmem:[%s8388_s4 + $0x34] ss:$12 sps:$4 sm:$0xff]  }
 0x157   : > { %1861 = vmatmul.mubr.bf16.vlgmr.msra.gmra.mrb[8].mxu1 %v1328_v36  ;;  %1943 = vmatmul.mubr.bf16.vlgmr.msra.gmra.mrb[4].mxu0 %v1328_v36  ;;  %v6128_v36 = vld [vmem:[%s8388_s4 + $0xf8] ss:$12 sps:$4 sm:$0xff]  }
 0x158   : > { %1870 = vmatpush1.bf16.msra.mxu1 %v6933_v34  ;;  %5355 = vmatpush3.bf16.msra.mxu0 %v6938_v35 }
 0x159   : > { %1871 = vmatprep.subr.bf16.mxu1 %v6943_v37  ;;  %5356 = vmatprep.subr.bf16.mxu0 %v6321_v46 }
 0x15a   : > { %1901 = vmatprep.mubr.bf16.mxu1 %v6323_v63  ;;  %5370 = vmatprep.mubr.msk.bf16.mxu0 %vm6322_vm0, %v6321_v46 }
 0x15c   : > { %1872 = vmatpush1.bf16.msra.mxu1 %v6950_v38  ;;  %5357 = vmatpush3.bf16.msra.mxu0 %v6955_v39 }
 0x15d   : > { %1873 = vmatprep.subr.bf16.mxu1 %v6962_v40  ;;  %5358 = vmatprep.subr.bf16.mxu0 %v6321_v46 }
 0x160   : > { %1874 = vmatpush1.bf16.msra.mxu1 %v6972_v41  ;;  %5359 = vmatpush3.bf16.msra.mxu0 %v6977_v42 }
 0x161   : > { %1875 = vmatprep.subr.bf16.mxu1 %v6984_v43  ;;  %5360 = vmatprep.subr.bf16.mxu0 %v6321_v46 }
 0x164   : > { %1876 = vmatpush1.bf16.msra.mxu1 %v6991_v44  ;;  %5361 = vmatpush3.bf16.msra.mxu0 %v6996_v45 }
 0x165   : > { %1877 = vmatprep.subr.bf16.mxu1 %v7003_v47  ;;  %5362 = vmatprep.subr.bf16.mxu0 %v6321_v46 }
 0x168   : > { %1878 = vmatpush1.bf16.msra.mxu1 %v7010_v48  ;;  %5363 = vmatpush3.bf16.msra.mxu0 %v7015_v49 }
 0x169   : > { %1879 = vmatprep.subr.bf16.mxu1 %v7022_v50  ;;  %5364 = vmatprep.subr.bf16.mxu0 %v6321_v46 }
 0x16c   : > { %1880 = vmatpush1.bf16.msra.mxu1 %v7029_v3  ;;  %5365 = vmatpush3.bf16.msra.mxu0 %v7034_v4 }
 0x16d   : > { %1881 = vmatprep.subr.bf16.mxu1 %v7041_v5  ;;  %5366 = vmatprep.subr.bf16.mxu0 %v6321_v46 }
 0x170   : > { %1882 = vmatpush1.bf16.msra.mxu1 %v7048_v6  ;;  %5367 = vmatpush3.bf16.msra.mxu0 %v7053_v7 }
 0x171   : > { %1883 = vmatprep.subr.bf16.mxu1 %v7061_v11  ;;  %5368 = vmatprep.subr.bf16.mxu0 %v6321_v46 }
 0x174   : > { %1884 = vmatpush1.bf16.msra.mxu1 %v7070_v14  ;;  %5369 = vmatpush3.bf16.msra.mxu0 %v7075_v16 }
 0x175   : > { %1993 = vmatprep.subr.bf16.mxu0 %v6119_v25  ;;  %5170 = vmatprep.subr.bf16.mxu1 %v6120_v26  ;;  %v6134_v25 = vld [vmem:[%s8388_s4 + $0x50] ss:$12 sps:$4 sm:$0xff]  }
 0x176   : > { %v6135_v26 = vld [vmem:[%s8388_s4 + $0x64] ss:$12 sps:$4 sm:$0xff]  }
 0x177   : > { %1902 = vmatmul.mubr.bf16.vlgmr.msra.gmra.mrb[8].mxu1 %v1330_v24  ;;  %5371 = vmatmul.mubr.bf16.vlgmr.msra.gmra.mrb[8].mxu0 %v1330_v24  ;;  %v6133_v24 = vld [vmem:[%s8388_s4 + $0x48] ss:$12 sps:$4 sm:$0xff]  }
 0x178   : > { %1994 = vmatpush1.bf16.msra.mxu0 %v6121_v15  ;;  %5171 = vmatpush3.bf16.msra.mxu1 %v6122_v28  ;;  %v6137_v15 = vld [vmem:[%s8388_s4 + $0x60] ss:$12 sps:$4 sm:$0xff]   ;;  %v6138_v28 = vld [vmem:[%s8388_s4 + $0x68] ss:$12 sps:$4 sm:$0xff]  }
 0x179   : > { %1995 = vmatprep.subr.bf16.mxu0 %v6123_v29  ;;  %5172 = vmatprep.subr.bf16.mxu1 %v6124_v30  ;;  %v6139_v29 = vld [vmem:[%s8388_s4 + $0x7c] ss:$12 sps:$4 sm:$0xff]   ;;  %v6140_v30 = vld [vmem:[%s8388_s4 + $0x140] ss:$12 sps:$4 sm:$0xff]  }
 0x17a   : > { %2025 = vmatprep.mubr.bf16.mxu0 %v1991_v27  ;;  %2111 = vmatprep.mubr.bf16.mxu1 %v1991_v27  ;;  %v6136_v27 = vld [vmem:[%s8388_s4 + $0x128] ss:$12 sps:$4 sm:$0xff]  }
 0x17c   : > { %1996 = vmatpush1.bf16.msra.mxu0 %v6125_v31  ;;  %5173 = vmatpush3.bf16.msra.mxu1 %v6126_v32  ;;  %v6141_v31 = vld [vmem:[%s8388_s4 + $0x78] ss:$12 sps:$4 sm:$0xff]   ;;  %v6142_v32 = vld [vmem:[%s8388_s4 + $0x80] ss:$12 sps:$4 sm:$0xff]  }
 0x17d   : > { %1997 = vmatprep.subr.bf16.mxu0 %v6127_v33  ;;  %5174 = vmatprep.subr.bf16.mxu1 %v6128_v36  ;;  %v6143_v33 = vld [vmem:[%s8388_s4 + $0x94] ss:$12 sps:$4 sm:$0xff]   ;;  %v6144_v36 = vld [vmem:[%s8388_s4 + $0x158] ss:$12 sps:$4 sm:$0xff]  }
 0x180   : > { %1998 = vmatpush1.bf16.msra.mxu0 %v6129_v13  ;;  %5175 = vmatpush3.bf16.msra.mxu1 %v6130_v17  ;;  %v6145_v13 = vld [vmem:[%s8388_s4 + $0x90] ss:$12 sps:$4 sm:$0xff]   ;;  %v6146_v17 = vld [vmem:[%s8388_s4 + $0x98] ss:$12 sps:$4 sm:$0xff]  }
 0x181   : > { %1999 = vmatprep.subr.bf16.mxu0 %v6131_v18  ;;  %5176 = vmatprep.subr.bf16.mxu1 %v6132_v23  ;;  %v6147_v18 = vld [vmem:[%s8388_s4 + $0xac] ss:$12 sps:$4 sm:$0xff]   ;;  %v6148_v23 = vld [vmem:[%s8388_s4 + $0x170] ss:$12 sps:$4 sm:$0xff]  }
 0x184   : > { %2000 = vmatpush1.bf16.msra.mxu0 %v6133_v24  ;;  %5177 = vmatpush3.bf16.msra.mxu1 %v6134_v25  ;;  %v648_v24 = vld [vmem:[%s7080_s26] sm:$0xff]  ;;  %v651_v25 = vld [vmem:[%s7080_s26 + $0x18] sm:$0xff] }
 0x185   : > { %2001 = vmatprep.subr.bf16.mxu0 %v6135_v26  ;;  %5178 = vmatprep.subr.bf16.mxu1 %v6136_v27  ;;  %v6149_v26 = vld [vmem:[%s8388_s4 + $0xa8] ss:$12 sps:$4 sm:$0xff]   ;;  %v6150_v27 = vld [vmem:[%s8388_s4 + $0xb0] ss:$12 sps:$4 sm:$0xff]  }
 0x188   : > { %2002 = vmatpush1.bf16.msra.mxu0 %v6137_v15  ;;  %5179 = vmatpush3.bf16.msra.mxu1 %v6138_v28  ;;  %v6151_v15 = vld [vmem:[%s8388_s4 + $0xc4] ss:$12 sps:$4 sm:$0xff]   ;;  %v7190_v28 = vpack.c.bf16 %v651_v25, %v648_v24 }
 0x189   : > { %2003 = vmatprep.subr.bf16.mxu0 %v6139_v29  ;;  %5180 = vmatprep.subr.bf16.mxu1 %v6140_v30  ;;  %v6152_v29 = vld [vmem:[%s8388_s4 + $0xc0] ss:$12 sps:$4 sm:$0xff]   ;;  %v6153_v30 = vld [vmem:[%s8388_s4 + $0x188] ss:$12 sps:$4 sm:$0xff]   ;;  %v6162_v24 = vld [vmem:[%s8388_s4 + $0x1d0] ss:$12 sps:$4 sm:$0xff]  }
 0x18a   : > { %v6163_v25 = vld [vmem:[%s8388_s4 + $0x124] ss:$12 sps:$4 sm:$0xff]  }
 0x18c   : > { %2004 = vmatpush1.bf16.msra.mxu0 %v6141_v31  ;;  %5181 = vmatpush3.bf16.msra.mxu1 %v6142_v32  ;;  %v6154_v31 = vld [vmem:[%s8388_s4 + $0xdc] ss:$12 sps:$4 sm:$0xff]   ;;  %v6155_v32 = vld [vmem:[%s8388_s4 + $0xd8] ss:$12 sps:$4 sm:$0xff]  }
 0x18d   : > { %2005 = vmatprep.subr.bf16.mxu0 %v6143_v33  ;;  %5182 = vmatprep.subr.bf16.mxu1 %v6144_v36  ;;  %v6156_v33 = vld [vmem:[%s8388_s4 + $0x1a0] ss:$12 sps:$4 sm:$0xff]  }
 0x18e   : > { %v6157_v36 = vld [vmem:[%s8388_s4 + $0xf4] ss:$12 sps:$4 sm:$0xff]  }
 0x190   : > { %2006 = vmatpush1.bf16.msra.mxu0 %v6145_v13  ;;  %5183 = vmatpush3.bf16.msra.mxu1 %v6146_v17  ;;  %v6158_v13 = vld [vmem:[%s8388_s4 + $0xf0] ss:$12 sps:$4 sm:$0xff]   ;;  %v6159_v17 = vld [vmem:[%s8388_s4 + $0x1b8] ss:$12 sps:$4 sm:$0xff]  }
 0x191   : > { %2007 = vmatprep.subr.bf16.mxu0 %v6147_v18  ;;  %5184 = vmatprep.subr.bf16.mxu1 %v6148_v23  ;;  %v6160_v18 = vld [vmem:[%s8388_s4 + $0x10c] ss:$12 sps:$4 sm:$0xff]   ;;  %v6161_v23 = vld [vmem:[%s8388_s4 + $0x108] ss:$12 sps:$4 sm:$0xff]  }
 0x194   : > { %2008 = vmatpush1.bf16.msra.mxu0 %v6149_v26  ;;  %5185 = vmatpush3.bf16.msra.mxu1 %v6150_v27  ;;  %v6164_v26 = vld [vmem:[%s8388_s4 + $0x120] ss:$12 sps:$4 sm:$0xff]   ;;  %v6165_v27 = vld [vmem:[%s8388_s4 + $0x1e8] ss:$12 sps:$4 sm:$0xff]  }
 0x195   : > { %2009 = vmatprep.subr.bf16.mxu0 %v6151_v15  ;;  %5374 = vmatprep.subr.bf16.mxu1 %v6321_v46  ;;  %v6166_v15 = vld [vmem:[%s8388_s4 + $0x13c] ss:$12 sps:$4 sm:$0xff]  }
 0x197   : > { %2112 = vmatmul.mubr.bf16.vlgmr.msra.gmra.mrb[12].mxu1 %v7190_v28 }
 0x198   : > { %2010 = vmatpush1.bf16.msra.mxu0 %v6152_v29  ;;  %5375 = vmatpush3.bf16.msra.mxu1 %v6153_v30  ;;  %v6167_v29 = vld [vmem:[%s8388_s4 + $0x138] ss:$12 sps:$4 sm:$0xff]   ;;  %v6168_v30 = vld [vmem:[%s8388_s4 + $0x200] ss:$12 sps:$4 sm:$0xff]  }
 0x199   : > { %2011 = vmatprep.subr.bf16.mxu0 %v6154_v31  ;;  %5376 = vmatprep.subr.bf16.mxu1 %v6321_v46  ;;  %v6169_v31 = vld [vmem:[%s8388_s4 + $0x154] ss:$12 sps:$4 sm:$0xff]  }
 0x19a   : > { %5390 = vmatprep.mubr.msk.bf16.mxu1 %vm6322_vm0, %v6321_v46 }
 0x19c   : > { %2012 = vmatpush1.bf16.msra.mxu0 %v6155_v32  ;;  %5377 = vmatpush3.bf16.msra.mxu1 %v6156_v33  ;;  %v6170_v32 = vld [vmem:[%s8388_s4 + $0x150] ss:$12 sps:$4 sm:$0xff]   ;;  %v6171_v33 = vld [vmem:[%s8388_s4 + $0x218] ss:$12 sps:$4 sm:$0xff]  }
 0x19d   : > { %2013 = vmatprep.subr.bf16.mxu0 %v6157_v36  ;;  %5378 = vmatprep.subr.bf16.mxu1 %v6321_v46  ;;  %v6172_v36 = vld [vmem:[%s8388_s4 + $0x16c] ss:$12 sps:$4 sm:$0xff]  }
 0x1a0   : > { %2014 = vmatpush1.bf16.msra.mxu0 %v6158_v13  ;;  %5379 = vmatpush3.bf16.msra.mxu1 %v6159_v17  ;;  %v650_v13 = vld [vmem:[%s7080_s26 + $0x10] sm:$0xff]  ;;  %v653_v17 = vld [vmem:[%s7080_s26 + $0x28] sm:$0xff]  ;;  %s5103_s26 = sshll.u32 %s6442_s0, 6 }
 0x1a1   : > { %2015 = vmatprep.subr.bf16.mxu0 %v6160_v18  ;;  %5380 = vmatprep.subr.bf16.mxu1 %v6321_v46  ;;  %v6173_v18 = vld [vmem:[%s8388_s4 + $0x168] ss:$12 sps:$4 sm:$0xff]   ;;  %s8312_s3 = scalar_lea.hbm %s8402_s18, %s5103_s26 }
 0x1a4   : > { %2016 = vmatpush1.bf16.msra.mxu0 %v6161_v23  ;;  %5381 = vmatpush3.bf16.msra.mxu1 %v6162_v24  ;;  %v6174_v23 = vld [vmem:[%s8388_s4 + $0x230] ss:$12 sps:$4 sm:$0xff]  }
 0x1a5   : > { %2017 = vmatprep.subr.bf16.mxu0 %v6163_v25  ;;  %5382 = vmatprep.subr.bf16.mxu1 %v6321_v46  ;;  %v6175_v24 = vld [vmem:[%s8388_s4 + $0x184] ss:$12 sps:$4 sm:$0xff]   ;;  %v7277_v25 = vpack.c.bf16 %v653_v17, %v650_v13  ;;  %v6186_v13 = vld [vmem:[%s8388_s4 + $0x1cc] ss:$12 sps:$4 sm:$0xff]  }
 0x1a6   : > { %v6187_v17 = vld [vmem:[%s8390_s6 + $0x30] ss:$12 sps:$4 sm:$0xff]  }
 0x1a8   : > { %2018 = vmatpush1.bf16.msra.mxu0 %v6164_v26  ;;  %5383 = vmatpush3.bf16.msra.mxu1 %v6165_v27  ;;  %v6176_v26 = vld [vmem:[%s8390_s6 + $0x4] ss:$12 sps:$4 sm:$0xff]   ;;  %v6177_v27 = vld [vmem:[%s8388_s4 + $0x180] ss:$12 sps:$4 sm:$0xff]  }
 0x1a9   : > { %2019 = vmatprep.subr.bf16.mxu0 %v6166_v15  ;;  %5384 = vmatprep.subr.bf16.mxu1 %v6321_v46  ;;  %v6178_v15 = vld [vmem:[%s8388_s4 + $0x19c] ss:$12 sps:$4 sm:$0xff]  }
 0x1ac   : > { %2020 = vmatpush1.bf16.msra.mxu0 %v6167_v29  ;;  %5385 = vmatpush3.bf16.msra.mxu1 %v6168_v30  ;;  %v6179_v29 = vld [vmem:[%s8390_s6] ss:$12 sps:$4 sm:$0xff]   ;;  %v6181_v30 = vld [vmem:[%s8388_s4 + $0x198] ss:$12 sps:$4 sm:$0xff]  }
 0x1ad   : > { %2021 = vmatprep.subr.bf16.mxu0 %v6169_v31  ;;  %5386 = vmatprep.subr.bf16.mxu1 %v6321_v46  ;;  %v6182_v31 = vld [vmem:[%s8388_s4 + $0x1b4] ss:$12 sps:$4 sm:$0xff]  }
 0x1b0   : > { %2022 = vmatpush1.bf16.msra.mxu0 %v6170_v32  ;;  %5387 = vmatpush3.bf16.msra.mxu1 %v6171_v33  ;;  %v6183_v32 = vld [vmem:[%s8390_s6 + $0x18] ss:$12 sps:$4 sm:$0xff]   ;;  %v6184_v33 = vld [vmem:[%s8390_s6 + $0x34] ss:$12 sps:$4 sm:$0xff]  }
 0x1b1   : > { %2023 = vmatprep.subr.bf16.mxu0 %v6172_v36  ;;  %5388 = vmatprep.subr.bf16.mxu1 %v6321_v46  ;;  %v6185_v36 = vld [vmem:[%s8388_s4 + $0x1b0] ss:$12 sps:$4 sm:$0xff]  }
 0x1b4   : > { %2024 = vmatpush1.bf16.msra.mxu0 %v6173_v18  ;;  %5389 = vmatpush3.bf16.msra.mxu1 %v6174_v23  ;;  %v6188_v18 = vld [vmem:[%s8390_s6 + $0x4c] ss:$12 sps:$4 sm:$0xff]   ;;  %v6189_v23 = vld [vmem:[%s8388_s4 + $0x1c8] ss:$12 sps:$4 sm:$0xff]  }
 0x1b5   : > { %2036 = vmatprep.subr.bf16.mxu0 %v6175_v24  ;;  %2182 = vmatprep.subr.bf16.mxu1 %v6176_v26  ;;  %v6190_v24 = vld [vmem:[%s8388_s4 + $0x1e4] ss:$12 sps:$4 sm:$0xff]   ;;  %v6191_v26 = vld [vmem:[%s8390_s6 + $0x48] ss:$12 sps:$4 sm:$0xff]  }
 0x1b7   : > { %2026 = vmatmul.mubr.bf16.vlgmr.msra.gmra.mrb[12].mxu0 %v7190_v28  ;;  %5391 = vmatmul.mubr.bf16.vlgmr.msra.gmra.mrb[16].mxu1 %v7277_v25  ;;  %v6180_v28 = vld [vmem:[%s8390_s6 + $0x1c] ss:$12 sps:$4 sm:$0xff]  }
 0x1b8   : > { %2037 = vmatpush1.bf16.msra.mxu0 %v6177_v27  ;;  %2068 = vmatprep.mubr.bf16.mxu0 %v6323_v63  ;;  %v6192_v27 = vld [vmem:[%s8390_s6 + $0x64] ss:$12 sps:$4 sm:$0xff]  }
 0x1b9   : > { %2038 = vmatprep.subr.bf16.mxu0 %v6178_v15  ;;  %2183 = vmatpush1.bf16.msra.mxu1 %v6179_v29  ;;  %v6193_v15 = vld [vmem:[%s8388_s4 + $0x1e0] ss:$12 sps:$4 sm:$0xff]   ;;  %v6194_v29 = vld [vmem:[%s8388_s4 + $0x1fc] ss:$12 sps:$4 sm:$0xff]  }
 0x1ba   : > { %2184 = vmatprep.subr.bf16.mxu1 %v6180_v28  ;;  %v6195_v28 = vld [vmem:[%s8390_s6 + $0x60] ss:$12 sps:$4 sm:$0xff]  }
 0x1bc   : > { %2039 = vmatpush1.bf16.msra.mxu0 %v6181_v30  ;;  %v6196_v30 = vld [vmem:[%s8390_s6 + $0x7c] ss:$12 sps:$4 sm:$0xff]  }
 0x1bd   : > { %2040 = vmatprep.subr.bf16.mxu0 %v6182_v31  ;;  %2185 = vmatpush1.bf16.msra.mxu1 %v6183_v32  ;;  %v6197_v31 = vld [vmem:[%s8388_s4 + $0x1f8] ss:$12 sps:$4 sm:$0xff]   ;;  %v6198_v32 = vld [vmem:[%s8388_s4 + $0x214] ss:$12 sps:$4 sm:$0xff]  }
 0x1be   : > { %2186 = vmatprep.subr.bf16.mxu1 %v6184_v33  ;;  %v6199_v33 = vld [vmem:[%s8390_s6 + $0x78] ss:$12 sps:$4 sm:$0xff]  }
 0x1c0   : > { %2041 = vmatpush1.bf16.msra.mxu0 %v6185_v36  ;;  %v6200_v36 = vld [vmem:[%s8390_s6 + $0x94] ss:$12 sps:$4 sm:$0xff]  }
 0x1c1   : > { %2042 = vmatprep.subr.bf16.mxu0 %v6186_v13  ;;  %2187 = vmatpush1.bf16.msra.mxu1 %v6187_v17  ;;  %v6201_v13 = vld [vmem:[%s8388_s4 + $0x210] ss:$12 sps:$4 sm:$0xff]   ;;  %v6202_v17 = vld [vmem:[%s8388_s4 + $0x22c] ss:$12 sps:$4 sm:$0xff]  }
 0x1c2   : > { %2188 = vmatprep.subr.bf16.mxu1 %v6188_v18  ;;  %v6203_v18 = vld [vmem:[%s8390_s6 + $0x90] ss:$12 sps:$4 sm:$0xff]  }
 0x1c4   : > { %2043 = vmatpush1.bf16.msra.mxu0 %v6189_v23  ;;  %v6204_v23 = vld [vmem:[%s8390_s6 + $0xac] ss:$12 sps:$4 sm:$0xff]  }
 0x1c5   : > { %2044 = vmatprep.subr.bf16.mxu0 %v6190_v24  ;;  %2189 = vmatpush1.bf16.msra.mxu1 %v6191_v26  ;;  %v6205_v24 = vld [vmem:[%s8388_s4 + $0x228] ss:$12 sps:$4 sm:$0xff]  }
 0x1c6   : > { %2190 = vmatprep.subr.bf16.mxu1 %v6192_v27  ;;  %v6206_v26 = vld [vmem:[%s8390_s6 + $0xa8] ss:$12 sps:$4 sm:$0xff]  }
 0x1c7   : > { %v6207_v27 = vld [vmem:[%s8390_s6 + $0xc8] ss:$12 sps:$4 sm:$0xff]  }
 0x1c8   : > { %2045 = vmatpush1.bf16.msra.mxu0 %v6193_v15  ;;  %v6208_v15 = vld [vmem:[%s8390_s6 + $0xc4] ss:$12 sps:$4 sm:$0xff]  }
 0x1c9   : > { %2046 = vmatprep.subr.bf16.mxu0 %v6194_v29  ;;  %2191 = vmatpush1.bf16.msra.mxu1 %v6195_v28  ;;  %v6209_v29 = vld [vmem:[%s8390_s6 + $0x8] ss:$12 sps:$4 sm:$0xff]   ;;  %v6210_v28 = vld [vmem:[%s8390_s6 + $0xc0] ss:$12 sps:$4 sm:$0xff]  }
 0x1ca   : > { %2192 = vmatprep.subr.bf16.mxu1 %v6196_v30  ;;  %v6211_v30 = vld [vmem:[%s8390_s6 + $0xe0] ss:$12 sps:$4 sm:$0xff]  }
 0x1cc   : > { %2047 = vmatpush1.bf16.msra.mxu0 %v6197_v31  ;;  %v6212_v31 = vld [vmem:[%s8390_s6 + $0xdc] ss:$12 sps:$4 sm:$0xff]  }
 0x1cd   : > { %2048 = vmatprep.subr.bf16.mxu0 %v6198_v32  ;;  %2193 = vmatpush1.bf16.msra.mxu1 %v6199_v33  ;;  %v6214_v32 = vld [vmem:[%s8390_s6 + $0xd8] ss:$12 sps:$4 sm:$0xff]  }
 0x1ce   : > { %2194 = vmatprep.subr.bf16.mxu1 %v6200_v36  ;;  %v6215_v33 = vld [vmem:[%s8390_s6 + $0xf8] ss:$12 sps:$4 sm:$0xff]   ;;  %v6216_v36 = vld [vmem:[%s8390_s6 + $0xf4] ss:$12 sps:$4 sm:$0xff]  }
 0x1d0   : > { %2049 = vmatpush1.bf16.msra.mxu0 %v6201_v13  ;;  %v6217_v13 = vld [vmem:[%s8390_s6 + $0x38] ss:$12 sps:$4 sm:$0xff]  }
 0x1d1   : > { %2050 = vmatprep.subr.bf16.mxu0 %v6202_v17  ;;  %2195 = vmatpush1.bf16.msra.mxu1 %v6203_v18  ;;  %v6218_v17 = vld [vmem:[%s8390_s6 + $0xf0] ss:$12 sps:$4 sm:$0xff]  }
 0x1d2   : > { %2196 = vmatprep.subr.bf16.mxu1 %v6204_v23  ;;  %v6219_v18 = vld [vmem:[%s8390_s6 + $0x110] ss:$12 sps:$4 sm:$0xff]  }
 0x1d3   : > { %v6220_v23 = vld [vmem:[%s8390_s6 + $0x50] ss:$12 sps:$4 sm:$0xff]  }
 0x1d4   : > { %2051 = vmatpush1.bf16.msra.mxu0 %v6205_v24  ;;  %v6221_v24 = vld [vmem:[%s8390_s6 + $0x128] ss:$12 sps:$4 sm:$0xff]  }
 0x1d5   : > { %2197 = vmatpush1.bf16.msra.mxu1 %v6206_v26  ;;  %5201 = vmatprep.subr.bf16.mxu0 %v6207_v27  ;;  %v6222_v26 = vld [vmem:[%s8390_s6 + $0x68] ss:$12 sps:$4 sm:$0xff]  }
 0x1d6   : > { %2198 = vmatprep.subr.bf16.mxu1 %v6208_v15 }
 0x1d7   : > { %2069 = vmatmul.mubr.bf16.vlgmr.msra.gmra.mrb[12].mxu0 %v7277_v25  ;;  %v6213_v25 = vld [vmem:[%s8390_s6 + $0x20] ss:$12 sps:$4 sm:$0xff]  }
 0x1d8   : > { %5202 = vmatpush3.bf16.msra.mxu0 %v6209_v29 }
 0x1d9   : > { %2199 = vmatpush1.bf16.msra.mxu1 %v6210_v28  ;;  %5203 = vmatprep.subr.bf16.mxu0 %v6211_v30 }
 0x1da   : > { %2200 = vmatprep.subr.bf16.mxu1 %v6212_v31 }
 0x1dc   : > { %5204 = vmatpush3.bf16.msra.mxu0 %v6213_v25 }
 0x1dd   : > { %2201 = vmatpush1.bf16.msra.mxu1 %v6214_v32  ;;  %5205 = vmatprep.subr.bf16.mxu0 %v6215_v33 }
 0x1de   : > { %2202 = vmatprep.subr.bf16.mxu1 %v6216_v36 }
 0x1e0   : > { %5206 = vmatpush3.bf16.msra.mxu0 %v6217_v13 }
 0x1e1   : > { %2203 = vmatpush1.bf16.msra.mxu1 %v6218_v17  ;;  %5207 = vmatprep.subr.bf16.mxu0 %v6219_v18 }
 0x1e2   : > { %2204 = vmatprep.subr.bf16.mxu1 %v6813_v51  ;;  %v6223_v51 = vld [vmem:[%s8390_s6 + $0x140] ss:$12 sps:$4 sm:$0xff]  }
 0x1e4   : > { %5208 = vmatpush3.bf16.msra.mxu0 %v6220_v23 }
 0x1e5   : > { %2205 = vmatpush1.bf16.msra.mxu1 %v6818_v52  ;;  %5209 = vmatprep.subr.bf16.mxu0 %v6221_v24  ;;  %v6224_v52 = vld [vmem:[%s8390_s6 + $0x80] ss:$12 sps:$4 sm:$0xff]  }
 0x1e6   : > { %2206 = vmatprep.subr.bf16.mxu1 %v6823_v53 }
 0x1e8   : > { %5210 = vmatpush3.bf16.msra.mxu0 %v6222_v26 }
 0x1e9   : > { %2207 = vmatpush1.bf16.msra.mxu1 %v6829_v54  ;;  %5211 = vmatprep.subr.bf16.mxu0 %v6223_v51 }
 0x1ea   : > { %2208 = vmatprep.subr.bf16.mxu1 %v6834_v55 }
 0x1ec   : > { %5212 = vmatpush3.bf16.msra.mxu0 %v6224_v52 }
 0x1ed   : > { %2209 = vmatpush1.bf16.msra.mxu1 %v6841_v56  ;;  %5213 = vmatprep.subr.bf16.mxu0 %v6854_v58  ;;  %v7449_v58 = vld [vmem:[%s8391_s7] sm:$0x7] }
 0x1ee   : > { %2210 = vmatprep.subr.bf16.mxu1 %v6849_v57 }
 0x1f0   : > { %5214 = vmatpush3.bf16.msra.mxu0 %v6864_v60 }
 0x1f1   : > { %2211 = vmatpush1.bf16.msra.mxu1 %v6859_v59  ;;  %5215 = vmatprep.subr.bf16.mxu0 %v6878_v62  ;;  %v7453_v59 = vrot.slane %v7449_v58, %v6905_v10 }
 0x1f2   : > { %2212 = vmatprep.subr.bf16.mxu1 %v6873_v61 }
 0x1f4   : > { %5216 = vmatpush3.bf16.msra.mxu0 %v6888_v1 }
 0x1f5   : > { %2213 = vmatpush1.bf16.msra.mxu1 %v6883_v0  ;;  %5394 = vmatprep.subr.bf16.mxu0 %v6321_v46 }
 0x1f6   : > { %2225 = vmatprep.subr.bf16.mxu1 %v6897_v2 }
 0x22a   : > { %v5155_v53 = vpop.f32.mrb[4].mxu0 }
 0x22b   : > { %v5156_v54 = vpop.f32.mrb[5].mxu0 }
 0x22c   : > { %v5157_v55 = vadd.f32 %v5156_v54, %v5155_v53  ;;  %v5158_v56 = vpop.f32.mrb[6].mxu0 }
 0x22d   : > { %v5159_v57 = vpop.f32.mrb[7].mxu0 }
 0x22e   : > { %v1945_v60 = vadd.f32 %v5157_v55, %v7453_v59 }
 0x24a   : > { %v7456_v61 = vpop.f32.mrb[8].mxu1  ;;  %v1984_v62 = vpop.f32.mrb[8].mxu0 }
 0x24b   : > { %v7458_v0 = vadd.f32 %v1984_v62, %v1945_v60  ;;  %v7460_v1 = vpop.f32.mrb[9].mxu1  ;;  %v5372_v2 = vpop.f32.mrb[9].mxu0 }
 0x24c   : > { %v1907_v27 = vpop.f32.mrb[10].mxu1  ;;  %v1987_v15 = vpop.f32.mrb[10].mxu0 }
 0x24d   : > { %v1908_v29 = vpop.f32.mrb[11].mxu1  ;;  %v5373_v28 = vpop.f32.mrb[11].mxu0 }
 0x26a   : > { %v5186_v30 = vpop.f32.mrb[12].mxu1 }
 0x26b   : > { %v5187_v31 = vpop.f32.mrb[13].mxu1 }
 0x26c   : > { %v5188_v25 = vadd.f32 %v5187_v31, %v5186_v30  ;;  %v5189_v32 = vpop.f32.mrb[14].mxu1 }
 0x26d   : > { %v5190_v33 = vpop.f32.mrb[15].mxu1 }
 0x26e   : > { %v5191_v36 = vadd.f32 %v5190_v33, %v5189_v32  ;;  %v2114_v13 = vadd.f32 %v5188_v25, %v6911_v12 }
 0x270   : > { %v2117_v17 = vadd.f32 %v5191_v36, %v6911_v12 }
 0x28a   : > { %v2154_v18 = vpop.f32.mrb[16].mxu1 }
 0x28b   : > { %v2155_v23 = vadd.f32 %v2154_v18, %v2114_v13  ;;  %v5392_v24 = vpop.f32.mrb[17].mxu1 }
 0x28c   : > { %v2157_v26 = vpop.f32.mrb[18].mxu1  ;;  %v5860_v24 = vld [vmem:[%s8393_s9 + $0x120] ss:$16 sps:$4 sm:$0xff]  }
 0x28d   : > { %vm2163_vm4 = vcmp.ge.f32.partialorder %v2155_v23, 0.0  ;;  %v2169_v51 = vmul.f32 0.1, %v2155_v23  ;;  %v2158_v52 = vadd.f32 %v2157_v26, %v2117_v17  ;;  %v5393_v53 = vpop.f32.mrb[19].mxu1  ;;  %v5868_v26 = vld [vmem:[%s8393_s9 + $0x144] ss:$16 sps:$4 sm:$0xff]  }
 0x28e   : > { %v5869_v53 = vld [vmem:[%s8393_s9 + $0x260] ss:$16 sps:$4 sm:$0xff]  }
 0x28f   : > { %v2175_v54 = vsel %vm2163_vm4, %v2155_v23, %v2169_v51  ;;  %vm2166_vm5 = vcmp.ge.f32.partialorder %v2158_v52, 0.0  ;;  %v2172_v55 = vmul.f32 0.1, %v2158_v52  ;;  %v5866_v51 = vld [vmem:[%s8393_s9 + $0x140] ss:$16 sps:$4 sm:$0xff]  }
 0x291   : > { %v2178_v56 = vsel %vm2166_vm5, %v2158_v52, %v2172_v55  ;;  %v5871_v52 = vld [vmem:[%s8393_s9 + $0x264] ss:$16 sps:$4 sm:$0xff]   ;;  %v5872_v55 = vld [vmem:[%s8393_s9 + $0x160] ss:$16 sps:$4 sm:$0xff]  }
 0x292   : > { %v7464_v57 = vpack.c.bf16 %v2178_v56, %v2175_v54  ;;  %v5874_v54 = vld [vmem:[%s8393_s9 + $0x164] ss:$16 sps:$4 sm:$0xff]  }
 0x293   : > { %v5877_v56 = vld [vmem:[%s8393_s9 + $0x284] ss:$16 sps:$4 sm:$0xff]  }
 0x2aa   : > { %v2070_v60 = vpop.f32.mrb[12].mxu0 }
 0x2ab   : > { %v5550_v62 = vadd.f32 %v2070_v60, %v6923_v21  ;;  %v2072_v2 = vpop.f32.mrb[13].mxu0  ;;  %v5880_v60 = vld [vmem:[%s8393_s9 + $0x184] ss:$16 sps:$4 sm:$0xff]  }
 0x2ac   : > { %v5551_v12 = vadd.f32 %v2072_v2, %v6926_v22  ;;  %v2074_v27 = vpop.f32.mrb[14].mxu0  ;;  %v5883_v2 = vld [vmem:[%s8393_s9 + $0x2a4] ss:$16 sps:$4 sm:$0xff]  }
 0x2ad   : > { %v2167_v15 = vmul.f32 0.1, %v5550_v62  ;;  %v5552_v29 = vadd.f32 %v2074_v27, %v6923_v21  ;;  %v2076_v28 = vpop.f32.mrb[15].mxu0  ;;  %vm2161_vm6 = vcmp.ge.f32.partialorder %v5550_v62, 0.0  ;;  %v5829_v21 = vld [vmem:[%s8393_s9 + $0x4] ss:$16 sps:$4 sm:$0xff]  }
 0x2ae   : > { %v2168_v30 = vmul.f32 0.1, %v5551_v12  ;;  %v5553_v31 = vadd.f32 %v2076_v28, %v6926_v22  ;;  %vm2162_vm7 = vcmp.ge.f32.partialorder %v5551_v12, 0.0  ;;  %v5827_v22 = vld [vmem:[%s8393_s9] ss:$16 sps:$4 sm:$0xff]  }
 0x2af   : > { %vm2164_vm8 = vcmp.ge.f32.partialorder %v5552_v29, 0.0  ;;  %v2170_v25 = vmul.f32 0.1, %v5552_v29  ;;  %v2173_v33 = vsel %vm2161_vm6, %v5550_v62, %v2167_v15  ;;  %v5878_v62 = vld [vmem:[%s8393_s9 + $0x180] ss:$16 sps:$4 sm:$0xff]  }
 0x2b0   : > { %vm2165_vm9 = vcmp.ge.f32.partialorder %v5553_v31, 0.0  ;;  %v2171_v32 = vmul.f32 0.1, %v5553_v31  ;;  %v2174_v17 = vsel %vm2162_vm7, %v5551_v12, %v2168_v30  ;;  %v5881_v12 = vld [vmem:[%s8393_s9 + $0x2a0] ss:$16 sps:$4 sm:$0xff]  }
 0x2b1   : > { %v2176_v36 = vsel %vm2164_vm8, %v5552_v29, %v2170_v25  ;;  %v5886_v27 = vld [vmem:[%s8393_s9 + $0x1a4] ss:$16 sps:$4 sm:$0xff]   ;;  %v5884_v15 = vld [vmem:[%s8393_s9 + $0x1a0] ss:$16 sps:$4 sm:$0xff]  }
 0x2b2   : > { %v2179_v13 = vpack.c.bf16 %v2176_v36, %v2173_v33  ;;  %v2177_v18 = vsel %vm2165_vm9, %v5553_v31, %v2171_v32  ;;  %v5889_v29 = vld [vmem:[%s8393_s9 + $0x2c4] ss:$16 sps:$4 sm:$0xff]   ;;  %v5887_v28 = vld [vmem:[%s8393_s9 + $0x2c0] ss:$16 sps:$4 sm:$0xff]  }
 0x2b3   : > { %v2180_v23 = vpack.c.bf16 %v2177_v18, %v2174_v17  ;;  %v5892_v30 = vld [vmem:[%s8393_s9 + $0x1c4] ss:$16 sps:$4 sm:$0xff]   ;;  %v5890_v31 = vld [vmem:[%s8393_s9 + $0x1c0] ss:$16 sps:$4 sm:$0xff]   ;;  %v5904_v17 = vld [vmem:[%s8393_s9 + $0x20c] ss:$16 sps:$4 sm:$0xff]  }
 0x2b4   : > { %v5893_v25 = vld [vmem:[%s8393_s9 + $0x2e0] ss:$16 sps:$4 sm:$0xff]   ;;  %v5895_v32 = vld [vmem:[%s8393_s9 + $0x2e4] ss:$16 sps:$4 sm:$0xff]  }
 0x2b5   : > { %2214 = vmatprep.mubr.bf16.mxu1 %v2180_v23  ;;  %2300 = vmatprep.mubr.bf16.mxu0 %v2180_v23  ;;  %v5898_v33 = vld [vmem:[%s8393_s9 + $0x1e4] ss:$16 sps:$4 sm:$0xff]   ;;  %v5896_v36 = vld [vmem:[%s8393_s9 + $0x1e0] ss:$16 sps:$4 sm:$0xff]  }
 0x2b6   : > { %2215 = vmatmul.mubr.bf16.vlgmr.msra.gmra.mrb[20].mxu1 %v2179_v13  ;;  %2301 = vmatmul.mubr.bf16.vlgmr.msra.gmra.mrb[16].mxu0 %v2179_v13  ;;  %v5901_v13 = vld [vmem:[%s8393_s9 + $0xc] ss:$16 sps:$4 sm:$0xff]  }
 0x2b7   : > { %2226 = vmatpush1.bf16.msra.mxu1 %v6933_v34  ;;  %5395 = vmatpush3.bf16.msra.mxu0 %v6938_v35  ;;  %v5832_v34 = vld [vmem:[%s8393_s9 + $0x24] ss:$16 sps:$4 sm:$0xff]   ;;  %v5830_v35 = vld [vmem:[%s8393_s9 + $0x20] ss:$16 sps:$4 sm:$0xff]  }
 0x2b8   : > { %2227 = vmatprep.subr.bf16.mxu1 %v6943_v37  ;;  %5396 = vmatprep.subr.bf16.mxu0 %v6321_v46  ;;  %v5835_v37 = vld [vmem:[%s8393_s9 + $0x44] ss:$16 sps:$4 sm:$0xff]  }
 0x2b9   : > { %2257 = vmatprep.mubr.bf16.mxu1 %v6323_v63  ;;  %5410 = vmatprep.mubr.msk.bf16.mxu0 %vm6322_vm0, %v6321_v46 }
 0x2bb   : > { %2228 = vmatpush1.bf16.msra.mxu1 %v6950_v38  ;;  %5397 = vmatpush3.bf16.msra.mxu0 %v6955_v39  ;;  %v5833_v38 = vld [vmem:[%s8393_s9 + $0x40] ss:$16 sps:$4 sm:$0xff]   ;;  %v5838_v39 = vld [vmem:[%s8393_s9 + $0x64] ss:$16 sps:$4 sm:$0xff]  }
 0x2bc   : > { %2229 = vmatprep.subr.bf16.mxu1 %v6962_v40  ;;  %5398 = vmatprep.subr.bf16.mxu0 %v6321_v46  ;;  %v5836_v40 = vld [vmem:[%s8393_s9 + $0x60] ss:$16 sps:$4 sm:$0xff]  }
 0x2bf   : > { %2230 = vmatpush1.bf16.msra.mxu1 %v6972_v41  ;;  %5399 = vmatpush3.bf16.msra.mxu0 %v6977_v42  ;;  %v5841_v41 = vld [vmem:[%s8393_s9 + $0x84] ss:$16 sps:$4 sm:$0xff]   ;;  %v5839_v42 = vld [vmem:[%s8393_s9 + $0x80] ss:$16 sps:$4 sm:$0xff]  }
 0x2c0   : > { %2231 = vmatprep.subr.bf16.mxu1 %v6984_v43  ;;  %5400 = vmatprep.subr.bf16.mxu0 %v6321_v46  ;;  %v5844_v43 = vld [vmem:[%s8393_s9 + $0xa4] ss:$16 sps:$4 sm:$0xff]  }
 0x2c3   : > { %2232 = vmatpush1.bf16.msra.mxu1 %v6991_v44  ;;  %5401 = vmatpush3.bf16.msra.mxu0 %v6996_v45  ;;  %v5851_v44 = vld [vmem:[%s8393_s9 + $0x200] ss:$16 sps:$4 sm:$0xff]   ;;  %v5853_v45 = vld [vmem:[%s8393_s9 + $0x204] ss:$16 sps:$4 sm:$0xff]  }
 0x2c4   : > { %2233 = vmatprep.subr.bf16.mxu1 %v7003_v47  ;;  %5402 = vmatprep.subr.bf16.mxu0 %v6321_v46  ;;  %v5859_v47 = vld [vmem:[%s8393_s9 + $0x224] ss:$16 sps:$4 sm:$0xff]  }
 0x2c7   : > { %2234 = vmatpush1.bf16.msra.mxu1 %v7010_v48  ;;  %5403 = vmatpush3.bf16.msra.mxu0 %v7015_v49  ;;  %v5842_v48 = vld [vmem:[%s8393_s9 + $0xa0] ss:$16 sps:$4 sm:$0xff]  }
 0x2c8   : > { %2235 = vmatprep.subr.bf16.mxu1 %v7022_v50  ;;  %5404 = vmatprep.subr.bf16.mxu0 %v6321_v46  ;;  %v5857_v49 = vld [vmem:[%s8393_s9 + $0x220] ss:$16 sps:$4 sm:$0xff]   ;;  %v5847_v50 = vld [vmem:[%s8393_s9 + $0xc4] ss:$16 sps:$4 sm:$0xff]  }
 0x2cb   : > { %2236 = vmatpush1.bf16.msra.mxu1 %v7029_v3  ;;  %5405 = vmatpush3.bf16.msra.mxu0 %v7034_v4  ;;  %v5865_v3 = vld [vmem:[%s8393_s9 + $0x244] ss:$16 sps:$4 sm:$0xff]   ;;  %v5845_v4 = vld [vmem:[%s8393_s9 + $0xc0] ss:$16 sps:$4 sm:$0xff]  }
 0x2cc   : > { %2237 = vmatprep.subr.bf16.mxu1 %v7041_v5  ;;  %5406 = vmatprep.subr.bf16.mxu0 %v6321_v46  ;;  %v5863_v5 = vld [vmem:[%s8393_s9 + $0x240] ss:$16 sps:$4 sm:$0xff]  }
 0x2cf   : > { %2238 = vmatpush1.bf16.msra.mxu1 %v7048_v6  ;;  %5407 = vmatpush3.bf16.msra.mxu0 %v7053_v7  ;;  %v5850_v6 = vld [vmem:[%s8393_s9 + $0xe4] ss:$16 sps:$4 sm:$0xff]   ;;  %v5848_v7 = vld [vmem:[%s8393_s9 + $0xe0] ss:$16 sps:$4 sm:$0xff]  }
 0x2d0   : > { %2239 = vmatprep.subr.bf16.mxu1 %v7061_v11  ;;  %5408 = vmatprep.subr.bf16.mxu0 %v6321_v46  ;;  %v5856_v11 = vld [vmem:[%s8393_s9 + $0x104] ss:$16 sps:$4 sm:$0xff]  }
 0x2d3   : > { %2240 = vmatpush1.bf16.msra.mxu1 %v7070_v14  ;;  %5409 = vmatpush3.bf16.msra.mxu0 %v7075_v16  ;;  %v5854_v14 = vld [vmem:[%s8393_s9 + $0x100] ss:$16 sps:$4 sm:$0xff]   ;;  %v5862_v16 = vld [vmem:[%s8393_s9 + $0x124] ss:$16 sps:$4 sm:$0xff]  }
 0x2d4   : > { %3009 = vmatprep.subr.bf16.mxu0 %v5829_v21  ;;  %3050 = vmatprep.subr.bf16.mxu1 %v5853_v45 }
 0x2d6   : > { %2258 = vmatmul.mubr.bf16.vlgmr.msra.gmra.mrb[20].mxu1 %v7464_v57  ;;  %5411 = vmatmul.mubr.bf16.vlgmr.msra.gmra.mrb[20].mxu0 %v7464_v57  ;;  %v5875_v57 = vld [vmem:[%s8393_s9 + $0x280] ss:$16 sps:$4 sm:$0xff]  }
 0x2d7   : > { %3010 = vmatpush1.bf16.msra.mxu0 %v5827_v22  ;;  %3082 = vmatprep.mubr.bf16.mxu1 %v6323_v63 }
 0x2d8   : > { %3011 = vmatprep.subr.bf16.mxu0 %v5832_v34  ;;  %3051 = vmatpush1.bf16.msra.mxu1 %v5851_v44 }
 0x2d9   : > { %3052 = vmatprep.subr.bf16.mxu1 %v5859_v47  ;;  %v7667_v47 = vrot.slane %v7449_v58, %v6920_v20 }
 0x2db   : > { %3012 = vmatpush1.bf16.msra.mxu0 %v5830_v35 }
 0x2dc   : > { %3013 = vmatprep.subr.bf16.mxu0 %v5835_v37  ;;  %3053 = vmatpush1.bf16.msra.mxu1 %v5857_v49  ;;  %v2352_v37 = vadd.s32 8, %v6902_v9 }
 0x2dd   : > { %3054 = vmatprep.subr.bf16.mxu1 %v5865_v3 }
 0x2de   : > { %vm2354_vm10 = vcmp.lt.s32.totalorder %v2352_v37, 12  ;;  %v5913_v37 = vld [vmem:[%s8393_s9 + $0x4c] ss:$16 sps:$4 sm:$0xff]  }
 0x2df   : > { %3014 = vmatpush1.bf16.msra.mxu0 %v5833_v38 }
 0x2e0   : > { %3015 = vmatprep.subr.bf16.mxu0 %v5838_v39  ;;  %3055 = vmatpush1.bf16.msra.mxu1 %v5863_v5 }
 0x2e1   : > { %3056 = vmatprep.subr.bf16.mxu1 %v5871_v52 }
 0x2e3   : > { %3016 = vmatpush1.bf16.msra.mxu0 %v5836_v40 }
 0x2e4   : > { %3017 = vmatprep.subr.bf16.mxu0 %v5841_v41  ;;  %3057 = vmatpush1.bf16.msra.mxu1 %v5869_v53  ;;  %v7660_v41 = vrot.slane %v7449_v58, %v6917_v19 }
 0x2e5   : > { %3058 = vmatprep.subr.bf16.mxu1 %v5877_v56 }
 0x2e7   : > { %3018 = vmatpush1.bf16.msra.mxu0 %v5839_v42 }
 0x2e8   : > { %3019 = vmatprep.subr.bf16.mxu0 %v5844_v43  ;;  %3059 = vmatpush1.bf16.msra.mxu1 %v5875_v57 }
 0x2e9   : > { %3060 = vmatprep.subr.bf16.mxu1 %v5883_v2 }
 0x2eb   : > { %3020 = vmatpush1.bf16.msra.mxu0 %v5842_v48 }
 0x2ec   : > { %3021 = vmatprep.subr.bf16.mxu0 %v5847_v50  ;;  %3061 = vmatpush1.bf16.msra.mxu1 %v5881_v12 }
 0x2ed   : > { %3062 = vmatprep.subr.bf16.mxu1 %v5889_v29 }
 0x2ef   : > { %3022 = vmatpush1.bf16.msra.mxu0 %v5845_v4 }
 0x2f0   : > { %3023 = vmatprep.subr.bf16.mxu0 %v5850_v6  ;;  %3063 = vmatpush1.bf16.msra.mxu1 %v5887_v28 }
 0x2f1   : > { %3064 = vmatprep.subr.bf16.mxu1 %v5895_v32 }
 0x2f3   : > { %3024 = vmatpush1.bf16.msra.mxu0 %v5848_v7 }
 0x2f4   : > { %3025 = vmatprep.subr.bf16.mxu0 %v5856_v11  ;;  %3065 = vmatpush1.bf16.msra.mxu1 %v5893_v25 }
 0x2f5   : > { %3091 = vmatprep.subr.bf16.mxu1 %v5901_v13 }
 0x2f7   : > { %3026 = vmatpush1.bf16.msra.mxu0 %v5854_v14 }
 0x2f8   : > { %3027 = vmatprep.subr.bf16.mxu0 %v5862_v16 }
 0x2fb   : > { %3028 = vmatpush1.bf16.msra.mxu0 %v5860_v24 }
 0x2fc   : > { %3029 = vmatprep.subr.bf16.mxu0 %v5868_v26 }
 0x2ff   : > { %3030 = vmatpush1.bf16.msra.mxu0 %v5866_v51 }
 0x300   : > { %3031 = vmatprep.subr.bf16.mxu0 %v5874_v54 }
 0x303   : > { %3032 = vmatpush1.bf16.msra.mxu0 %v5872_v55 }
 0x304   : > { %3033 = vmatprep.subr.bf16.mxu0 %v5880_v60 }
 0x307   : > { %3034 = vmatpush1.bf16.msra.mxu0 %v5878_v62 }
 0x308   : > { %3035 = vmatprep.subr.bf16.mxu0 %v5886_v27 }
 0x30b   : > { %3036 = vmatpush1.bf16.msra.mxu0 %v5884_v15 }
 0x30c   : > { %3037 = vmatprep.subr.bf16.mxu0 %v5892_v30 }
 0x30f   : > { %3038 = vmatpush1.bf16.msra.mxu0 %v5890_v31 }
 0x310   : > { %3039 = vmatprep.subr.bf16.mxu0 %v5898_v33 }
 0x313   : > { %3040 = vmatpush1.bf16.msra.mxu0 %v5896_v36  ;;  %v5899_v36 = vld [vmem:[%s8393_s9 + $0x8] ss:$16 sps:$4 sm:$0xff]  }
 0x314   : > { %3132 = vmatprep.subr.bf16.mxu0 %v5904_v17 }
 0x389   : > { %v5217_v18 = vpop.f32.mrb[16].mxu0 }
 0x38a   : > { %v5218_v23 = vpop.f32.mrb[17].mxu0 }
 0x38b   : > { %v5219_v21 = vadd.f32 %v5218_v23, %v5217_v18  ;;  %v5220_v22 = vpop.f32.mrb[18].mxu0  ;;  %v5902_v23 = vld [vmem:[%s8393_s9 + $0x208] ss:$16 sps:$4 sm:$0xff]  }
 0x38c   : > { %v5221_v34 = vpop.f32.mrb[19].mxu0 }
 0x38d   : > { %v5222_v35 = vadd.f32 %v5221_v34, %v5220_v22  ;;  %v2303_v38 = vadd.f32 %v5219_v21, %v7453_v59  ;;  %v5907_v21 = vld [vmem:[%s8393_s9 + $0x2c] ss:$16 sps:$4 sm:$0xff]  }
 0x38e   : > { %v5910_v34 = vld [vmem:[%s8393_s9 + $0x22c] ss:$16 sps:$4 sm:$0xff]  }
 0x38f   : > { %v2306_v45 = vadd.f32 %v5222_v35, %v7453_v59  ;;  %v5905_v35 = vld [vmem:[%s8393_s9 + $0x28] ss:$16 sps:$4 sm:$0xff]  }
 0x3a9   : > { %v2259_v39 = vpop.f32.mrb[20].mxu1  ;;  %v2343_v40 = vpop.f32.mrb[20].mxu0 }
 0x3aa   : > { %v7662_v42 = vadd.f32 %v2343_v40, %v2303_v38  ;;  %v2261_v43 = vpop.f32.mrb[21].mxu1  ;;  %v5412_v44 = vpop.f32.mrb[21].mxu0  ;;  %v7671_v6 = vadd.f32 %v2259_v39, %v7660_v41  ;;  %v5908_v38 = vld [vmem:[%s8393_s9 + $0x228] ss:$16 sps:$4 sm:$0xff]   ;;  %v5916_v39 = vld [vmem:[%s8393_s9 + $0x24c] ss:$16 sps:$4 sm:$0xff]  }
 0x3ab   : > { %v2263_v48 = vpop.f32.mrb[22].mxu1  ;;  %v2346_v49 = vpop.f32.mrb[22].mxu0  ;;  %v7675_v11 = vadd.f32 %v2261_v43, %v7667_v47  ;;  %v5911_v40 = vld [vmem:[%s8393_s9 + $0x48] ss:$16 sps:$4 sm:$0xff]   ;;  %v5919_v43 = vld [vmem:[%s8393_s9 + $0x6c] ss:$16 sps:$4 sm:$0xff]  }
 0x3ac   : > { %v5556_v50 = vadd.f32 %v2263_v48, %v7660_v41  ;;  %v2347_v3 = vadd.f32 %v2346_v49, %v2306_v45  ;;  %v2265_v4 = vpop.f32.mrb[23].mxu1  ;;  %v5413_v5 = vpop.f32.mrb[23].mxu0  ;;  %v5914_v44 = vld [vmem:[%s8393_s9 + $0x248] ss:$16 sps:$4 sm:$0xff]   ;;  %v5922_v45 = vld [vmem:[%s8393_s9 + $0x26c] ss:$16 sps:$4 sm:$0xff]  }
 0x3ad   : > { %v5557_v7 = vadd.f32 %v2265_v4, %v7667_v47  ;;  %v5917_v48 = vld [vmem:[%s8393_s9 + $0x68] ss:$16 sps:$4 sm:$0xff]   ;;  %v5925_v49 = vld [vmem:[%s8393_s9 + $0x8c] ss:$16 sps:$4 sm:$0xff]  }
 0x3ae   : > { %v7677_v59 = vsel %vm2354_vm10, %v5556_v50, 0.0  ;;  %v7679_v58 = vsel %vm2354_vm10, %v2347_v3, 0.0  ;;  %v5920_v50 = vld [vmem:[%s8393_s9 + $0x268] ss:$16 sps:$4 sm:$0xff]   ;;  %v5928_v3 = vld [vmem:[%s8393_s9 + $0x28c] ss:$16 sps:$4 sm:$0xff]  }
 0x3af   : > { %v2373_v14 = vadd.f32 %v7671_v6, %v7677_v59  ;;  %v2387_v16 = vadd.f32 %v7679_v58, %v7662_v42  ;;  %v7685_v24 = vsel %vm2354_vm10, %v5557_v7, 0.0  ;;  %v5923_v4 = vld [vmem:[%s8393_s9 + $0x88] ss:$16 sps:$4 sm:$0xff]   ;;  %v5931_v5 = vld [vmem:[%s8393_s9 + $0xac] ss:$16 sps:$4 sm:$0xff]  }
 0x3b0   : > { %v2380_v26 = vadd.f32 %v7675_v11, %v7685_v24  ;;  %v5926_v7 = vld [vmem:[%s8393_s9 + $0x288] ss:$16 sps:$4 sm:$0xff]  }
 0x3b1   : > { %v2374_v51 = vrot.slane %v2373_v14, 4  ;;  %v2388_v52 = vrot.slane %v2387_v16, 4 }
 0x3b2   : > { %v2381_v53 = vrot.slane %v2380_v26, 4 }
 0x3b3   : > { %v2375_v54 = vadd.f32 %v2374_v51, %v2373_v14  ;;  %v2389_v55 = vadd.f32 %v2388_v52, %v2387_v16  ;;  %v5934_v14 = vld [vmem:[%s8393_s9 + $0x2ac] ss:$16 sps:$4 sm:$0xff]   ;;  %v5929_v16 = vld [vmem:[%s8393_s9 + $0xa8] ss:$16 sps:$4 sm:$0xff]  }
 0x3b4   : > { %v2382_v56 = vadd.f32 %v2381_v53, %v2380_v26  ;;  %v5937_v26 = vld [vmem:[%s8393_s9 + $0xcc] ss:$16 sps:$4 sm:$0xff]   ;;  %v5932_v51 = vld [vmem:[%s8393_s9 + $0x2a8] ss:$16 sps:$4 sm:$0xff]  }
 0x3b5   : > { %v2376_v57 = vrot.slane %v2375_v54, 2  ;;  %v2390_v60 = vrot.slane %v2389_v55, 2  ;;  %v5940_v52 = vld [vmem:[%s8393_s9 + $0x2cc] ss:$16 sps:$4 sm:$0xff]   ;;  %v5935_v53 = vld [vmem:[%s8393_s9 + $0xc8] ss:$16 sps:$4 sm:$0xff]  }
 0x3b6   : > { %v2383_v62 = vrot.slane %v2382_v56, 2 }
 0x3b7   : > { %v2377_v2 = vadd.f32 %v2376_v57, %v2375_v54  ;;  %v2391_v12 = vadd.f32 %v2390_v60, %v2389_v55  ;;  %v5943_v54 = vld [vmem:[%s8393_s9 + $0xec] ss:$16 sps:$4 sm:$0xff]   ;;  %v5938_v55 = vld [vmem:[%s8393_s9 + $0x2c8] ss:$16 sps:$4 sm:$0xff]  }
 0x3b8   : > { %v2384_v27 = vadd.f32 %v2383_v62, %v2382_v56  ;;  %v5946_v56 = vld [vmem:[%s8393_s9 + $0x2ec] ss:$16 sps:$4 sm:$0xff]   ;;  %v5941_v57 = vld [vmem:[%s8393_s9 + $0xe8] ss:$16 sps:$4 sm:$0xff]  }
 0x3b9   : > { %v2378_v15 = vrot.slane %v2377_v2, 1  ;;  %v2392_v29 = vrot.slane %v2391_v12, 1  ;;  %v5949_v60 = vld [vmem:[%s8393_s9 + $0x10c] ss:$16 sps:$4 sm:$0xff]   ;;  %v5944_v62 = vld [vmem:[%s8393_s9 + $0x2e8] ss:$16 sps:$4 sm:$0xff]  }
 0x3ba   : > { %v2385_v28 = vrot.slane %v2384_v27, 1 }
 0x3bb   : > { %v2393_v30 = vadd.f32 %v2392_v29, %v2391_v12  ;;  %v2379_v31 = vadd.f32 %v2378_v15, %v2377_v2  ;;  %v7793_v2 = vld [vmem:[%s636_s29] sm:$0xff]  ;;  %v7795_v12 = vld [vmem:[%s636_s29 + $0x8] sm:$0xff]  ;;  %s6225_s29 = scalar_lea.vmem %s4607_s17, 64 }
 0x3bc   : > { %v2386_v25 = vadd.f32 %v2385_v28, %v2384_v27  ;;  %v5952_v27 = vld [vmem:[%s8392_s8 + $0x4] ss:$16 sps:$4 sm:$0xff]   ;;  %v5947_v15 = vld [vmem:[%s8393_s9 + $0x108] ss:$16 sps:$4 sm:$0xff]   ;;  %v5955_v29 = vld [vmem:[%s8393_s9 + $0x12c] ss:$16 sps:$4 sm:$0xff]   ;;  %v2365_v28 = vadd.f32 %v7795_v12, %v7793_v2  ;;  %p6226_p11 = scmp.ne.s32.totalorder %s4607_s17, %s6225_s29  ;;  %p6233_p1 = scmp.lt.s32.totalorder %s6231_s27, %s6225_s29 }
 0x3bd   : > { %v2396_v32 = vmul.f32 0.083333336, %v2393_v30  ;;  %v2394_v33 = vmul.f32 0.083333336, %v2379_v31  ;;  %v5950_v30 = vld [vmem:[%s8392_s8] ss:$16 sps:$4 sm:$0xff]  }
 0x3be   : > { %v2395_v13 = vmul.f32 0.083333336, %v2386_v25  ;;  %v5958_v31 = vld [vmem:[%s8392_s8 + $0x24] ss:$16 sps:$4 sm:$0xff]   ;;  %v5953_v25 = vld [vmem:[%s8393_s9 + $0x128] ss:$16 sps:$4 sm:$0xff]   ;;  %p6227_p12 = pnand %p6226_p11, %p6459_p5  ;;  %p6234_p2 = por %p6233_p1, %p6232_p0 }
 0x3bf   : > { %v7692_v17 = vpack.c.bf16 %v2396_v32, %v2396_v32  ;;  %v7701_v22 = vpack.c.bf16 %v2394_v33, %v2394_v33  ;;  %v5961_v32 = vld [vmem:[%s8393_s9 + $0x14c] ss:$16 sps:$4 sm:$0xff]   ;;  %v2366_v33 = vrot.slane %v2365_v28, 4 }
 0x3c0   : > { %v2431_v18 = vpack.c.bf16 %v2395_v13, %v2395_v13  ;;  %v5964_v13 = vld [vmem:[%s8392_s8 + $0x44] ss:$16 sps:$4 sm:$0xff]   ;;  %p6228_p13 = pneg %p6227_p12 }
 0x3c1   : > { %3083 = vmatmul.mubr.bf16.vlgmr.msra.gmra.mrb[24].mxu1 %v7692_v17 }
 0x3c2   : > { %3092 = vmatpush1.bf16.msra.mxu1 %v5899_v36  ;;  %3041 = vmatprep.mubr.bf16.mxu0 %v2431_v18  ;;  %v5956_v36 = vld [vmem:[%s8392_s8 + $0x20] ss:$16 sps:$4 sm:$0xff]   ;;  %p6235_p3 = pnand %p6234_p2, %p6228_p13 }
 0x3c3   : > { %3123 = vmatprep.mubr.bf16.mxu1 %v2431_v18  ;;  %3042 = vmatmul.mubr.bf16.vlgmr.msra.gmra.mrb[24].mxu0 %v7701_v22  ;;  %v5967_v18 = vld [vmem:[%s8393_s9 + $0x16c] ss:$16 sps:$4 sm:$0xff]  }
 0x3c4   : > { %3133 = vmatpush1.bf16.msra.mxu0 %v5902_v23  ;;  %3093 = vmatprep.subr.bf16.mxu1 %v5907_v21  ;;  %v2367_v23 = vadd.f32 %v2366_v33, %v2365_v28  ;;  %v5962_v21 = vld [vmem:[%s8392_s8 + $0x40] ss:$16 sps:$4 sm:$0xff]   ;;  %v6000_v28 = vld [vmem:[%s8392_s8 + $0x28] ss:$16 sps:$4 sm:$0xff]  }
 0x3c5   : > { %3134 = vmatprep.subr.bf16.mxu0 %v5910_v34  ;;  %3164 = vmatprep.mubr.bf16.mxu0 %v6323_v63  ;;  %v5970_v34 = vld [vmem:[%s8392_s8 + $0x64] ss:$16 sps:$4 sm:$0xff]   ;;  %v6013_v33 = vld [vmem:[%s8396_s12 + $0x58] sm:$0xff]  }
 0x3c6   : > { %3094 = vmatpush1.bf16.msra.mxu1 %v5905_v35  ;;  %v5965_v35 = vld [vmem:[%s8393_s9 + $0x168] ss:$16 sps:$4 sm:$0xff]  }
 0x3c7   : > { %3095 = vmatprep.subr.bf16.mxu1 %v5913_v37  ;;  %v5973_v37 = vld [vmem:[%s8393_s9 + $0x18c] ss:$16 sps:$4 sm:$0xff]  }
 0x3c8   : > { %3135 = vmatpush1.bf16.msra.mxu0 %v5908_v38  ;;  %v2368_v38 = vrot.slane %v2367_v23, 2 }
 0x3c9   : > { %3136 = vmatprep.subr.bf16.mxu0 %v5916_v39  ;;  %v5968_v39 = vld [vmem:[%s8392_s8 + $0x60] ss:$16 sps:$4 sm:$0xff]  }
 0x3ca   : > { %3096 = vmatpush1.bf16.msra.mxu1 %v5911_v40  ;;  %v5976_v40 = vld [vmem:[%s8392_s8 + $0x84] ss:$16 sps:$4 sm:$0xff]  }
 0x3cb   : > { %3097 = vmatprep.subr.bf16.mxu1 %v5919_v43  ;;  %v5971_v43 = vld [vmem:[%s8393_s9 + $0x188] ss:$16 sps:$4 sm:$0xff]  }
 0x3cc   : > { %3137 = vmatpush1.bf16.msra.mxu0 %v5914_v44  ;;  %v5979_v44 = vld [vmem:[%s8393_s9 + $0x1ac] ss:$16 sps:$4 sm:$0xff]  }
 0x3cd   : > { %3138 = vmatprep.subr.bf16.mxu0 %v5922_v45  ;;  %v2369_v45 = vadd.f32 %v2368_v38, %v2367_v23  ;;  %v6015_v23 = vld [vmem:[%s8392_s8 + $0x88] ss:$16 sps:$4 sm:$0xff]   ;;  %v6027_v38 = vld [vmem:[%s8392_s8 + $0xcc] ss:$16 sps:$4 sm:$0xff]  }
 0x3ce   : > { %3098 = vmatpush1.bf16.msra.mxu1 %v5917_v48  ;;  %v5974_v48 = vld [vmem:[%s8392_s8 + $0x80] ss:$16 sps:$4 sm:$0xff]  }
 0x3cf   : > { %3099 = vmatprep.subr.bf16.mxu1 %v5925_v49  ;;  %v5982_v49 = vld [vmem:[%s8392_s8 + $0xa4] ss:$16 sps:$4 sm:$0xff]  }
 0x3d0   : > { %3139 = vmatpush1.bf16.msra.mxu0 %v5920_v50  ;;  %v5977_v50 = vld [vmem:[%s8393_s9 + $0x1a8] ss:$16 sps:$4 sm:$0xff]  }
 0x3d1   : > { %3140 = vmatprep.subr.bf16.mxu0 %v5928_v3  ;;  %v5985_v3 = vld [vmem:[%s8393_s9 + $0x1cc] ss:$16 sps:$4 sm:$0xff]  }
 0x3d2   : > { %3100 = vmatpush1.bf16.msra.mxu1 %v5923_v4  ;;  %v2370_v4 = vrot.slane %v2369_v45, 1 }
 0x3d3   : > { %3101 = vmatprep.subr.bf16.mxu1 %v5931_v5  ;;  %v5980_v5 = vld [vmem:[%s8392_s8 + $0xa0] ss:$16 sps:$4 sm:$0xff]  }
 0x3d4   : > { %3141 = vmatpush1.bf16.msra.mxu0 %v5926_v7  ;;  %v5988_v7 = vld [vmem:[%s8392_s8 + $0xc4] ss:$16 sps:$4 sm:$0xff]  }
 0x3d5   : > { %3142 = vmatprep.subr.bf16.mxu0 %v5934_v14  ;;  %v5983_v14 = vld [vmem:[%s8393_s9 + $0x1c8] ss:$16 sps:$4 sm:$0xff]  }
 0x3d6   : > { %3102 = vmatpush1.bf16.msra.mxu1 %v5929_v16  ;;  %v5991_v16 = vld [vmem:[%s8393_s9 + $0x1ec] ss:$16 sps:$4 sm:$0xff]  }
 0x3d7   : > { %3103 = vmatprep.subr.bf16.mxu1 %v5937_v26  ;;  %v2371_v26 = vadd.f32 %v2370_v4, %v2369_v45  ;;  %v6029_v45 = vld [vmem:[%s8396_s12 + $0x30] sm:$0xff]   ;;  %v6035_v4 = vld [vmem:[%s8396_s12 + $0x80] sm:$0xff]  }
 0x3d8   : > { %3143 = vmatpush1.bf16.msra.mxu0 %v5932_v51  ;;  %v5986_v51 = vld [vmem:[%s8392_s8 + $0xc0] ss:$16 sps:$4 sm:$0xff]  }
 0x3d9   : > { %3144 = vmatprep.subr.bf16.mxu0 %v5940_v52  ;;  %v5994_v52 = vld [vmem:[%s8392_s8 + $0xe4] ss:$16 sps:$4 sm:$0xff]  }
 0x3da   : > { %3104 = vmatpush1.bf16.msra.mxu1 %v5935_v53  ;;  %v5989_v53 = vld [vmem:[%s8393_s9 + $0x1e8] ss:$16 sps:$4 sm:$0xff]  }
 0x3db   : > { %3105 = vmatprep.subr.bf16.mxu1 %v5943_v54  ;;  %v5997_v54 = vld [vmem:[%s8392_s8 + $0xc] ss:$16 sps:$4 sm:$0xff]  }
 0x3dc   : > { %3145 = vmatpush1.bf16.msra.mxu0 %v5938_v55  ;;  %v2372_v55 = vmul.f32 0.083333336, %v2371_v26  ;;  %v6041_v26 = vld [vmem:[%s8396_s12 + $0xb0] sm:$0xff]  }
 0x3dd   : > { %3146 = vmatprep.subr.bf16.mxu0 %v5946_v56  ;;  %v5992_v56 = vld [vmem:[%s8392_s8 + $0xe0] ss:$16 sps:$4 sm:$0xff]  }
 0x3de   : > { %3106 = vmatpush1.bf16.msra.mxu1 %v5941_v57  ;;  %v5998_v57 = vld [vmem:[%s8396_s12 + $0x40] sm:$0xff]  }
 0x3df   : > { %3107 = vmatprep.subr.bf16.mxu1 %v5949_v60  ;;  %v5549_v60 = vadd.f32 %v7460_v1, %v7667_v47  ;;  %v6003_v1 = vld [vmem:[%s8396_s12 + $0x48] sm:$0xff]  }
 0x3e0   : > { %3147 = vmatpush1.bf16.msra.mxu0 %v5944_v62  ;;  %v5995_v62 = vld [vmem:[%s8392_s8 + $0x8] ss:$16 sps:$4 sm:$0xff]  }
 0x3e1   : > { %3333 = vmatprep.subr.bf16.mxu0 %v5952_v27  ;;  %v7905_v27 = vpack.c.bf16 %v2372_v55, %v2372_v55  ;;  %v3511_v47 = vpack.c.bf16 %v5549_v60, %v5549_v60  ;;  %v6045_v55 = vld [vmem:[%s8395_s11 + $0x10] sm:$0xff]  }
 0x3e2   : > { %3108 = vmatpush1.bf16.msra.mxu1 %v5947_v15  ;;  %v6002_v15 = vld [vmem:[%s8392_s8 + $0x2c] ss:$16 sps:$4 sm:$0xff]   ;;  %v6049_v60 = vld [vmem:[%s8395_s11 + $0x30] sm:$0xff]  }
 0x3e3   : > { %3165 = vmatmul.mubr.bf16.vlgmr.msra.gmra.mrb[28].mxu0 %v7692_v17  ;;  %3109 = vmatprep.subr.bf16.mxu1 %v5955_v29  ;;  %v5959_v17 = vld [vmem:[%s8393_s9 + $0x148] ss:$16 sps:$4 sm:$0xff]   ;;  %v5999_v29 = vld [vmem:[%s8396_s12] sm:$0xff]  }
 0x3e4   : > { %3334 = vmatpush1.bf16.msra.mxu0 %v5950_v30  ;;  %3365 = vmatprep.mubr.bf16.mxu0 %v6323_v63  ;;  %v6004_v30 = vld [vmem:[%s8396_s12 + $0x8] sm:$0xff]  }
 0x3e5   : > { %3335 = vmatprep.subr.bf16.mxu0 %v5958_v31  ;;  %v6008_v31 = vld [vmem:[%s8396_s12 + $0x50] sm:$0xff]  }
 0x3e6   : > { %3110 = vmatpush1.bf16.msra.mxu1 %v5953_v25  ;;  %v6012_v25 = vld [vmem:[%s8392_s8 + $0x6c] ss:$16 sps:$4 sm:$0xff]  }
 0x3e7   : > { %3111 = vmatprep.subr.bf16.mxu1 %v5961_v32  ;;  %v6009_v32 = vld [vmem:[%s8396_s12 + $0x10] sm:$0xff]  }
 0x3e8   : > { %3336 = vmatpush1.bf16.msra.mxu0 %v5956_v36  ;;  %v6010_v36 = vld [vmem:[%s8392_s8 + $0x68] ss:$16 sps:$4 sm:$0xff]  }
 0x3e9   : > { %3337 = vmatprep.subr.bf16.mxu0 %v5964_v13  ;;  %v6017_v13 = vld [vmem:[%s8392_s8 + $0x8c] ss:$16 sps:$4 sm:$0xff]  }
 0x3ea   : > { %3112 = vmatpush1.bf16.msra.mxu1 %v5959_v17  ;;  %v6014_v17 = vld [vmem:[%s8396_s12 + $0x18] sm:$0xff]  }
 0x3eb   : > { %3113 = vmatprep.subr.bf16.mxu1 %v5967_v18  ;;  %v6018_v18 = vld [vmem:[%s8396_s12 + $0x60] sm:$0xff]  }
 0x3ec   : > { %3338 = vmatpush1.bf16.msra.mxu0 %v5962_v21  ;;  %v6022_v21 = vld [vmem:[%s8392_s8 + $0xac] ss:$16 sps:$4 sm:$0xff]  }
 0x3ed   : > { %3339 = vmatprep.subr.bf16.mxu0 %v5970_v34  ;;  %v6019_v34 = vld [vmem:[%s8396_s12 + $0x20] sm:$0xff]  }
 0x3ee   : > { %3114 = vmatpush1.bf16.msra.mxu1 %v5965_v35  ;;  %v6023_v35 = vld [vmem:[%s8396_s12 + $0x68] sm:$0xff]  }
 0x3ef   : > { %3115 = vmatprep.subr.bf16.mxu1 %v5973_v37  ;;  %v6020_v37 = vld [vmem:[%s8392_s8 + $0xa8] ss:$16 sps:$4 sm:$0xff]  }
 0x3f0   : > { %3340 = vmatpush1.bf16.msra.mxu0 %v5968_v39  ;;  %v6024_v39 = vld [vmem:[%s8396_s12 + $0x28] sm:$0xff]  }
 0x3f1   : > { %3341 = vmatprep.subr.bf16.mxu0 %v5976_v40  ;;  %v6028_v40 = vld [vmem:[%s8396_s12 + $0x70] sm:$0xff]  }
 0x3f2   : > { %3116 = vmatpush1.bf16.msra.mxu1 %v5971_v43  ;;  %v6025_v43 = vld [vmem:[%s8392_s8 + $0xc8] ss:$16 sps:$4 sm:$0xff]  }
 0x3f3   : > { %3117 = vmatprep.subr.bf16.mxu1 %v5979_v44  ;;  %v6032_v44 = vld [vmem:[%s8392_s8 + $0xec] ss:$16 sps:$4 sm:$0xff]  }
 0x3f4   : > { %3342 = vmatpush1.bf16.msra.mxu0 %v5974_v48  ;;  %v6033_v48 = vld [vmem:[%s8396_s12 + $0x78] sm:$0xff]  }
 0x3f5   : > { %3343 = vmatprep.subr.bf16.mxu0 %v5982_v49  ;;  %v6030_v49 = vld [vmem:[%s8392_s8 + $0xe8] ss:$16 sps:$4 sm:$0xff]  }
 0x3f6   : > { %3118 = vmatpush1.bf16.msra.mxu1 %v5977_v50  ;;  %v6034_v50 = vld [vmem:[%s8396_s12 + $0x38] sm:$0xff]  }
 0x3f7   : > { %3119 = vmatprep.subr.bf16.mxu1 %v5985_v3  ;;  %v5548_v3 = vadd.f32 %v7456_v61, %v7660_v41  ;;  %v6037_v61 = vld [vmem:[%s8396_s12 + $0x90] sm:$0xff]   ;;  %v6038_v41 = vld [vmem:[%s8396_s12 + $0x98] sm:$0xff]  }
 0x3f8   : > { %3344 = vmatpush1.bf16.msra.mxu0 %v5980_v5 }
 0x3f9   : > { %3345 = vmatprep.subr.bf16.mxu0 %v5988_v7  ;;  %v3510_v5 = vpack.c.bf16 %v5548_v3, %v5548_v3  ;;  %v6036_v7 = vld [vmem:[%s8396_s12 + $0x88] sm:$0xff]  }
 0x3fa   : > { %3120 = vmatpush1.bf16.msra.mxu1 %v5983_v14  ;;  %v6039_v14 = vld [vmem:[%s8396_s12 + $0xa0] sm:$0xff]  }
 0x3fb   : > { %3121 = vmatprep.subr.bf16.mxu1 %v5991_v16  ;;  %v6040_v16 = vld [vmem:[%s8396_s12 + $0xa8] sm:$0xff]  }
 0x3fc   : > { %3346 = vmatpush1.bf16.msra.mxu0 %v5986_v51  ;;  %v6042_v51 = vld [vmem:[%s8396_s12 + $0xb8] sm:$0xff]  }
 0x3fd   : > { %3347 = vmatprep.subr.bf16.mxu0 %v5994_v52  ;;  %v6043_v52 = vld [vmem:[%s8395_s11] sm:$0xff]  }
 0x3fe   : > { %3122 = vmatpush1.bf16.msra.mxu1 %v5989_v53  ;;  %v3512_v53 = vpack.c.bf16 %v7458_v0, %v7458_v0  ;;  %v6046_v0 = vld [vmem:[%s8395_s11 + $0x18] sm:$0xff]  }
 0x3ff   : > { %3374 = vmatprep.subr.bf16.mxu1 %v5997_v54  ;;  %v6044_v54 = vld [vmem:[%s8395_s11 + $0x8] sm:$0xff]  }
 0x400   : > { %3348 = vmatpush1.bf16.msra.mxu0 %v5992_v56  ;;  %v6047_v56 = vld [vmem:[%s8395_s11 + $0x20] sm:$0xff]  }
 0x401   : > { %3124 = vmatmul.mubr.bf16.vlgmr.msra.gmra.mrb[28].mxu1 %v7701_v22  ;;  %5232 = vmatprep.subr.bf16.mxu0 %v5998_v57  ;;  %v6007_v22 = vld [vmem:[%s8392_s8 + $0x4c] ss:$16 sps:$4 sm:$0xff]  }
 0x402   : > { %3375 = vmatpush1.bf16.msra.mxu1 %v5995_v62  ;;  %3406 = vmatprep.mubr.bf16.mxu1 %v6323_v63  ;;  %v6005_v63 = vld [vmem:[%s8392_s8 + $0x48] ss:$16 sps:$4 sm:$0xff]  }
 0x403   : > { %3366 = vmatmul.mubr.bf16.vlgmr.msra.gmra.mrb[32].mxu0 %v7905_v27  ;;  %3376 = vmatprep.subr.bf16.mxu1 %v6002_v15  ;;  %v6048_v57 = vld [vmem:[%s8395_s11 + $0x28] sm:$0xff]   ;;  %v6050_v62 = vld [vmem:[%s8395_s11 + $0x38] sm:$0xff]  }
 0x404   : > { %5233 = vmatpush3.bf16.msra.mxu0 %v5999_v29  ;;  %3737 = vmatprep.mubr.bf16.mxu0 %v3511_v47  ;;  %v6051_v29 = vld [vmem:[%s8398_s14 + $0x40] sm:$0xff]   ;;  %v6053_v47 = vld [vmem:[%s8398_s14 + $0x48] sm:$0xff]  }
 0x405   : > { %5234 = vmatprep.subr.bf16.mxu0 %v6003_v1  ;;  %v6052_v1 = vld [vmem:[%s8398_s14] sm:$0xff]  }
 0x406   : > { %3377 = vmatpush1.bf16.msra.mxu1 %v6000_v28  ;;  %v6054_v28 = vld [vmem:[%s8398_s14 + $0x8] sm:$0xff]  }
 0x407   : > { %3378 = vmatprep.subr.bf16.mxu1 %v6007_v22  ;;  %v6055_v22 = vld [vmem:[%s8398_s14 + $0x50] sm:$0xff]  }
 0x408   : > { %5235 = vmatpush3.bf16.msra.mxu0 %v6004_v30  ;;  %v6056_v30 = vld [vmem:[%s8398_s14 + $0x10] sm:$0xff]  }
 0x409   : > { %5236 = vmatprep.subr.bf16.mxu0 %v6008_v31  ;;  %v6057_v31 = vld [vmem:[%s8398_s14 + $0x58] sm:$0xff]  }
 0x40a   : > { %3379 = vmatpush1.bf16.msra.mxu1 %v6005_v63  ;;  %v6058_v63 = vld [vmem:[%s8398_s14 + $0x18] sm:$0xff]  }
 0x40b   : > { %3380 = vmatprep.subr.bf16.mxu1 %v6012_v25  ;;  %v6059_v25 = vld [vmem:[%s8398_s14 + $0x60] sm:$0xff]  }
 0x40c   : > { %5237 = vmatpush3.bf16.msra.mxu0 %v6009_v32  ;;  %v6060_v32 = vld [vmem:[%s8398_s14 + $0x20] sm:$0xff]  }
 0x40d   : > { %5238 = vmatprep.subr.bf16.mxu0 %v6013_v33  ;;  %v6061_v33 = vld [vmem:[%s8398_s14 + $0x68] sm:$0xff]  }
 0x40e   : > { %3381 = vmatpush1.bf16.msra.mxu1 %v6010_v36  ;;  %v6062_v36 = vld [vmem:[%s8398_s14 + $0x28] sm:$0xff]  }
 0x40f   : > { %3382 = vmatprep.subr.bf16.mxu1 %v6017_v13  ;;  %v6063_v13 = vld [vmem:[%s8398_s14 + $0x70] sm:$0xff]  }
 0x410   : > { %5239 = vmatpush3.bf16.msra.mxu0 %v6014_v17  ;;  %v6064_v17 = vld [vmem:[%s8398_s14 + $0x30] sm:$0xff]  }
 0x411   : > { %5240 = vmatprep.subr.bf16.mxu0 %v6018_v18 }
 0x412   : > { %3383 = vmatpush1.bf16.msra.mxu1 %v6015_v23  ;;  %v6065_v23 = vld [vmem:[%s8398_s14 + $0x78] sm:$0xff]  }
 0x413   : > { %3384 = vmatprep.subr.bf16.mxu1 %v6022_v21  ;;  %v6066_v21 = vld [vmem:[%s8398_s14 + $0x38] sm:$0xff]  }
 0x414   : > { %5241 = vmatpush3.bf16.msra.mxu0 %v6019_v34 }
 0x415   : > { %5242 = vmatprep.subr.bf16.mxu0 %v6023_v35 }
 0x416   : > { %3385 = vmatpush1.bf16.msra.mxu1 %v6020_v37 }
 0x417   : > { %3386 = vmatprep.subr.bf16.mxu1 %v6027_v38 }
 0x418   : > { %5243 = vmatpush3.bf16.msra.mxu0 %v6024_v39 }
 0x419   : > { %5244 = vmatprep.subr.bf16.mxu0 %v6028_v40 }
 0x41a   : > { %3387 = vmatpush1.bf16.msra.mxu1 %v6025_v43 }
 0x41b   : > { %3388 = vmatprep.subr.bf16.mxu1 %v6032_v44 }
 0x41c   : > { %5245 = vmatpush3.bf16.msra.mxu0 %v6029_v45 }
 0x41d   : > { %5246 = vmatprep.subr.bf16.mxu0 %v6033_v48 }
 0x41e   : > { %3389 = vmatpush1.bf16.msra.mxu1 %v6030_v49 }
 0x41f   : > { %5414 = vmatprep.subr.bf16.mxu1 %v6321_v46 }
 0x420   : > { %5247 = vmatpush3.bf16.msra.mxu0 %v6034_v50 }
 0x421   : > { %3407 = vmatmul.mubr.bf16.vlgmr.msra.gmra.mrb[32].mxu1 %v7905_v27  ;;  %v8073_v27 = vld [vmem:[%s626_s30] sm:$0xf]  ;;  %5272 = vmatprep.subr.bf16.mxu0 %v6051_v29  ;;  %s4580_s30 = scalar_lea.sflag [#allocation5], %s8263_s19 }
 0x422   : > { %5415 = vmatpush3.bf16.msra.mxu1 %v6035_v4  ;;  %5430 = vmatprep.mubr.msk.bf16.mxu1 %vm6322_vm0, %v6321_v46  ;;  %v3493_v15 = vpack.c.bf16 %v8073_v27, %v8073_v27  ;;  %v3415_v4 = vld [vmem:[%s8394_s10] sm:$0xf] }
 0x423   : > { %3738 = vmatmul.mubr.bf16.vlgmr.msra.gmra.mrb[36].mxu0 %v3510_v5  ;;  %5416 = vmatprep.subr.bf16.mxu1 %v6321_v46 }
 0x424   : > { %5273 = vmatpush3.bf16.msra.mxu0 %v6052_v1 }
 0x425   : > { %5274 = vmatprep.subr.bf16.mxu0 %v6053_v47 }
 0x426   : > { %5417 = vmatpush3.bf16.msra.mxu1 %v6036_v7 }
 0x427   : > { %5418 = vmatprep.subr.bf16.mxu1 %v6321_v46 }
 0x428   : > { %5275 = vmatpush3.bf16.msra.mxu0 %v6054_v28 }
 0x429   : > { %5276 = vmatprep.subr.bf16.mxu0 %v6055_v22 }
 0x42a   : > { %5419 = vmatpush3.bf16.msra.mxu1 %v6037_v61 }
 0x42b   : > { %5420 = vmatprep.subr.bf16.mxu1 %v6321_v46 }
 0x42c   : > { %5277 = vmatpush3.bf16.msra.mxu0 %v6056_v30 }
 0x42d   : > { %5278 = vmatprep.subr.bf16.mxu0 %v6057_v31 }
 0x42e   : > { %5421 = vmatpush3.bf16.msra.mxu1 %v6038_v41  ;;  %v3420_v41 = vrot.slane %v3415_v4, %v6917_v19 }
 0x42f   : > { %5422 = vmatprep.subr.bf16.mxu1 %v6321_v46 }
 0x430   : > { %5279 = vmatpush3.bf16.msra.mxu0 %v6058_v63 }
 0x431   : > { %5280 = vmatprep.subr.bf16.mxu0 %v6059_v25 }
 0x432   : > { %5423 = vmatpush3.bf16.msra.mxu1 %v6039_v14 }
 0x433   : > { %5424 = vmatprep.subr.bf16.mxu1 %v6321_v46 }
 0x434   : > { %5281 = vmatpush3.bf16.msra.mxu0 %v6060_v32 }
 0x435   : > { %5282 = vmatprep.subr.bf16.mxu0 %v6061_v33 }
 0x436   : > { %5425 = vmatpush3.bf16.msra.mxu1 %v6040_v16 }
 0x437   : > { %5426 = vmatprep.subr.bf16.mxu1 %v6321_v46 }
 0x438   : > { %5283 = vmatpush3.bf16.msra.mxu0 %v6062_v36 }
 0x439   : > { %5284 = vmatprep.subr.bf16.mxu0 %v6063_v13 }
 0x43a   : > { %5427 = vmatpush3.bf16.msra.mxu1 %v6041_v26 }
 0x43b   : > { %5428 = vmatprep.subr.bf16.mxu1 %v6321_v46 }
 0x43c   : > { %5285 = vmatpush3.bf16.msra.mxu0 %v6064_v17 }
 0x43d   : > { %5286 = vmatprep.subr.bf16.mxu0 %v6065_v23 }
 0x43e   : > { %5429 = vmatpush3.bf16.msra.mxu1 %v6042_v51 }
 0x43f   : > { %5434 = vmatprep.subr.bf16.mxu1 %v6321_v46 }
 0x440   : > { %5287 = vmatpush3.bf16.msra.mxu0 %v6066_v21 }
 0x441   : > { %5431 = vmatmul.mubr.bf16.vlgmr.msra.gmra.mrb[36].mxu1 %v3512_v53  ;;  %5454 = vmatprep.subr.bf16.mxu0 %v6321_v46 }
 0x442   : > { %5435 = vmatpush3.bf16.msra.mxu1 %v6043_v52  ;;  %5450 = vmatprep.mubr.msk.bf16.mxu1 %vm6322_vm0, %v6321_v46 }
 0x443   : > { %5436 = vmatprep.subr.bf16.mxu1 %v6321_v46 }
 0x446   : > { %5437 = vmatpush3.bf16.msra.mxu1 %v6044_v54 }
 0x447   : > { %5438 = vmatprep.subr.bf16.mxu1 %v6321_v46 }
 0x44a   : > { %5439 = vmatpush3.bf16.msra.mxu1 %v6045_v55 }
 0x44b   : > { %5440 = vmatprep.subr.bf16.mxu1 %v6321_v46 }
 0x44e   : > { %5441 = vmatpush3.bf16.msra.mxu1 %v6046_v0 }
 0x44f   : > { %5442 = vmatprep.subr.bf16.mxu1 %v6321_v46 }
 0x452   : > { %5443 = vmatpush3.bf16.msra.mxu1 %v6047_v56 }
 0x453   : > { %5444 = vmatprep.subr.bf16.mxu1 %v6321_v46 }
 0x456   : > { %5445 = vmatpush3.bf16.msra.mxu1 %v6048_v57  ;;  %v3424_v57 = vrot.slane %v3415_v4, %v6920_v20 }
 0x457   : > { %5446 = vmatprep.subr.bf16.mxu1 %v6321_v46 }
 0x45a   : > { %5447 = vmatpush3.bf16.msra.mxu1 %v6049_v60 }
 0x45b   : > { %5448 = vmatprep.subr.bf16.mxu1 %v6321_v46 }
 0x45e   : > { %5449 = vmatpush3.bf16.msra.mxu1 %v6050_v62 }
 0x45f   : > { %5494 = vmatprep.subr.bf16.mxu1 %v6321_v46 }
 0x461   : > { %5451 = vmatmul.mubr.bf16.vlgmr.msra.gmra.mrb[36].mxu1 %v3493_v15  ;;  %v3428_v15 = vrot.slane %v3415_v4, %v6905_v10 }
 0x462   : > { %5510 = vmatprep.mubr.msk.bf16.mxu1 %vm6322_vm0, %v6321_v46 }
 0x494   : > { %v3084_v18 = vpop.f32.mrb[24].mxu1 }
 0x495   : > { %v3086_v34 = vpop.f32.mrb[25].mxu1 }
 0x496   : > { %v3043_v35 = vpop.f32.mrb[24].mxu0  ;;  %v3088_v37 = vpop.f32.mrb[26].mxu1 }
 0x497   : > { %v3085_v38 = vadd.f32 %v3084_v18, %v3043_v35  ;;  %v3045_v39 = vpop.f32.mrb[25].mxu0  ;;  %v3089_v40 = vpop.f32.mrb[27].mxu1  ;;  %v3431_v18 = vsub.s32 3, %v6902_v9 }
 0x498   : > { %v3087_v43 = vadd.f32 %v3086_v34, %v3045_v39  ;;  %v3047_v44 = vpop.f32.mrb[26].mxu0 }
 0x499   : > { %v3048_v45 = vpop.f32.mrb[27].mxu0  ;;  %v3432_v10 = vrot.slane %v3415_v4, %v3431_v18 }
 0x4b6   : > { %v3166_v48 = vpop.f32.mrb[28].mxu0 }
 0x4b7   : > { %v3168_v49 = vpop.f32.mrb[29].mxu0 }
 0x4b8   : > { %v3170_v50 = vpop.f32.mrb[30].mxu0 }
 0x4b9   : > { %v3171_v3 = vpop.f32.mrb[31].mxu0 }
 0x4ba   : > { %v6067_v3 = vld [vmem:[%s8398_s14 + $0x80] sm:$0xff]  }
 0x4d4   : > { %v3125_v5 = vpop.f32.mrb[28].mxu1 }
 0x4d5   : > { %v3167_v7 = vadd.f32 %v3166_v48, %v3125_v5  ;;  %v3127_v61 = vpop.f32.mrb[29].mxu1 }
 0x4d6   : > { %v3169_v14 = vadd.f32 %v3168_v49, %v3127_v61  ;;  %v3129_v16 = vpop.f32.mrb[30].mxu1  ;;  %v3367_v26 = vpop.f32.mrb[32].mxu0 }
 0x4d7   : > { %v3368_v51 = vadd.f32 %v3367_v26, %v3085_v38  ;;  %v3130_v52 = vpop.f32.mrb[31].mxu1  ;;  %v3369_v53 = vpop.f32.mrb[33].mxu0  ;;  %v6073_v26 = vld [vmem:[%s8398_s14 + $0xb0] sm:$0xff]  }
 0x4d8   : > { %v3370_v54 = vadd.f32 %v3369_v53, %v3087_v43  ;;  %v3371_v55 = vpop.f32.mrb[34].mxu0 }
 0x4d9   : > { %v8134_v0 = vadd.f32 %v3420_v41, %v3368_v51  ;;  %v3372_v56 = vpop.f32.mrb[35].mxu0  ;;  %v6074_v55 = vld [vmem:[%s8398_s14 + $0xb8] sm:$0xff]  }
 0x4da   : > { %v3438_v60 = vadd.f32 %v3424_v57, %v3370_v54 }
 0x4db   : > { %v5016_v41 = vmul.f32 -1.442695, %v8134_v0 }
 0x4dc   : > { %v5017_v62 = vmul.f32 -1.442695, %v3438_v60 }
 0x4de   : > { %6099 = vpow2.f32 %v5017_v62  ;;  %v6075_v62 = vld [vmem:[%s8397_s13] sm:$0xff]  }
 0x4e8   : > { %v6100_v17 = vpop.eup %6099 }
 0x4e9   : > { %v3454_v20 = vadd.f32 1.0, %v6100_v17 }
 0x4f4   : > { %v3408_v29 = vpop.f32.mrb[32].mxu1 }
 0x4f5   : > { %v3409_v1 = vadd.f32 %v3408_v29, %v3167_v7  ;;  %v3410_v47 = vpop.f32.mrb[33].mxu1 }
 0x4f6   : > { %v3411_v28 = vadd.f32 %v3410_v47, %v3169_v14  ;;  %v3412_v22 = vpop.f32.mrb[34].mxu1  ;;  %v5248_v30 = vpop.f32.mrb[36].mxu0  ;;  %v6072_v14 = vld [vmem:[%s8398_s14 + $0xa8] sm:$0xff]  }
 0x4f7   : > { %v3439_v31 = vadd.f32 %v3428_v15, %v3409_v1  ;;  %v3413_v63 = vpop.f32.mrb[35].mxu1  ;;  %v5249_v25 = vpop.f32.mrb[37].mxu0  ;;  %v6076_v47 = vld [vmem:[%s8397_s13 + $0x8] sm:$0xff]  }
 0x4f8   : > { %v5250_v32 = vadd.f32 %v5249_v25, %v5248_v30  ;;  %v5251_v33 = vpop.f32.mrb[38].mxu0  ;;  %v3440_v34 = vadd.f32 %v3432_v10, %v3411_v28  ;;  %v6079_v28 = vld [vmem:[%s8397_s13 + $0x20] sm:$0xff]   ;;  %v6080_v30 = vld [vmem:[%s8397_s13 + $0x28] sm:$0xff]   ;;  %v6081_v63 = vld [vmem:[%s8397_s13 + $0x30] sm:$0xff]  }
 0x4f9   : > { %v5018_v36 = vmul.f32 -1.442695, %v3439_v31  ;;  %v5252_v13 = vpop.f32.mrb[39].mxu0 }
 0x4fa   : > { %v5019_v37 = vmul.f32 -1.442695, %v3440_v34 }
 0x4fb   : > { %6101 = vpow2.f32 %v5018_v36 }
 0x4fc   : > { %6103 = vrcp.f32 %v3454_v20 }
 0x505   : > { %v6102_v23 = vpop.eup %6101 }
 0x506   : > { %v3455_v21 = vadd.f32 1.0, %v6102_v23  ;;  %v6104_v35 = vpop.eup %6103 }
 0x507   : > { %v3466_v38 = vadd.f32 1.0, %v6104_v35 }
 0x508   : > { %6105 = vrcp.f32 %v3455_v21 }
 0x509   : > { %6107 = vpow2.f32 %v5019_v37  ;;  %v3478_v40 = vrot.slane %v3466_v38, %v6917_v19 }
 0x50b   : > { %v3487_v45 = vmul.f32 %v7671_v6, %v3478_v40  ;;  %v3490_v9 = vmul.f32 %v3478_v40, %v7677_v59  ;;  %v6068_v6 = vld [vmem:[%s8398_s14 + $0x88] sm:$0xff]   ;;  %v6070_v59 = vld [vmem:[%s8398_s14 + $0x98] sm:$0xff]  }
 0x50d   : > { %v3890_v5 = vpack.c.bf16 %v3490_v9, %v3487_v45  ;;  %v6084_v45 = vld [vmem:[%s8399_s15 + $0x8] sm:$0xff]   ;;  %v6085_v9 = vld [vmem:[%s8399_s15 + $0x10] sm:$0xff]  }
 0x512   : > { %v6106_v39 = vpop.eup %6105 }
 0x513   : > { %v3467_v43 = vadd.f32 1.0, %v6106_v39  ;;  %v6108_v4 = vpop.eup %6107 }
 0x514   : > { %v3456_v7 = vadd.f32 1.0, %v6108_v4  ;;  %v6090_v4 = vld [vmem:[%s8399_s15 + $0x38] sm:$0xff]  }
 0x515   : > { %v3482_v44 = vrot.slane %v3467_v43, %v6917_v19 }
 0x516   : > { %6109 = vrcp.f32 %v3456_v7  ;;  %v4407_v7 = vand.u32 127, %v758_v8 }
 0x517   : > { %v3488_v48 = vmul.f32 %v7675_v11, %v3482_v44  ;;  %v3491_v49 = vmul.f32 %v3482_v44, %v7685_v24  ;;  %v6069_v11 = vld [vmem:[%s8398_s14 + $0x90] sm:$0xff]   ;;  %v6071_v24 = vld [vmem:[%s8398_s14 + $0xa0] sm:$0xff]   ;;  %6111 = vpow2.f32 %v5016_v41 }
 0x518   : > { %v6083_v44 = vld [vmem:[%s8399_s15] sm:$0xff]   ;;  %vm4408_vm11 = vcmp.lt.s32.totalorder %v4407_v7, 12 }
 0x519   : > { %v3891_v50 = vpack.c.bf16 %v3491_v49, %v3488_v48  ;;  %5495 = vmatpush3.bf16.msra.mxu1 %v6083_v44  ;;  %v6086_v48 = vld [vmem:[%s8399_s15 + $0x18] sm:$0xff]   ;;  %v6087_v49 = vld [vmem:[%s8399_s15 + $0x20] sm:$0xff]  }
 0x51a   : > { %5496 = vmatprep.subr.bf16.mxu1 %v6321_v46 }
 0x51b   : > { %4117 = vmatprep.mubr.bf16.mxu0 %v3891_v50  ;;  %v6088_v50 = vld [vmem:[%s8399_s15 + $0x28] sm:$0xff]  }
 0x51c   : > { %4118 = vmatmul.mubr.bf16.vlgmr.msra.gmra.mrb[40].mxu0 %v3890_v5  ;;  %v4256_v5 = vpack.c.bf16 %v7795_v12, %v7793_v2 }
 0x51d   : > { %5455 = vmatpush3.bf16.msra.mxu0 %v6067_v3  ;;  %5470 = vmatprep.mubr.msk.bf16.mxu0 %vm6322_vm0, %v6321_v46  ;;  %v6089_v3 = vld [vmem:[%s8399_s15 + $0x30] sm:$0xff]  }
 0x51e   : > { %5456 = vmatprep.subr.bf16.mxu0 %v6321_v46  ;;  %5497 = vmatpush3.bf16.msra.mxu1 %v6084_v45 }
 0x51f   : > { %5498 = vmatprep.subr.bf16.mxu1 %v6321_v46 }
 0x520   : > { %v6110_v61 = vpop.eup %6109 }
 0x521   : > { %5457 = vmatpush3.bf16.msra.mxu0 %v6068_v6  ;;  %v3468_v16 = vadd.f32 1.0, %v6110_v61  ;;  %v6112_v15 = vpop.eup %6111 }
 0x522   : > { %5458 = vmatprep.subr.bf16.mxu0 %v6321_v46  ;;  %v3453_v1 = vadd.f32 1.0, %v6112_v15  ;;  %5499 = vmatpush3.bf16.msra.mxu1 %v6085_v9  ;;  %v6092_v15 = vld [vmem:[%s8400_s16 + $0x8] sm:$0xff]  }
 0x523   : > { %v3486_v51 = vrot.slane %v3468_v16, %v6917_v19  ;;  %5500 = vmatprep.subr.bf16.mxu1 %v6321_v46 }
 0x524   : > { %6113 = vrcp.f32 %v3453_v1  ;;  %v6094_v1 = vld [vmem:[%s8400_s16 + $0x18] sm:$0xff]  }
 0x525   : > { %5459 = vmatpush3.bf16.msra.mxu0 %v6069_v11  ;;  %v3489_v56 = vmul.f32 %v3486_v51, %v7662_v42  ;;  %v3492_v57 = vmul.f32 %v3486_v51, %v7679_v58  ;;  %v6077_v42 = vld [vmem:[%s8397_s13 + $0x10] sm:$0xff]   ;;  %v6078_v58 = vld [vmem:[%s8397_s13 + $0x18] sm:$0xff]  }
 0x526   : > { %5460 = vmatprep.subr.bf16.mxu0 %v6321_v46  ;;  %5501 = vmatpush3.bf16.msra.mxu1 %v6086_v48 }
 0x527   : > { %v3892_v29 = vpack.c.bf16 %v3492_v57, %v3489_v56  ;;  %5502 = vmatprep.subr.bf16.mxu1 %v6321_v46 }
 0x529   : > { %5461 = vmatpush3.bf16.msra.mxu0 %v6070_v59 }
 0x52a   : > { %5462 = vmatprep.subr.bf16.mxu0 %v6321_v46  ;;  %5503 = vmatpush3.bf16.msra.mxu1 %v6087_v49 }
 0x52b   : > { %5504 = vmatprep.subr.bf16.mxu1 %v6321_v46 }
 0x52d   : > { %5463 = vmatpush3.bf16.msra.mxu0 %v6071_v24 }
 0x52e   : > { %5464 = vmatprep.subr.bf16.mxu0 %v6321_v46  ;;  %v6114_v22 = vpop.eup %6113  ;;  %5505 = vmatpush3.bf16.msra.mxu1 %v6088_v50 }
 0x52f   : > { %v3465_v31 = vadd.f32 1.0, %v6114_v22  ;;  %5506 = vmatprep.subr.bf16.mxu1 %v6321_v46 }
 0x531   : > { %5465 = vmatpush3.bf16.msra.mxu0 %v6072_v14  ;;  %v3472_v25 = vrot.slane %v3465_v31, %v6917_v19 }
 0x532   : > { %5466 = vmatprep.subr.bf16.mxu0 %v6321_v46  ;;  %5507 = vmatpush3.bf16.msra.mxu1 %v6089_v3 }
 0x533   : > { %v3473_v33 = vmul.f32 %v3472_v25, %v7793_v2  ;;  %v3474_v36 = vmul.f32 %v3472_v25, %v7795_v12  ;;  %5508 = vmatprep.subr.bf16.mxu1 %v6321_v46 }
 0x534   : > { %v3867_v52 = vpop.f32.mrb[36].mxu1 }
 0x535   : > { %v8176_v53 = vadd.f32 %v5250_v32, %v3867_v52  ;;  %5467 = vmatpush3.bf16.msra.mxu0 %v6073_v26  ;;  %v5452_v54 = vpop.f32.mrb[37].mxu1  ;;  %v6082_v32 = vld [vmem:[%s8397_s13 + $0x38] sm:$0xff]   ;;  %v3873_v13 = vpack.c.bf16 %v3474_v36, %v3473_v33 }
 0x536   : > { %v3870_v0 = vpop.f32.mrb[38].mxu1  ;;  %5468 = vmatprep.subr.bf16.mxu0 %v6321_v46  ;;  %5509 = vmatpush3.bf16.msra.mxu1 %v6090_v4 }
 0x537   : > { %v5453_v60 = vpop.f32.mrb[39].mxu1  ;;  %v4362_v43 = vpack.c.bf16 %v8176_v53, %v8176_v53  ;;  %5520 = vmatprep.subr.bf16.mxu1 %v6321_v46 }
 0x538   : > { %v6091_v60 = vld [vmem:[%s8400_s16] sm:$0xff]  }
 0x539   : > { %5469 = vmatpush3.bf16.msra.mxu0 %v6074_v55  ;;  %5511 = vmatmul.mubr.bf16.vlgmr.msra.gmra.mrb[40].mxu1 %v4256_v5 }
 0x53a   : > { %5474 = vmatprep.subr.bf16.mxu0 %v6321_v46  ;;  %5522 = vmatprep.mubr.msk.bf16.mxu1 %vm6322_vm0, %v6321_v46 }
 0x53c   : > { %5471 = vmatmul.mubr.bf16.vlgmr.msra.gmra.mrb[44].mxu0 %v3892_v29  ;;  %v6093_v29 = vld [vmem:[%s8400_s16 + $0x10] sm:$0xff]  }
 0x53d   : > { %5475 = vmatpush3.bf16.msra.mxu0 %v6075_v62  ;;  %5490 = vmatprep.mubr.msk.bf16.mxu0 %vm6322_vm0, %v6321_v46 }
 0x53e   : > { %5476 = vmatprep.subr.bf16.mxu0 %v6321_v46 }
 0x541   : > { %5477 = vmatpush3.bf16.msra.mxu0 %v6076_v47  ;;  %v6095_v47 = vld [vmem:[%s8400_s16 + $0x20] sm:$0xff]  }
 0x542   : > { %5478 = vmatprep.subr.bf16.mxu0 %v6321_v46 }
 0x545   : > { %5479 = vmatpush3.bf16.msra.mxu0 %v6077_v42  ;;  %v6096_v42 = vld [vmem:[%s8400_s16 + $0x28] sm:$0xff]  }
 0x546   : > { %5480 = vmatprep.subr.bf16.mxu0 %v6321_v46 }
 0x549   : > { %5481 = vmatpush3.bf16.msra.mxu0 %v6078_v58  ;;  %v6097_v58 = vld [vmem:[%s8400_s16 + $0x30] sm:$0xff]  }
 0x54a   : > { %5482 = vmatprep.subr.bf16.mxu0 %v6321_v46 }
 0x54d   : > { %5483 = vmatpush3.bf16.msra.mxu0 %v6079_v28  ;;  %v6098_v28 = vld [vmem:[%s8400_s16 + $0x38] sm:$0xff]  }
 0x54e   : > { %5484 = vmatprep.subr.bf16.mxu0 %v6321_v46 }
 0x551   : > { %5485 = vmatpush3.bf16.msra.mxu0 %v6080_v30 }
 0x552   : > { %5486 = vmatprep.subr.bf16.mxu0 %v6321_v46 }
 0x555   : > { %5487 = vmatpush3.bf16.msra.mxu0 %v6081_v63 }
 0x556   : > { %5488 = vmatprep.subr.bf16.mxu0 %v6321_v46 }
 0x559   : > { %5489 = vmatpush3.bf16.msra.mxu0 %v6082_v32 }
 0x55a   : > { %5514 = vmatprep.subr.bf16.mxu0 %v6321_v46 }
 0x55c   : > { %5491 = vmatmul.mubr.bf16.vlgmr.msra.gmra.mrb[44].mxu0 %v3873_v13 }
 0x55d   : > { %5516 = vmatprep.mubr.msk.bf16.mxu0 %vm6322_vm0, %v6321_v46 }
 0x5ef   : > { %v5288_v19 = vpop.f32.mrb[40].mxu0 }
 0x5f0   : > { %v5289_v17 = vpop.f32.mrb[41].mxu0 }
 0x5f1   : > { %v5290_v20 = vadd.f32 %v5289_v17, %v5288_v19  ;;  %v5291_v18 = vpop.f32.mrb[42].mxu0 }
 0x5f2   : > { %v5292_v10 = vpop.f32.mrb[43].mxu0 }
 0x5f3   : > { %v5293_v23 = vadd.f32 %v5292_v10, %v5291_v18 }
 0x60c   : > { %v4355_v51 = vpop.f32.mrb[40].mxu1 }
 0x60d   : > { %v5512_v52 = vpop.f32.mrb[41].mxu1 }
 0x60e   : > { %v4358_v53 = vpop.f32.mrb[42].mxu1 }
 0x60f   : > { %v5513_v54 = vpop.f32.mrb[43].mxu1  ;;  %v4364_v55 = vpack.c.bf16 %v4358_v53, %v4355_v51 }
 0x611   : > { %5521 = vmatpush3.bf16.msra.mxu1 %v4364_v55 }
 0x612   : > { %5526 = vmatprep.subr.bf16.mxu1 %v6321_v46 }
 0x62f   : > { %v4249_v21 = vpop.f32.mrb[44].mxu0 }
 0x630   : > { %v5559_v34 = vadd.f32 %v5290_v20, %v4249_v21  ;;  %v5492_v35 = vpop.f32.mrb[45].mxu0 }
 0x631   : > { %v4252_v37 = vpop.f32.mrb[46].mxu0 }
 0x632   : > { %v5560_v38 = vadd.f32 %v5293_v23, %v4252_v37  ;;  %v5493_v39 = vpop.f32.mrb[47].mxu0 }
 0x634   : > { %v4363_v40 = vpack.c.bf16 %v5560_v38, %v5559_v34 }
 0x636   : > { %5515 = vmatpush3.bf16.xpose.msra.mxu0 %v4363_v40 }
 0x63d   : > { %5517 = vmatmul.mubr.bf16.vlgmr.msra.gmra.mrb[48].mxu0 %v4362_v43 }
 0x710   : > { %v4399_v6 = vpop.f32.mrb[48].mxu0 }
 0x711   : > { %v4405_v11 = vmul.f32 0.088388346, %v4399_v6  ;;  %v5518_v59 = vpop.f32.mrb[49].mxu0 }
 0x712   : > { %v4402_v2 = vpop.f32.mrb[50].mxu0 }
 0x713   : > { %v5519_v12 = vpop.f32.mrb[51].mxu0  ;;  %v4409_v24 = vsel %vm4408_vm11, %v4405_v11, -1e+30  ;;  %4573 = vst.msk [vmem:[%s8269_s24] sm:$0xf] %vm4410_vm12, %v4405_v11 }
 0x714   : > { %v4411_v61 = vsel %vm4410_vm12, %v4409_v24, -inf }
 0x715   : > { %4412 = vmax.xlane.f32.xlu0 %v4411_v61 }
 0x7a2   : > { %v4413_v41 = vpop.xlane.xlu0 %4412 }
 0x7a3   : > { %v4414_v14 = vsub.f32 %v4409_v24, %v4413_v41 }
 0x7a5   : > { %v4415_v16 = vmul.f32 1.442695, %v4414_v14 }
 0x7a7   : > { %6115 = vpow2.f32 %v4415_v16 }
 0x7b1   : > { %v6116_v8 = vpop.eup %6115 }
 0x7b2   : > { %v4417_v26 = vsel %vm4410_vm12, %v6116_v8, 0.0 }
 0x7b3   : > { %4418 = vadd.xlane.f32.xlu0 %v4417_v26 }
 0x840   : > { %v4419_v0 = vpop.xlane.xlu0 %4418 }
 0x841   : > { %6117 = vrcp.f32 %v4419_v0 }
 0x84b   : > { %v6118_v56 = vpop.eup %6117 }
 0x84c   : > { %v4421_v57 = vmul.f32 %v6118_v56, %v6116_v8 }
 0x84e   : > { %v4422_v62 = vpack.c.bf16 %v4421_v57, %v4421_v57 }
 0x850   : > { %5523 = vmatmul.mubr.msk.bf16.vlgmr.msra.gmra.mrb[44].mxu1 %vm4423_vm13, %v4422_v62 }
 0x851   : > { %5527 = vmatpush3.bf16.msra.mxu1 %v6091_v60  ;;  %5542 = vmatprep.mubr.msk.bf16.mxu1 %vm6322_vm0, %v6321_v46 }
 0x852   : > { %5528 = vmatprep.subr.bf16.mxu1 %v6321_v46 }
 0x855   : > { %5529 = vmatpush3.bf16.msra.mxu1 %v6092_v15 }
 0x856   : > { %5530 = vmatprep.subr.bf16.mxu1 %v6321_v46 }
 0x859   : > { %5531 = vmatpush3.bf16.msra.mxu1 %v6093_v29 }
 0x85a   : > { %5532 = vmatprep.subr.bf16.mxu1 %v6321_v46 }
 0x85d   : > { %5533 = vmatpush3.bf16.msra.mxu1 %v6094_v1 }
 0x85e   : > { %5534 = vmatprep.subr.bf16.mxu1 %v6321_v46 }
 0x861   : > { %5535 = vmatpush3.bf16.msra.mxu1 %v6095_v47 }
 0x862   : > { %5536 = vmatprep.subr.bf16.mxu1 %v6321_v46 }
 0x865   : > { %5537 = vmatpush3.bf16.msra.mxu1 %v6096_v42 }
 0x866   : > { %5538 = vmatprep.subr.bf16.mxu1 %v6321_v46 }
 0x869   : > { %5539 = vmatpush3.bf16.msra.mxu1 %v6097_v58 }
 0x86a   : > { %5540 = vmatprep.subr.bf16.mxu1 %v6321_v46 }
 0x86d   : > { %5541 = vmatpush3.bf16.msra.mxu1 %v6098_v28 }
 0x923   : > { %v4461_v22 = vpop.f32.mrb[44].mxu1 }
 0x924   : > { %v4467_v30 = vpack.c.bf16 %v4461_v22, %v4461_v22  ;;  %v5524_v31 = vpop.f32.mrb[45].mxu1 }
 0x925   : > { %v4464_v63 = vpop.f32.mrb[46].mxu1 }
 0x926   : > { %v5525_v25 = vpop.f32.mrb[47].mxu1  ;;  %5543 = vmatmul.mubr.bf16.vlgmr.msra.gmra.mrb[48].mxu1 %v4467_v30 }
 0x927   : > { %6238 = shalt.err (!%p6235_p3)
}
 0x928   : > { %s6239_s24 = scalar_lea.hbm %s8312_s3, 64  ;;  %s6243_s20 = scalar_lea.hbm %s8402_s18, 128 }
 0x929   : > { %p6240_p4 = scmp.ne.s32.totalorder %s8312_s3, %s6239_s24  ;;  %p6244_p9 = scmp.lt.u32.totalorder %s8312_s3, %s8402_s18 }
 0x92a   : > { %p6245_p10 = scmp.lt.u32.totalorder %s6243_s20, %s6239_s24  ;;  %p6247_p12 = scmp.lt.u32.totalorder %s6239_s24, %s8312_s3 }
 0x92b   : > { %p6241_p7 = pnand %p6240_p4, %p6459_p5 }
 0x92c   : > { %p6246_p11 = por %p6245_p10, %p6244_p9 }
 0x92d   : > { %p6242_p8 = pneg %p6241_p7 }
 0x92e   : > { %p6248_p13 = por %p6247_p12, %p6246_p11 }
 0x930   : > { %p6249_p0 = pnand %p6248_p13, %p6242_p8 }
 0x932   : > { %6252 = shalt.err (!%p6249_p0)
}
 0x933   : > { %5588 = dma.vmem_to_hbm [thread:$0]  (%p6459_p5), %s4607_s17, 64, %s8312_s3, %s4580_s30  }
 0x934   : > { %s615_s29 = scalar_lea.vmem [#allocation2], %s4737_s25  ;;  %s8427_s1 = sld [smem:[#allocation18_spill]] }
 0x935   : > { %s4593_s27 = sshll.u32 %s615_s29, 4  ;;  %s4575_s25 = scalar_lea.sflag [#allocation3], %s8263_s19  ;;  %s8343_s27 = int_to_ptr.vmem [resolvable:$true] %s4593_s27 }
 0x936   : > { %s6253_s3 = scalar_lea.vmem %s8343_s27, 64  ;;  %s6325_s0 = smov [#allocation2]  }
 0x937   : > { %p6254_p1 = scmp.ne.s32.totalorder %s8343_s27, %s6253_s3  ;;  %s6257_s17 = sshll.u32 %s6325_s0, 4  ;;  %s6258_s17 = int_to_ptr.vmem [resolvable:$false] %s6257_s17 }
 0x938   : > { %s6259_s30 = scalar_lea.vmem %s6258_s17, 128  ;;  %p6260_p4 = scmp.lt.s32.totalorder %s8343_s27, %s6258_s17 }
 0x939   : > { %p6255_p2 = pnand %p6254_p1, %p6459_p5  ;;  %p6261_p7 = scmp.lt.s32.totalorder %s6259_s30, %s6253_s3 }
 0x93a   : > { %s8341_s20 = scalar_lea.hbm %s8427_s1, %s5103_s26 }
 0x93b   : > { %p6256_p3 = pneg %p6255_p2  ;;  %p6262_p8 = por %p6261_p7, %p6260_p4 }
 0x93d   : > { %p6263_p9 = pnand %p6262_p8, %p6256_p3 }
 0x9f9   : > { %v4566_v46 = vpop.f32.mrb[48].mxu1 }
 0x9fa   : > { %v4567_v32 = vadd.f32 %v4566_v46, %v8073_v27  ;;  %v5544_v33 = vpop.f32.mrb[49].mxu1 }
 0x9fb   : > { %v4569_v36 = vpop.f32.mrb[50].mxu1 }
 0x9fc   : > { %4572 = vst [vmem:[%s615_s29] sm:$0xf] %v4567_v32  ;;  %v5545_v13 = vpop.f32.mrb[51].mxu1 }
 0x9fd   : > { %6266 = shalt.err (!%p6263_p9)
}
 0x9fe   : > { %s6267_s19 = scalar_lea.hbm %s8341_s20, 64  ;;  %s6271_s23 = scalar_lea.hbm %s8427_s1, 128 }
 0x9ff   : > { %p6268_p10 = scmp.ne.s32.totalorder %s8341_s20, %s6267_s19  ;;  %p6272_p13 = scmp.lt.u32.totalorder %s8341_s20, %s8427_s1 }
 0xa00   : > { %p6273_p0 = scmp.lt.u32.totalorder %s6271_s23, %s6267_s19  ;;  %p6275_p2 = scmp.lt.u32.totalorder %s6267_s19, %s8341_s20 }
 0xa01   : > { %p6269_p11 = pnand %p6268_p10, %p6459_p5 }
 0xa02   : > { %p6274_p1 = por %p6273_p0, %p6272_p13 }
 0xa03   : > { %p6270_p12 = pneg %p6269_p11 }
 0xa04   : > { %p6276_p3 = por %p6275_p2, %p6274_p1 }
 0xa06   : > { %p6277_p4 = pnand %p6276_p3, %p6270_p12 }
 0xa08   : > { %6280 = shalt.err (!%p6277_p4)
}
 0xa09   : > { %5587 = dma.vmem_to_hbm [thread:$0]  (%p6459_p5), %s8343_s27, 64, %s8341_s20, %s4575_s25  }
 0xa0a PF: > { %s8428_s21 = sld [smem:[#allocation10_spill]]  ;;  %s8429_s3 = sld [smem:[#allocation8_spill]] }
 0xa10   : > { %p5598_p7 = scmp.ge.s32.totalorder %s8428_s21, 2  ;;  %s4618_s17 = sand.u32 1, %s8429_s3  }
 0xa11   : > { %s4619_s30 = scalar_lea.sflag [#allocation3], %s4618_s17 }
 0xa12   : > { %p5592_p8 = pnand %p5598_p7, %p6463_p6 }
 0xa14   : > { %6298 = dma.done.wait (!%p5592_p8), %s4619_s30, 64  }
 0xa15   : > { %6300 = vsyncadd (!%p5592_p8), %s4619_s30, 4294967232  ;;  %s4628_s19 = scalar_lea.sflag [#allocation5], %s4618_s17 }
 0xa16   : > { %6302 = dma.done.wait (!%p5592_p8), %s4628_s19, 64  }
 0xa17   : > { %6304 = vsyncadd (!%p5592_p8), %s4628_s19, 4294967232  ;;  %s8431_s30 = sld [smem:[#allocation11_spill]]  ;;  %s8432_s2 = sld [smem:[#allocation9_spill]] }
 0xa18   : > { %s8433_s29 = sld [smem:[#allocation12_spill]]  ;;  %s8434_s27 = smov %s6311_s28 }
 0xa1d   : > { %p32_p5 = scmp.ge.s32.totalorder %s8431_s30, 4   ;;  %s8435_s28 = smov %s8432_s2 }
 0xa1f   :  { %34 = sbr.rel (!%p32_p5) target bundleno = 11 (0xb), region = 149 }
 0xa26   :  { %4633 = vsyncpa [#allocation3], 1 }
 0xa27   :  { %4635 = vsyncpa [#allocation3 + $0x1], 1 }
 0xa28   :  { %4636 = vsyncpa [#allocation5], 1 }
 0xa29   :  { %4638 = vsyncpa [#allocation5 + $0x1], 1 }

</bundles_post_ra>
